<compile_context>
chip_gen: v7x
topology: tpu7x:2x2x1
jax: 0.10.0
libtpu: 0.0.40
codegen_flags: <defaults>
</compile_context>

<pallas_src>
import functools

import jax
import jax.numpy as jnp
import numpy as np
from jax.experimental import pallas as pl
from jax.experimental.pallas import tpu as pltpu


# ----------------------------------------------------------------------------- #
# Pallas kernels
# ----------------------------------------------------------------------------- #
def _gemm_epilogue_kernel(*refs, relu, has_res, has_att):
    """out = [relu?]((cols @ w) * scale + bias [+ res]) [* att]

    cols / w are bf16 (MXU-native); accumulation and the epilogue run in f32.
    Ref order: cols, w, scale, bias, [res], [att], out.
    """
    cols_ref, w_ref, scale_ref, bias_ref = refs[:4]
    o_ref = refs[-1]
    opt = refs[4:-1]
    idx = 0
    res_ref = att_ref = None
    if has_res:
        res_ref = opt[idx]
        idx += 1
    if has_att:
        att_ref = opt[idx]
        idx += 1

    y = jnp.dot(cols_ref[...], w_ref[...], preferred_element_type=jnp.float32)
    y = y * scale_ref[...] + bias_ref[...]
    if has_res:
        y = y + res_ref[...]
    if relu:
        y = jnp.maximum(y, 0.0)
    if has_att:
        y = y * att_ref[...]
    o_ref[...] = y


def _dual_gemm_kernel(ca_ref, wa_ref, sa_ref, ba_ref,
                      cd_ref, wd_ref, sd_ref, bd_ref,
                      oa_ref, od_ref):
    """Fused ResBlock head for the strided blocks (one launch, two outputs):
         a = relu(bn1(conv1_s2(x)))     (3x3x3, stride 2)
         r = bn_ds(conv_ds_s2(x))       (1x1x1, stride 2) -- the residual branch
    """
    a = jnp.dot(ca_ref[...], wa_ref[...], preferred_element_type=jnp.float32)
    oa_ref[...] = jnp.maximum(a * sa_ref[...] + ba_ref[...], 0.0)
    r = jnp.dot(cd_ref[...], wd_ref[...], preferred_element_type=jnp.float32)
    od_ref[...] = r * sd_ref[...] + bd_ref[...]


def _stem_pool_kernel(cols_ref, w_ref, scale_ref, bias_ref, att_ref, o_ref):
    """Fused stem: relu(bn(conv3x3x3)) -> 2x2x2 max-pool -> att multiply.

    cols_ref: (8, tmo, K) -- the leading axis enumerates the 8 conv-output voxels of
    one pooling window per pooled output row, so the pool is a max over that axis.
    Eight small MXU GEMM "taps" are unrolled statically (no in-kernel relayout).
    """
    w = w_ref[...]
    s = scale_ref[...]
    b = bias_ref[...]

    def tap(p):
        y = jnp.dot(cols_ref[p], w, preferred_element_type=jnp.float32)
        return jnp.maximum(y * s + b, 0.0)

    acc = tap(0)
    for p in range(1, 8):        # static unroll
        acc = jnp.maximum(acc, tap(p))
    o_ref[...] = acc * att_ref[0]


# ----------------------------------------------------------------------------- #
# Tiling helpers
# ----------------------------------------------------------------------------- #
def _pick_tm(rows):
    """Largest 8-aligned row tile that divides `rows` and keeps >=2 grid steps."""
    for tm in (1024, 512, 256, 128, 64, 32, 16, 8):
        if rows % tm == 0 and rows // tm >= 2:
            return tm
    return rows


def _pick_pool_tile(mp):
    """Pooled-row tile for the stem kernel (8-aligned, divides per-batch rows)."""
    for tmo in (128, 256, 64, 32, 16, 8):
        if mp % tmo == 0:
            return tmo
    assert mp % 8 == 0, "pooled rows per batch must be 8-aligned"
    return mp


# ----------------------------------------------------------------------------- #
# Pallas wrappers
# ----------------------------------------------------------------------------- #
def gemm_bn_act(cols, w, scale, bias, *, relu, res=None, att=None):
    """Pallas GEMM with fused BN affine / residual / ReLU / attention epilogue.

    cols: [R, K] (cast to bf16)   w: [K, C] (cast to bf16)
    res:  [R, C] or None (added before the ReLU)
    att:  [R, C] or None (multiplied after the ReLU)
    returns float32 [R, C].
    """
    R, K = cols.shape
    C = w.shape[1]
    tm = _pick_tm(R)
    assert R % tm == 0

    args = [cols.astype(jnp.bfloat16), w.astype(jnp.bfloat16),
            scale.reshape(1, C).astype(jnp.float32),
            bias.reshape(1, C).astype(jnp.float32)]
    in_specs = [
        pl.BlockSpec((tm, K), lambda i: (i, 0)),
        pl.BlockSpec((K, C), lambda i: (0, 0)),
        pl.BlockSpec((1, C), lambda i: (0, 0)),
        pl.BlockSpec((1, C), lambda i: (0, 0)),
    ]
    if res is not None:
        args.append(res.astype(jnp.float32))
        in_specs.append(pl.BlockSpec((tm, C), lambda i: (i, 0)))
    if att is not None:
        args.append(att.astype(jnp.float32))
        in_specs.append(pl.BlockSpec((tm, C), lambda i: (i, 0)))

    kernel = functools.partial(_gemm_epilogue_kernel, relu=relu,
                               has_res=res is not None, has_att=att is not None)
    return pl.pallas_call(
        kernel,
        out_shape=jax.ShapeDtypeStruct((R, C), jnp.float32),
        grid=(R // tm,),
        in_specs=in_specs,
        out_specs=pl.BlockSpec((tm, C), lambda i: (i, 0)),
        compiler_params=pltpu.CompilerParams(dimension_semantics=("parallel",)),
    )(*args)


# ----------------------------------------------------------------------------- #
# Conv helpers (XLA-side im2col glue; all heavy math runs in the Pallas GEMMs)
# ----------------------------------------------------------------------------- #
def _conv_patches(x, ksize, stride, padding):
    """x: [N, D, H, W, C] -> patches [N, Do, Ho, Wo, ksize^3*C] (taps major, C minor)."""
    N, D, H, W, C = x.shape
    if padding > 0:
        x = jnp.pad(x, ((0, 0),) + ((padding, padding),) * 3 + ((0, 0),))
    Do = (D + 2 * padding - ksize) // stride + 1
    Ho = (H + 2 * padding - ksize) // stride + 1
    Wo = (W + 2 * padding - ksize) // stride + 1
    patches = []
    for kd in range(ksize):
        for kh in range(ksize):
            for kw in range(ksize):
                patches.append(
                    x[:, kd:kd + Do * stride:stride,
                      kh:kh + Ho * stride:stride,
                      kw:kw + Wo * stride:stride, :])
    p = jnp.stack(patches, axis=-2)                      # [N,Do,Ho,Wo,taps,C]
    return p.reshape(N, Do, Ho, Wo, ksize ** 3 * C), (Do, Ho, Wo)


def im2col_3d(x, ksize, stride, padding):
    """x: [N, D, H, W, C] -> cols [N*Do*Ho*Wo, ksize^3*C]."""
    patches, (Do, Ho, Wo) = _conv_patches(x, ksize, stride, padding)
    N = x.shape[0]
    K = patches.shape[-1]
    return patches.reshape(N * Do * Ho * Wo, K), (N, Do, Ho, Wo)


def conv_w_to_mat(w_oidhw):
    """PyTorch Conv3d weight [Cout, Cin, kd, kh, kw] -> [k^3*Cin, Cout] (taps major)."""
    cout = w_oidhw.shape[0]
    return jnp.transpose(w_oidhw, (2, 3, 4, 1, 0)).reshape(-1, cout)


def bn_fold(gamma, beta, mean, var, eps=1e-5):
    scale = gamma / jnp.sqrt(var + eps)
    return scale, beta - mean * scale


def conv3d_bn(x, w_oidhw, bn, *, ksize, stride, padding, relu, res=None, att=None):
    """Conv3d (no bias) + folded BN [+ residual] [+ ReLU] [+ attention], one Pallas call.

    x: [N, D, H, W, Cin] f32.   res: reshapable to [N*M, Cout].   att: [N, Cout].
    Returns [N, Do, Ho, Wo, Cout] f32.
    """
    scale, bias = bn_fold(*bn)
    cols, (N, Do, Ho, Wo) = im2col_3d(x.astype(jnp.bfloat16), ksize, stride, padding)
    w = conv_w_to_mat(w_oidhw)
    cout = w.shape[1]
    M = Do * Ho * Wo
    res_rows = None if res is None else res.reshape(N * M, cout)
    att_rows = None
    if att is not None:
        att_rows = jnp.broadcast_to(att[:, None, :], (N, M, cout)).reshape(N * M, cout)
    y = gemm_bn_act(cols, w, scale, bias, relu=relu, res=res_rows, att=att_rows)
    return y.reshape(N, Do, Ho, Wo, cout)


def stem_pool_att(x, w_oidhw, bn, att):
    """Stem ConvBnReLU + MaxPool3d(2,2) + attention multiply as ONE Pallas call.

    x: [N, D, H, W, Cin] f32, att: [N, Cout].  Returns [N, D/2, H/2, W/2, Cout] f32.
    """
    N = x.shape[0]
    C = w_oidhw.shape[0]
    scale, bias = bn_fold(*bn)
    patches, (Do, Ho, Wo) = _conv_patches(x.astype(jnp.bfloat16), 3, 1, 1)
    K = patches.shape[-1]
    assert Do % 2 == 0 and Ho % 2 == 0 and Wo % 2 == 0
    Dp, Hp, Wp = Do // 2, Ho // 2, Wo // 2
    Mp = Dp * Hp * Wp                                      # pooled voxels per batch

    # Reorder rows so the 8 voxels of each pooling window sit on a leading axis.
    cols = patches.reshape(N, Dp, 2, Hp, 2, Wp, 2, K)
    cols = jnp.transpose(cols, (2, 4, 6, 0, 1, 3, 5, 7)).reshape(8, N * Mp, K)
    w = conv_w_to_mat(w_oidhw).astype(jnp.bfloat16)

    tmo = _pick_pool_tile(Mp)                              # pooled rows per grid step
    tpb = Mp // tmo

    out = pl.pallas_call(
        _stem_pool_kernel,
        out_shape=jax.ShapeDtypeStruct((N * Mp, C), jnp.float32),
        grid=(N, tpb),
        in_specs=[
            pl.BlockSpec((8, tmo, K), lambda n, t: (0, n * tpb + t, 0)),
            pl.BlockSpec((K, C), lambda n, t: (0, 0)),
            pl.BlockSpec((1, C), lambda n, t: (0, 0)),
            pl.BlockSpec((1, C), lambda n, t: (0, 0)),
            pl.BlockSpec((1, 1, C), lambda n, t: (n, 0, 0)),
        ],
        out_specs=pl.BlockSpec((tmo, C), lambda n, t: (n * tpb + t, 0)),
        compiler_params=pltpu.CompilerParams(
            dimension_semantics=("parallel", "parallel")),
    )(cols, w,
      scale.reshape(1, C).astype(jnp.float32),
      bias.reshape(1, C).astype(jnp.float32),
      att.reshape(N, 1, C).astype(jnp.float32))
    return out.reshape(N, Dp, Hp, Wp, C)


def strided_block_head(x, conv1_w, bn1, ds_w, ds_bn, *, stride):
    """Single Pallas launch computing both the stride-2 conv1 path (ReLU'd) and the
    1x1 stride-2 downsample residual of a ResBlock."""
    N, D, H, W, Cin = x.shape
    xb = x.astype(jnp.bfloat16)
    cols_a, (N, Do, Ho, Wo) = im2col_3d(xb, 3, stride, 1)
    cols_d = xb[:, ::stride, ::stride, ::stride, :].reshape(N * Do * Ho * Wo, Cin)
    wa = conv_w_to_mat(conv1_w).astype(jnp.bfloat16)
    wd = conv_w_to_mat(ds_w).astype(jnp.bfloat16)
    sa, ba = bn_fold(*bn1)
    sd, bd = bn_fold(*ds_bn)
    cout = conv1_w.shape[0]
    R = N * Do * Ho * Wo
    Ka = cols_a.shape[1]
    tm = _pick_tm(R)
    assert R % tm == 0

    a, r = pl.pallas_call(
        _dual_gemm_kernel,
        out_shape=(jax.ShapeDtypeStruct((R, cout), jnp.float32),
                   jax.ShapeDtypeStruct((R, cout), jnp.float32)),
        grid=(R // tm,),
        in_specs=[
            pl.BlockSpec((tm, Ka), lambda i: (i, 0)),
            pl.BlockSpec((Ka, cout), lambda i: (0, 0)),
            pl.BlockSpec((1, cout), lambda i: (0, 0)),
            pl.BlockSpec((1, cout), lambda i: (0, 0)),
            pl.BlockSpec((tm, Cin), lambda i: (i, 0)),
            pl.BlockSpec((Cin, cout), lambda i: (0, 0)),
            pl.BlockSpec((1, cout), lambda i: (0, 0)),
            pl.BlockSpec((1, cout), lambda i: (0, 0)),
        ],
        out_specs=(pl.BlockSpec((tm, cout), lambda i: (i, 0)),
                   pl.BlockSpec((tm, cout), lambda i: (i, 0))),
        compiler_params=pltpu.CompilerParams(dimension_semantics=("parallel",)),
    )(cols_a, wa, sa.reshape(1, cout).astype(jnp.float32),
      ba.reshape(1, cout).astype(jnp.float32),
      cols_d, wd, sd.reshape(1, cout).astype(jnp.float32),
      bd.reshape(1, cout).astype(jnp.float32))
    return a.reshape(N, Do, Ho, Wo, cout), r


def res_block_identity(x, p, att_next):
    """ResBlock, stride 1, identity residual (block1). att_next fused into the epilogue."""
    a = conv3d_bn(x, p["conv1"], p["bn1"], ksize=3, stride=1, padding=1, relu=True)
    return conv3d_bn(a, p["conv2"], p["bn2"], ksize=3, stride=1, padding=1,
                     relu=True, res=x, att=att_next)


def res_block_strided(x, p, att_next, *, stride):
    """ResBlock, stride 2, 1x1-conv downsample residual (blocks 2-4)."""
    a, r = strided_block_head(x, p["conv1"], p["bn1"], p["ds_conv"], p["ds_bn"],
                              stride=stride)
    return conv3d_bn(a, p["conv2"], p["bn2"], ksize=3, stride=1, padding=1,
                     relu=True, res=r, att=att_next)


# ----------------------------------------------------------------------------- #
# InteractiveHNN forward (Pallas path)
# ----------------------------------------------------------------------------- #
def interactive_hnn_forward(params, image, tabular):
    """image: [N, C_in, D, H, W] (PyTorch NCDHW); tabular: [N, ndim_non_img]."""
    x = jnp.transpose(image, (0, 2, 3, 4, 1)).astype(jnp.float32)  # -> NDHWC

    # Aux MLP chain: a few hundred FLOPs -> plain jnp so XLA fuses it.
    tab = tabular.astype(jnp.float32)
    att1 = jax.nn.relu(tab @ params["aux_base_w"].T) @ params["aux_1_w"].T
    att2 = att1 @ params["aux_2_w"].T
    att3 = att2 @ params["aux_3_w"].T
    att4 = att3 @ params["aux_4_w"].T

    # Stem: Conv3d + BN + ReLU + 2x2x2 max-pool + attention multiply, one Pallas call.
    h0 = stem_pool_att(x, params["conv1_w"], params["conv1_bn"], att1)

    # The attention multiply feeding block k+1 is fused into block k's final epilogue.
    out = res_block_identity(h0, params["block1"], att2)
    out = res_block_strided(out, params["block2"], att3, stride=2)
    out = res_block_strided(out, params["block3"], att4, stride=2)
    out = res_block_strided(out, params["block4"], None, stride=2)

    # Global average pool + final Linear: tiny, left to XLA.
    feat = out.mean(axis=(1, 2, 3))
    return feat @ params["fc_w"].T + params["fc_b"]


# ----------------------------------------------------------------------------- #
# Deterministic parameter initialization (PyTorch weight layouts)
# ----------------------------------------------------------------------------- #
def init_params(key, in_channels=1, n_outputs=3, nb=4, ndim_non_img=15):
    keys = iter(jax.random.split(key, 80))

    def conv_w(cout, cin, k):
        fan_in = cin * k ** 3
        return jax.random.normal(next(keys), (cout, cin, k, k, k), jnp.float32) * \
            (2.0 / fan_in) ** 0.5

    def bn_p(c):
        g = 1.0 + 0.1 * jax.random.normal(next(keys), (c,), jnp.float32)
        b = 0.1 * jax.random.normal(next(keys), (c,), jnp.float32)
        m = 0.1 * jax.random.normal(next(keys), (c,), jnp.float32)
        v = 1.0 + 0.1 * jnp.abs(jax.random.normal(next(keys), (c,), jnp.float32))
        return (g, b, m, v)

    def lin_w(cout, cin):
        return jax.random.normal(next(keys), (cout, cin), jnp.float32) * (1.0 / cin) ** 0.5

    params = {
        "conv1_w": conv_w(nb, in_channels, 3),
        "conv1_bn": bn_p(nb),
        "block1": {"conv1": conv_w(nb, nb, 3), "bn1": bn_p(nb),
                   "conv2": conv_w(nb, nb, 3), "bn2": bn_p(nb)},
        "block2": {"conv1": conv_w(2 * nb, nb, 3), "bn1": bn_p(2 * nb),
                   "conv2": conv_w(2 * nb, 2 * nb, 3), "bn2": bn_p(2 * nb),
                   "ds_conv": conv_w(2 * nb, nb, 1), "ds_bn": bn_p(2 * nb)},
        "block3": {"conv1": conv_w(4 * nb, 2 * nb, 3), "bn1": bn_p(4 * nb),
                   "conv2": conv_w(4 * nb, 4 * nb, 3), "bn2": bn_p(4 * nb),
                   "ds_conv": conv_w(4 * nb, 2 * nb, 1), "ds_bn": bn_p(4 * nb)},
        "block4": {"conv1": conv_w(8 * nb, 4 * nb, 3), "bn1": bn_p(8 * nb),
                   "conv2": conv_w(8 * nb, 8 * nb, 3), "bn2": bn_p(8 * nb),
                   "ds_conv": conv_w(8 * nb, 4 * nb, 1), "ds_bn": bn_p(8 * nb)},
        "fc_w": lin_w(n_outputs, 8 * nb),
        "fc_b": 0.1 * jax.random.normal(next(keys), (n_outputs,), jnp.float32),
        "aux_base_w": lin_w(8, ndim_non_img),
        "aux_1_w": lin_w(nb, 8),
        "aux_2_w": lin_w(nb, nb),
        "aux_3_w": lin_w(2 * nb, nb),
        "aux_4_w": lin_w(4 * nb, 2 * nb),
    }
    return params


# ----------------------------------------------------------------------------- #
# Pure-JAX reference (for correctness check of the Pallas path)
# ----------------------------------------------------------------------------- #
def _conv_ref(x, w, stride, padding):
    wt = jnp.transpose(w, (2, 3, 4, 1, 0))  # DHWIO
    return jax.lax.conv_general_dilated(
        x, wt, window_strides=(stride,) * 3, padding=[(padding, padding)] * 3,
        dimension_numbers=("NDHWC", "DHWIO", "NDHWC"))


def _bn_ref(x, p, eps=1e-5):
    g, b, m, v = p
    return (x - m) / jnp.sqrt(v + eps) * g + b


def _res_block_ref(x, p, stride):
    out = jax.nn.relu(_bn_ref(_conv_ref(x, p["conv1"], stride, 1), p["bn1"]))
    out = _bn_ref(_conv_ref(out, p["conv2"], 1, 1), p["bn2"])
    if "ds_conv" in p:
        res = _bn_ref(_conv_ref(x, p["ds_conv"], stride, 0), p["ds_bn"])
    else:
        res = x
    return jax.nn.relu(out + res)


def forward_ref(params, image, tabular):
    x = jnp.transpose(image, (0, 2, 3, 4, 1)).astype(jnp.float32)
    out = jax.nn.relu(_bn_ref(_conv_ref(x, params["conv1_w"], 1, 1), params["conv1_bn"]))
    out = jax.lax.reduce_window(out, -jnp.inf, jax.lax.max,
                                (1, 2, 2, 2, 1), (1, 2, 2, 2, 1), "VALID")
    att = jax.nn.relu(tabular @ params["aux_base_w"].T) @ params["aux_1_w"].T
    out = out * att[:, None, None, None, :]
    out = _res_block_ref(out, params["block1"], 1)
    att = att @ params["aux_2_w"].T
    out = out * att[:, None, None, None, :]
    out = _res_block_ref(out, params["block2"], 2)
    att = att @ params["aux_3_w"].T
    out = out * att[:, None, None, None, :]
    out = _res_block_ref(out, params["block3"], 2)
    att = att @ params["aux_4_w"].T
    out = out * att[:, None, None, None, :]
    out = _res_block_ref(out, params["block4"], 2)
    pooled = jnp.mean(out, axis=(1, 2, 3))
    return pooled @ params["fc_w"].T + params["fc_b"]


# ----------------------------------------------------------------------------- #
if __name__ == "__main__":
    key = jax.random.PRNGKey(0)
    kp, ki, kt = jax.random.split(key, 3)

    in_channels, n_outputs, nb, ndim_non_img = 1, 3, 4, 15
    params = init_params(kp, in_channels, n_outputs, nb, ndim_non_img)

    image = jax.random.normal(ki, (2, in_channels, 16, 16, 16), jnp.float32)   # NCDHW
    tabular = jax.random.normal(kt, (2, ndim_non_img), jnp.float32)

    fwd = jax.jit(interactive_hnn_forward)
    logits = jax.block_until_ready(fwd(params, image, tabular))
    assert logits.shape == (2, n_outputs)

    # bf16 MXU operands (f32 accumulation) -> slightly looser tolerance than pure f32.
    ref = jax.block_until_ready(forward_ref(params, image, tabular))
    np.testing.assert_allclose(np.asarray(logits), np.asarray(ref), rtol=5e-2, atol=5e-2)

    print("KERNEL_OK")
</pallas_src>

<mosaic_0001>
module attributes {stable_mosaic.version = 11 : i64} {
  func.func @_stem_pool_kernel(%arg0: i32, %arg1: i32, %arg2: memref<8x128x27xbf16, #tpu.memory_space<vmem>>, %arg3: memref<27x4xbf16, #tpu.memory_space<vmem>>, %arg4: memref<1x4xf32, #tpu.memory_space<vmem>>, %arg5: memref<1x4xf32, #tpu.memory_space<vmem>>, %arg6: memref<1x1x4xf32, #tpu.memory_space<vmem>>, %arg7: memref<128x4xf32, #tpu.memory_space<vmem>>) attributes {dimension_semantics = [#tpu.dimension_semantics<parallel>, #tpu.dimension_semantics<parallel>], iteration_bounds = array<i64: 2, 4>, scalar_prefetch = 0 : i64, scratch_operands = 0 : i64, tpu.core_type = #tpu.core_type<tc>, window_params = [{transform_indices = @transform_0, window_bounds = array<i64: 8, 128, 27>}, {pipeline_mode = #tpu.pipeline_mode<synchronous>, transform_indices = @transform_1, window_bounds = array<i64: 27, 4>}, {pipeline_mode = #tpu.pipeline_mode<synchronous>, transform_indices = @transform_2, window_bounds = array<i64: 1, 4>}, {pipeline_mode = #tpu.pipeline_mode<synchronous>, transform_indices = @transform_3, window_bounds = array<i64: 1, 4>}, {transform_indices = @transform_4, window_bounds = array<i64: 1, 1, 4>}, {transform_indices = @transform_5, window_bounds = array<i64: 128, 4>}]} {
    %c0 = arith.constant 0 : index
    %c0_0 = arith.constant 0 : index
    %0 = vector.load %arg3[%c0, %c0_0] : memref<27x4xbf16, #tpu.memory_space<vmem>>, vector<27x4xbf16>
    %c0_1 = arith.constant 0 : index
    %c0_2 = arith.constant 0 : index
    %1 = vector.load %arg4[%c0_1, %c0_2] : memref<1x4xf32, #tpu.memory_space<vmem>>, vector<1x4xf32>
    %c0_3 = arith.constant 0 : index
    %c0_4 = arith.constant 0 : index
    %2 = vector.load %arg5[%c0_3, %c0_4] : memref<1x4xf32, #tpu.memory_space<vmem>>, vector<1x4xf32>
    %c0_5 = arith.constant 0 : index
    %c0_6 = arith.constant 0 : index
    %c0_7 = arith.constant 0 : index
    %3 = vector.load %arg2[%c0_5, %c0_6, %c0_7] : memref<8x128x27xbf16, #tpu.memory_space<vmem>>, vector<1x128x27xbf16>
    %4 = vector.shape_cast %3 : vector<1x128x27xbf16> to vector<128x27xbf16>
    %cst = arith.constant dense<0.000000e+00> : vector<128x4xf32>
    %5 = tpu.matmul %4, %0, %cst {dimension_numbers = #tpu.dot_dimension_numbers<[1], [0], [0], [1], [0, 0, 1, 1], [], []>} : vector<128x27xbf16>, vector<27x4xbf16>, vector<128x4xf32> -> vector<128x4xf32>
    %6 = vector.broadcast %1 : vector<1x4xf32> to vector<128x4xf32>
    %7 = arith.mulf %5, %6 : vector<128x4xf32>
    %8 = vector.broadcast %2 : vector<1x4xf32> to vector<128x4xf32>
    %9 = arith.addf %7, %8 : vector<128x4xf32>
    %cst_8 = arith.constant 0.000000e+00 : f32
    %10 = vector.broadcast %cst_8 : f32 to vector<128x4xf32>
    %11 = arith.maximumf %9, %10 : vector<128x4xf32>
    %c1 = arith.constant 1 : index
    %c0_9 = arith.constant 0 : index
    %c0_10 = arith.constant 0 : index
    %12 = vector.load %arg2[%c1, %c0_9, %c0_10] : memref<8x128x27xbf16, #tpu.memory_space<vmem>>, vector<1x128x27xbf16>
    %13 = vector.shape_cast %12 : vector<1x128x27xbf16> to vector<128x27xbf16>
    %cst_11 = arith.constant dense<0.000000e+00> : vector<128x4xf32>
    %14 = tpu.matmul %13, %0, %cst_11 {dimension_numbers = #tpu.dot_dimension_numbers<[1], [0], [0], [1], [0, 0, 1, 1], [], []>} : vector<128x27xbf16>, vector<27x4xbf16>, vector<128x4xf32> -> vector<128x4xf32>
    %15 = vector.broadcast %1 : vector<1x4xf32> to vector<128x4xf32>
    %16 = arith.mulf %14, %15 : vector<128x4xf32>
    %17 = vector.broadcast %2 : vector<1x4xf32> to vector<128x4xf32>
    %18 = arith.addf %16, %17 : vector<128x4xf32>
    %cst_12 = arith.constant 0.000000e+00 : f32
    %19 = vector.broadcast %cst_12 : f32 to vector<128x4xf32>
    %20 = arith.maximumf %18, %19 : vector<128x4xf32>
    %21 = arith.maximumf %11, %20 : vector<128x4xf32>
    %c2 = arith.constant 2 : index
    %c0_13 = arith.constant 0 : index
    %c0_14 = arith.constant 0 : index
    %22 = vector.load %arg2[%c2, %c0_13, %c0_14] : memref<8x128x27xbf16, #tpu.memory_space<vmem>>, vector<1x128x27xbf16>
    %23 = vector.shape_cast %22 : vector<1x128x27xbf16> to vector<128x27xbf16>
    %cst_15 = arith.constant dense<0.000000e+00> : vector<128x4xf32>
    %24 = tpu.matmul %23, %0, %cst_15 {dimension_numbers = #tpu.dot_dimension_numbers<[1], [0], [0], [1], [0, 0, 1, 1], [], []>} : vector<128x27xbf16>, vector<27x4xbf16>, vector<128x4xf32> -> vector<128x4xf32>
    %25 = vector.broadcast %1 : vector<1x4xf32> to vector<128x4xf32>
    %26 = arith.mulf %24, %25 : vector<128x4xf32>
    %27 = vector.broadcast %2 : vector<1x4xf32> to vector<128x4xf32>
    %28 = arith.addf %26, %27 : vector<128x4xf32>
    %cst_16 = arith.constant 0.000000e+00 : f32
    %29 = vector.broadcast %cst_16 : f32 to vector<128x4xf32>
    %30 = arith.maximumf %28, %29 : vector<128x4xf32>
    %31 = arith.maximumf %21, %30 : vector<128x4xf32>
    %c3 = arith.constant 3 : index
    %c0_17 = arith.constant 0 : index
    %c0_18 = arith.constant 0 : index
    %32 = vector.load %arg2[%c3, %c0_17, %c0_18] : memref<8x128x27xbf16, #tpu.memory_space<vmem>>, vector<1x128x27xbf16>
    %33 = vector.shape_cast %32 : vector<1x128x27xbf16> to vector<128x27xbf16>
    %cst_19 = arith.constant dense<0.000000e+00> : vector<128x4xf32>
    %34 = tpu.matmul %33, %0, %cst_19 {dimension_numbers = #tpu.dot_dimension_numbers<[1], [0], [0], [1], [0, 0, 1, 1], [], []>} : vector<128x27xbf16>, vector<27x4xbf16>, vector<128x4xf32> -> vector<128x4xf32>
    %35 = vector.broadcast %1 : vector<1x4xf32> to vector<128x4xf32>
    %36 = arith.mulf %34, %35 : vector<128x4xf32>
    %37 = vector.broadcast %2 : vector<1x4xf32> to vector<128x4xf32>
    %38 = arith.addf %36, %37 : vector<128x4xf32>
    %cst_20 = arith.constant 0.000000e+00 : f32
    %39 = vector.broadcast %cst_20 : f32 to vector<128x4xf32>
    %40 = arith.maximumf %38, %39 : vector<128x4xf32>
    %41 = arith.maximumf %31, %40 : vector<128x4xf32>
    %c4 = arith.constant 4 : index
    %c0_21 = arith.constant 0 : index
    %c0_22 = arith.constant 0 : index
    %42 = vector.load %arg2[%c4, %c0_21, %c0_22] : memref<8x128x27xbf16, #tpu.memory_space<vmem>>, vector<1x128x27xbf16>
    %43 = vector.shape_cast %42 : vector<1x128x27xbf16> to vector<128x27xbf16>
    %cst_23 = arith.constant dense<0.000000e+00> : vector<128x4xf32>
    %44 = tpu.matmul %43, %0, %cst_23 {dimension_numbers = #tpu.dot_dimension_numbers<[1], [0], [0], [1], [0, 0, 1, 1], [], []>} : vector<128x27xbf16>, vector<27x4xbf16>, vector<128x4xf32> -> vector<128x4xf32>
    %45 = vector.broadcast %1 : vector<1x4xf32> to vector<128x4xf32>
    %46 = arith.mulf %44, %45 : vector<128x4xf32>
    %47 = vector.broadcast %2 : vector<1x4xf32> to vector<128x4xf32>
    %48 = arith.addf %46, %47 : vector<128x4xf32>
    %cst_24 = arith.constant 0.000000e+00 : f32
    %49 = vector.broadcast %cst_24 : f32 to vector<128x4xf32>
    %50 = arith.maximumf %48, %49 : vector<128x4xf32>
    %51 = arith.maximumf %41, %50 : vector<128x4xf32>
    %c5 = arith.constant 5 : index
    %c0_25 = arith.constant 0 : index
    %c0_26 = arith.constant 0 : index
    %52 = vector.load %arg2[%c5, %c0_25, %c0_26] : memref<8x128x27xbf16, #tpu.memory_space<vmem>>, vector<1x128x27xbf16>
    %53 = vector.shape_cast %52 : vector<1x128x27xbf16> to vector<128x27xbf16>
    %cst_27 = arith.constant dense<0.000000e+00> : vector<128x4xf32>
    %54 = tpu.matmul %53, %0, %cst_27 {dimension_numbers = #tpu.dot_dimension_numbers<[1], [0], [0], [1], [0, 0, 1, 1], [], []>} : vector<128x27xbf16>, vector<27x4xbf16>, vector<128x4xf32> -> vector<128x4xf32>
    %55 = vector.broadcast %1 : vector<1x4xf32> to vector<128x4xf32>
    %56 = arith.mulf %54, %55 : vector<128x4xf32>
    %57 = vector.broadcast %2 : vector<1x4xf32> to vector<128x4xf32>
    %58 = arith.addf %56, %57 : vector<128x4xf32>
    %cst_28 = arith.constant 0.000000e+00 : f32
    %59 = vector.broadcast %cst_28 : f32 to vector<128x4xf32>
    %60 = arith.maximumf %58, %59 : vector<128x4xf32>
    %61 = arith.maximumf %51, %60 : vector<128x4xf32>
    %c6 = arith.constant 6 : index
    %c0_29 = arith.constant 0 : index
    %c0_30 = arith.constant 0 : index
    %62 = vector.load %arg2[%c6, %c0_29, %c0_30] : memref<8x128x27xbf16, #tpu.memory_space<vmem>>, vector<1x128x27xbf16>
    %63 = vector.shape_cast %62 : vector<1x128x27xbf16> to vector<128x27xbf16>
    %cst_31 = arith.constant dense<0.000000e+00> : vector<128x4xf32>
    %64 = tpu.matmul %63, %0, %cst_31 {dimension_numbers = #tpu.dot_dimension_numbers<[1], [0], [0], [1], [0, 0, 1, 1], [], []>} : vector<128x27xbf16>, vector<27x4xbf16>, vector<128x4xf32> -> vector<128x4xf32>
    %65 = vector.broadcast %1 : vector<1x4xf32> to vector<128x4xf32>
    %66 = arith.mulf %64, %65 : vector<128x4xf32>
    %67 = vector.broadcast %2 : vector<1x4xf32> to vector<128x4xf32>
    %68 = arith.addf %66, %67 : vector<128x4xf32>
    %cst_32 = arith.constant 0.000000e+00 : f32
    %69 = vector.broadcast %cst_32 : f32 to vector<128x4xf32>
    %70 = arith.maximumf %68, %69 : vector<128x4xf32>
    %71 = arith.maximumf %61, %70 : vector<128x4xf32>
    %c7 = arith.constant 7 : index
    %c0_33 = arith.constant 0 : index
    %c0_34 = arith.constant 0 : index
    %72 = vector.load %arg2[%c7, %c0_33, %c0_34] : memref<8x128x27xbf16, #tpu.memory_space<vmem>>, vector<1x128x27xbf16>
    %73 = vector.shape_cast %72 : vector<1x128x27xbf16> to vector<128x27xbf16>
    %cst_35 = arith.constant dense<0.000000e+00> : vector<128x4xf32>
    %74 = tpu.matmul %73, %0, %cst_35 {dimension_numbers = #tpu.dot_dimension_numbers<[1], [0], [0], [1], [0, 0, 1, 1], [], []>} : vector<128x27xbf16>, vector<27x4xbf16>, vector<128x4xf32> -> vector<128x4xf32>
    %75 = vector.broadcast %1 : vector<1x4xf32> to vector<128x4xf32>
    %76 = arith.mulf %74, %75 : vector<128x4xf32>
    %77 = vector.broadcast %2 : vector<1x4xf32> to vector<128x4xf32>
    %78 = arith.addf %76, %77 : vector<128x4xf32>
    %cst_36 = arith.constant 0.000000e+00 : f32
    %79 = vector.broadcast %cst_36 : f32 to vector<128x4xf32>
    %80 = arith.maximumf %78, %79 : vector<128x4xf32>
    %81 = arith.maximumf %71, %80 : vector<128x4xf32>
    %c0_37 = arith.constant 0 : index
    %c0_38 = arith.constant 0 : index
    %c0_39 = arith.constant 0 : index
    %82 = vector.load %arg6[%c0_37, %c0_38, %c0_39] : memref<1x1x4xf32, #tpu.memory_space<vmem>>, vector<1x1x4xf32>
    %83 = vector.shape_cast %82 : vector<1x1x4xf32> to vector<1x4xf32>
    %84 = vector.broadcast %83 : vector<1x4xf32> to vector<128x4xf32>
    %85 = arith.mulf %81, %84 : vector<128x4xf32>
    %c0_40 = arith.constant 0 : index
    %c0_41 = arith.constant 0 : index
    %86 = vector.load %arg7[%c0_40, %c0_41] : memref<128x4xf32, #tpu.memory_space<vmem>>, vector<128x4xf32>
    tpu.vector_store %arg7[%c0_40, %c0_41], %85 {strides = array<i32>} : memref<128x4xf32, #tpu.memory_space<vmem>>, vector<128x4xf32>,
    return
  }
  func.func @transform_0(%arg0: i32, %arg1: i32) -> (i32, i32, i32) {
    %c4_i32 = arith.constant 4 : i32
    %0 = arith.muli %arg0, %c4_i32 : i32
    %1 = arith.addi %0, %arg1 : i32
    %c0_i32 = arith.constant 0 : i32
    %c0_i32_0 = arith.constant 0 : i32
    %c0_i32_1 = arith.constant 0 : i32
    return %c0_i32, %1, %c0_i32_0 : i32, i32, i32
  }
  func.func @transform_1(%arg0: i32, %arg1: i32) -> (i32, i32) {
    %c0_i32 = arith.constant 0 : i32
    %c0_i32_0 = arith.constant 0 : i32
    %c0_i32_1 = arith.constant 0 : i32
    return %c0_i32, %c0_i32_0 : i32, i32
  }
  func.func @transform_2(%arg0: i32, %arg1: i32) -> (i32, i32) {
    %c0_i32 = arith.constant 0 : i32
    %c0_i32_0 = arith.constant 0 : i32
    %c0_i32_1 = arith.constant 0 : i32
    return %c0_i32, %c0_i32_0 : i32, i32
  }
  func.func @transform_3(%arg0: i32, %arg1: i32) -> (i32, i32) {
    %c0_i32 = arith.constant 0 : i32
    %c0_i32_0 = arith.constant 0 : i32
    %c0_i32_1 = arith.constant 0 : i32
    return %c0_i32, %c0_i32_0 : i32, i32
  }
  func.func @transform_4(%arg0: i32, %arg1: i32) -> (i32, i32, i32) {
    %c0_i32 = arith.constant 0 : i32
    %c0_i32_0 = arith.constant 0 : i32
    %c0_i32_1 = arith.constant 0 : i32
    return %arg0, %c0_i32, %c0_i32_0 : i32, i32, i32
  }
  func.func @transform_5(%arg0: i32, %arg1: i32) -> (i32, i32) {
    %c4_i32 = arith.constant 4 : i32
    %0 = arith.muli %arg0, %c4_i32 : i32
    %1 = arith.addi %0, %arg1 : i32
    %c0_i32 = arith.constant 0 : i32
    %c0_i32_0 = arith.constant 0 : i32
    return %1, %c0_i32 : i32, i32
  }
}

module attributes {stable_mosaic.version = 11 : i64} {
  func.func @_gemm_epilogue_kernel(%arg0: i32, %arg1: memref<512x108xbf16, #tpu.memory_space<vmem>>, %arg2: memref<108x4xbf16, #tpu.memory_space<vmem>>, %arg3: memref<1x4xf32, #tpu.memory_space<vmem>>, %arg4: memref<1x4xf32, #tpu.memory_space<vmem>>, %arg5: memref<512x4xf32, #tpu.memory_space<vmem>>) attributes {dimension_semantics = [#tpu.dimension_semantics<parallel>], iteration_bounds = array<i64: 2>, scalar_prefetch = 0 : i64, scratch_operands = 0 : i64, tpu.core_type = #tpu.core_type<tc>, window_params = [{transform_indices = @transform_0, window_bounds = array<i64: 512, 108>}, {pipeline_mode = #tpu.pipeline_mode<synchronous>, transform_indices = @transform_1, window_bounds = array<i64: 108, 4>}, {pipeline_mode = #tpu.pipeline_mode<synchronous>, transform_indices = @transform_2, window_bounds = array<i64: 1, 4>}, {pipeline_mode = #tpu.pipeline_mode<synchronous>, transform_indices = @transform_3, window_bounds = array<i64: 1, 4>}, {transform_indices = @transform_4, window_bounds = array<i64: 512, 4>}]} {
    %c0 = arith.constant 0 : index
    %c0_0 = arith.constant 0 : index
    %0 = vector.load %arg1[%c0, %c0_0] : memref<512x108xbf16, #tpu.memory_space<vmem>>, vector<512x108xbf16>
    %c0_1 = arith.constant 0 : index
    %c0_2 = arith.constant 0 : index
    %1 = vector.load %arg2[%c0_1, %c0_2] : memref<108x4xbf16, #tpu.memory_space<vmem>>, vector<108x4xbf16>
    %cst = arith.constant dense<0.000000e+00> : vector<512x4xf32>
    %2 = tpu.matmul %0, %1, %cst {dimension_numbers = #tpu.dot_dimension_numbers<[1], [0], [0], [1], [0, 0, 1, 1], [], []>} : vector<512x108xbf16>, vector<108x4xbf16>, vector<512x4xf32> -> vector<512x4xf32>
    %c0_3 = arith.constant 0 : index
    %c0_4 = arith.constant 0 : index
    %3 = vector.load %arg3[%c0_3, %c0_4] : memref<1x4xf32, #tpu.memory_space<vmem>>, vector<1x4xf32>
    %4 = vector.broadcast %3 : vector<1x4xf32> to vector<512x4xf32>
    %5 = arith.mulf %2, %4 : vector<512x4xf32>
    %c0_5 = arith.constant 0 : index
    %c0_6 = arith.constant 0 : index
    %6 = vector.load %arg4[%c0_5, %c0_6] : memref<1x4xf32, #tpu.memory_space<vmem>>, vector<1x4xf32>
    %7 = vector.broadcast %6 : vector<1x4xf32> to vector<512x4xf32>
    %8 = arith.addf %5, %7 : vector<512x4xf32>
    %cst_7 = arith.constant 0.000000e+00 : f32
    %9 = vector.broadcast %cst_7 : f32 to vector<512x4xf32>
    %10 = arith.maximumf %8, %9 : vector<512x4xf32>
    %c0_8 = arith.constant 0 : index
    %c0_9 = arith.constant 0 : index
    %11 = vector.load %arg5[%c0_8, %c0_9] : memref<512x4xf32, #tpu.memory_space<vmem>>, vector<512x4xf32>
    tpu.vector_store %arg5[%c0_8, %c0_9], %10 {strides = array<i32>} : memref<512x4xf32, #tpu.memory_space<vmem>>, vector<512x4xf32>,
    return
  }
  func.func @transform_0(%arg0: i32) -> (i32, i32) {
    %c0_i32 = arith.constant 0 : i32
    %c0_i32_0 = arith.constant 0 : i32
    return %arg0, %c0_i32 : i32, i32
  }
  func.func @transform_1(%arg0: i32) -> (i32, i32) {
    %c0_i32 = arith.constant 0 : i32
    %c0_i32_0 = arith.constant 0 : i32
    %c0_i32_1 = arith.constant 0 : i32
    return %c0_i32, %c0_i32_0 : i32, i32
  }
  func.func @transform_2(%arg0: i32) -> (i32, i32) {
    %c0_i32 = arith.constant 0 : i32
    %c0_i32_0 = arith.constant 0 : i32
    %c0_i32_1 = arith.constant 0 : i32
    return %c0_i32, %c0_i32_0 : i32, i32
  }
  func.func @transform_3(%arg0: i32) -> (i32, i32) {
    %c0_i32 = arith.constant 0 : i32
    %c0_i32_0 = arith.constant 0 : i32
    %c0_i32_1 = arith.constant 0 : i32
    return %c0_i32, %c0_i32_0 : i32, i32
  }
  func.func @transform_4(%arg0: i32) -> (i32, i32) {
    %c0_i32 = arith.constant 0 : i32
    %c0_i32_0 = arith.constant 0 : i32
    return %arg0, %c0_i32 : i32, i32
  }
}

module attributes {stable_mosaic.version = 11 : i64} {
  func.func @_gemm_epilogue_kernel(%arg0: i32, %arg1: memref<512x108xbf16, #tpu.memory_space<vmem>>, %arg2: memref<108x4xbf16, #tpu.memory_space<vmem>>, %arg3: memref<1x4xf32, #tpu.memory_space<vmem>>, %arg4: memref<1x4xf32, #tpu.memory_space<vmem>>, %arg5: memref<512x4xf32, #tpu.memory_space<vmem>>, %arg6: memref<512x4xf32, #tpu.memory_space<vmem>>, %arg7: memref<512x4xf32, #tpu.memory_space<vmem>>) attributes {dimension_semantics = [#tpu.dimension_semantics<parallel>], iteration_bounds = array<i64: 2>, scalar_prefetch = 0 : i64, scratch_operands = 0 : i64, tpu.core_type = #tpu.core_type<tc>, window_params = [{transform_indices = @transform_0, window_bounds = array<i64: 512, 108>}, {pipeline_mode = #tpu.pipeline_mode<synchronous>, transform_indices = @transform_1, window_bounds = array<i64: 108, 4>}, {pipeline_mode = #tpu.pipeline_mode<synchronous>, transform_indices = @transform_2, window_bounds = array<i64: 1, 4>}, {pipeline_mode = #tpu.pipeline_mode<synchronous>, transform_indices = @transform_3, window_bounds = array<i64: 1, 4>}, {transform_indices = @transform_4, window_bounds = array<i64: 512, 4>}, {transform_indices = @transform_5, window_bounds = array<i64: 512, 4>}, {transform_indices = @transform_6, window_bounds = array<i64: 512, 4>}]} {
    %c0 = arith.constant 0 : index
    %c0_0 = arith.constant 0 : index
    %0 = vector.load %arg1[%c0, %c0_0] : memref<512x108xbf16, #tpu.memory_space<vmem>>, vector<512x108xbf16>
    %c0_1 = arith.constant 0 : index
    %c0_2 = arith.constant 0 : index
    %1 = vector.load %arg2[%c0_1, %c0_2] : memref<108x4xbf16, #tpu.memory_space<vmem>>, vector<108x4xbf16>
    %cst = arith.constant dense<0.000000e+00> : vector<512x4xf32>
    %2 = tpu.matmul %0, %1, %cst {dimension_numbers = #tpu.dot_dimension_numbers<[1], [0], [0], [1], [0, 0, 1, 1], [], []>} : vector<512x108xbf16>, vector<108x4xbf16>, vector<512x4xf32> -> vector<512x4xf32>
    %c0_3 = arith.constant 0 : index
    %c0_4 = arith.constant 0 : index
    %3 = vector.load %arg3[%c0_3, %c0_4] : memref<1x4xf32, #tpu.memory_space<vmem>>, vector<1x4xf32>
    %4 = vector.broadcast %3 : vector<1x4xf32> to vector<512x4xf32>
    %5 = arith.mulf %2, %4 : vector<512x4xf32>
    %c0_5 = arith.constant 0 : index
    %c0_6 = arith.constant 0 : index
    %6 = vector.load %arg4[%c0_5, %c0_6] : memref<1x4xf32, #tpu.memory_space<vmem>>, vector<1x4xf32>
    %7 = vector.broadcast %6 : vector<1x4xf32> to vector<512x4xf32>
    %8 = arith.addf %5, %7 : vector<512x4xf32>
    %c0_7 = arith.constant 0 : index
    %c0_8 = arith.constant 0 : index
    %9 = vector.load %arg5[%c0_7, %c0_8] : memref<512x4xf32, #tpu.memory_space<vmem>>, vector<512x4xf32>
    %10 = arith.addf %8, %9 : vector<512x4xf32>
    %cst_9 = arith.constant 0.000000e+00 : f32
    %11 = vector.broadcast %cst_9 : f32 to vector<512x4xf32>
    %12 = arith.maximumf %10, %11 : vector<512x4xf32>
    %c0_10 = arith.constant 0 : index
    %c0_11 = arith.constant 0 : index
    %13 = vector.load %arg6[%c0_10, %c0_11] : memref<512x4xf32, #tpu.memory_space<vmem>>, vector<512x4xf32>
    %14 = arith.mulf %12, %13 : vector<512x4xf32>
    %c0_12 = arith.constant 0 : index
    %c0_13 = arith.constant 0 : index
    %15 = vector.load %arg7[%c0_12, %c0_13] : memref<512x4xf32, #tpu.memory_space<vmem>>, vector<512x4xf32>
    tpu.vector_store %arg7[%c0_12, %c0_13], %14 {strides = array<i32>} : memref<512x4xf32, #tpu.memory_space<vmem>>, vector<512x4xf32>,
    return
  }
  func.func @transform_0(%arg0: i32) -> (i32, i32) {
    %c0_i32 = arith.constant 0 : i32
    %c0_i32_0 = arith.constant 0 : i32
    return %arg0, %c0_i32 : i32, i32
  }
  func.func @transform_1(%arg0: i32) -> (i32, i32) {
    %c0_i32 = arith.constant 0 : i32
    %c0_i32_0 = arith.constant 0 : i32
    %c0_i32_1 = arith.constant 0 : i32
    return %c0_i32, %c0_i32_0 : i32, i32
  }
  func.func @transform_2(%arg0: i32) -> (i32, i32) {
    %c0_i32 = arith.constant 0 : i32
    %c0_i32_0 = arith.constant 0 : i32
    %c0_i32_1 = arith.constant 0 : i32
    return %c0_i32, %c0_i32_0 : i32, i32
  }
  func.func @transform_3(%arg0: i32) -> (i32, i32) {
    %c0_i32 = arith.constant 0 : i32
    %c0_i32_0 = arith.constant 0 : i32
    %c0_i32_1 = arith.constant 0 : i32
    return %c0_i32, %c0_i32_0 : i32, i32
  }
  func.func @transform_4(%arg0: i32) -> (i32, i32) {
    %c0_i32 = arith.constant 0 : i32
    %c0_i32_0 = arith.constant 0 : i32
    return %arg0, %c0_i32 : i32, i32
  }
  func.func @transform_5(%arg0: i32) -> (i32, i32) {
    %c0_i32 = arith.constant 0 : i32
    %c0_i32_0 = arith.constant 0 : i32
    return %arg0, %c0_i32 : i32, i32
  }
  func.func @transform_6(%arg0: i32) -> (i32, i32) {
    %c0_i32 = arith.constant 0 : i32
    %c0_i32_0 = arith.constant 0 : i32
    return %arg0, %c0_i32 : i32, i32
  }
}

module attributes {stable_mosaic.version = 11 : i64} {
  func.func @_dual_gemm_kernel(%arg0: i32, %arg1: memref<64x108xbf16, #tpu.memory_space<vmem>>, %arg2: memref<108x8xbf16, #tpu.memory_space<vmem>>, %arg3: memref<1x8xf32, #tpu.memory_space<vmem>>, %arg4: memref<1x8xf32, #tpu.memory_space<vmem>>, %arg5: memref<64x4xbf16, #tpu.memory_space<vmem>>, %arg6: memref<4x8xbf16, #tpu.memory_space<vmem>>, %arg7: memref<1x8xf32, #tpu.memory_space<vmem>>, %arg8: memref<1x8xf32, #tpu.memory_space<vmem>>, %arg9: memref<64x8xf32, #tpu.memory_space<vmem>>, %arg10: memref<64x8xf32, #tpu.memory_space<vmem>>) attributes {dimension_semantics = [#tpu.dimension_semantics<parallel>], iteration_bounds = array<i64: 2>, scalar_prefetch = 0 : i64, scratch_operands = 0 : i64, tpu.core_type = #tpu.core_type<tc>, window_params = [{transform_indices = @transform_0, window_bounds = array<i64: 64, 108>}, {pipeline_mode = #tpu.pipeline_mode<synchronous>, transform_indices = @transform_1, window_bounds = array<i64: 108, 8>}, {pipeline_mode = #tpu.pipeline_mode<synchronous>, transform_indices = @transform_2, window_bounds = array<i64: 1, 8>}, {pipeline_mode = #tpu.pipeline_mode<synchronous>, transform_indices = @transform_3, window_bounds = array<i64: 1, 8>}, {transform_indices = @transform_4, window_bounds = array<i64: 64, 4>}, {pipeline_mode = #tpu.pipeline_mode<synchronous>, transform_indices = @transform_5, window_bounds = array<i64: 4, 8>}, {pipeline_mode = #tpu.pipeline_mode<synchronous>, transform_indices = @transform_6, window_bounds = array<i64: 1, 8>}, {pipeline_mode = #tpu.pipeline_mode<synchronous>, transform_indices = @transform_7, window_bounds = array<i64: 1, 8>}, {transform_indices = @transform_8, window_bounds = array<i64: 64, 8>}, {transform_indices = @transform_9, window_bounds = array<i64: 64, 8>}]} {
    %c0 = arith.constant 0 : index
    %c0_0 = arith.constant 0 : index
    %0 = vector.load %arg1[%c0, %c0_0] : memref<64x108xbf16, #tpu.memory_space<vmem>>, vector<64x108xbf16>
    %c0_1 = arith.constant 0 : index
    %c0_2 = arith.constant 0 : index
    %1 = vector.load %arg2[%c0_1, %c0_2] : memref<108x8xbf16, #tpu.memory_space<vmem>>, vector<108x8xbf16>
    %cst = arith.constant dense<0.000000e+00> : vector<64x8xf32>
    %2 = tpu.matmul %0, %1, %cst {dimension_numbers = #tpu.dot_dimension_numbers<[1], [0], [0], [1], [0, 0, 1, 1], [], []>} : vector<64x108xbf16>, vector<108x8xbf16>, vector<64x8xf32> -> vector<64x8xf32>
    %c0_3 = arith.constant 0 : index
    %c0_4 = arith.constant 0 : index
    %3 = vector.load %arg3[%c0_3, %c0_4] : memref<1x8xf32, #tpu.memory_space<vmem>>, vector<1x8xf32>
    %4 = vector.broadcast %3 : vector<1x8xf32> to vector<64x8xf32>
    %5 = arith.mulf %2, %4 : vector<64x8xf32>
    %c0_5 = arith.constant 0 : index
    %c0_6 = arith.constant 0 : index
    %6 = vector.load %arg4[%c0_5, %c0_6] : memref<1x8xf32, #tpu.memory_space<vmem>>, vector<1x8xf32>
    %7 = vector.broadcast %6 : vector<1x8xf32> to vector<64x8xf32>
    %8 = arith.addf %5, %7 : vector<64x8xf32>
    %cst_7 = arith.constant 0.000000e+00 : f32
    %9 = vector.broadcast %cst_7 : f32 to vector<64x8xf32>
    %10 = arith.maximumf %8, %9 : vector<64x8xf32>
    %c0_8 = arith.constant 0 : index
    %c0_9 = arith.constant 0 : index
    %11 = vector.load %arg9[%c0_8, %c0_9] : memref<64x8xf32, #tpu.memory_space<vmem>>, vector<64x8xf32>
    tpu.vector_store %arg9[%c0_8, %c0_9], %10 {strides = array<i32>} : memref<64x8xf32, #tpu.memory_space<vmem>>, vector<64x8xf32>,
    %c0_10 = arith.constant 0 : index
    %c0_11 = arith.constant 0 : index
    %12 = vector.load %arg5[%c0_10, %c0_11] : memref<64x4xbf16, #tpu.memory_space<vmem>>, vector<64x4xbf16>
    %c0_12 = arith.constant 0 : index
    %c0_13 = arith.constant 0 : index
    %13 = vector.load %arg6[%c0_12, %c0_13] : memref<4x8xbf16, #tpu.memory_space<vmem>>, vector<4x8xbf16>
    %cst_14 = arith.constant dense<0.000000e+00> : vector<64x8xf32>
    %14 = tpu.matmul %12, %13, %cst_14 {dimension_numbers = #tpu.dot_dimension_numbers<[1], [0], [0], [1], [0, 0, 1, 1], [], []>} : vector<64x4xbf16>, vector<4x8xbf16>, vector<64x8xf32> -> vector<64x8xf32>
    %c0_15 = arith.constant 0 : index
    %c0_16 = arith.constant 0 : index
    %15 = vector.load %arg7[%c0_15, %c0_16] : memref<1x8xf32, #tpu.memory_space<vmem>>, vector<1x8xf32>
    %16 = vector.broadcast %15 : vector<1x8xf32> to vector<64x8xf32>
    %17 = arith.mulf %14, %16 : vector<64x8xf32>
    %c0_17 = arith.constant 0 : index
    %c0_18 = arith.constant 0 : index
    %18 = vector.load %arg8[%c0_17, %c0_18] : memref<1x8xf32, #tpu.memory_space<vmem>>, vector<1x8xf32>
    %19 = vector.broadcast %18 : vector<1x8xf32> to vector<64x8xf32>
    %20 = arith.addf %17, %19 : vector<64x8xf32>
    %c0_19 = arith.constant 0 : index
    %c0_20 = arith.constant 0 : index
    %21 = vector.load %arg10[%c0_19, %c0_20] : memref<64x8xf32, #tpu.memory_space<vmem>>, vector<64x8xf32>
    tpu.vector_store %arg10[%c0_19, %c0_20], %20 {strides = array<i32>} : memref<64x8xf32, #tpu.memory_space<vmem>>, vector<64x8xf32>,
    return
  }
  func.func @transform_0(%arg0: i32) -> (i32, i32) {
    %c0_i32 = arith.constant 0 : i32
    %c0_i32_0 = arith.constant 0 : i32
    return %arg0, %c0_i32 : i32, i32
  }
  func.func @transform_1(%arg0: i32) -> (i32, i32) {
    %c0_i32 = arith.constant 0 : i32
    %c0_i32_0 = arith.constant 0 : i32
    %c0_i32_1 = arith.constant 0 : i32
    return %c0_i32, %c0_i32_0 : i32, i32
  }
  func.func @transform_2(%arg0: i32) -> (i32, i32) {
    %c0_i32 = arith.constant 0 : i32
    %c0_i32_0 = arith.constant 0 : i32
    %c0_i32_1 = arith.constant 0 : i32
    return %c0_i32, %c0_i32_0 : i32, i32
  }
  func.func @transform_3(%arg0: i32) -> (i32, i32) {
    %c0_i32 = arith.constant 0 : i32
    %c0_i32_0 = arith.constant 0 : i32
    %c0_i32_1 = arith.constant 0 : i32
    return %c0_i32, %c0_i32_0 : i32, i32
  }
  func.func @transform_4(%arg0: i32) -> (i32, i32) {
    %c0_i32 = arith.constant 0 : i32
    %c0_i32_0 = arith.constant 0 : i32
    return %arg0, %c0_i32 : i32, i32
  }
  func.func @transform_5(%arg0: i32) -> (i32, i32) {
    %c0_i32 = arith.constant 0 : i32
    %c0_i32_0 = arith.constant 0 : i32
    %c0_i32_1 = arith.constant 0 : i32
    return %c0_i32, %c0_i32_0 : i32, i32
  }
  func.func @transform_6(%arg0: i32) -> (i32, i32) {
    %c0_i32 = arith.constant 0 : i32
    %c0_i32_0 = arith.constant 0 : i32
    %c0_i32_1 = arith.constant 0 : i32
    return %c0_i32, %c0_i32_0 : i32, i32
  }
  func.func @transform_7(%arg0: i32) -> (i32, i32) {
    %c0_i32 = arith.constant 0 : i32
    %c0_i32_0 = arith.constant 0 : i32
    %c0_i32_1 = arith.constant 0 : i32
    return %c0_i32, %c0_i32_0 : i32, i32
  }
  func.func @transform_8(%arg0: i32) -> (i32, i32) {
    %c0_i32 = arith.constant 0 : i32
    %c0_i32_0 = arith.constant 0 : i32
    return %arg0, %c0_i32 : i32, i32
  }
  func.func @transform_9(%arg0: i32) -> (i32, i32) {
    %c0_i32 = arith.constant 0 : i32
    %c0_i32_0 = arith.constant 0 : i32
    return %arg0, %c0_i32 : i32, i32
  }
}

module attributes {stable_mosaic.version = 11 : i64} {
  func.func @_gemm_epilogue_kernel(%arg0: i32, %arg1: memref<64x216xbf16, #tpu.memory_space<vmem>>, %arg2: memref<216x8xbf16, #tpu.memory_space<vmem>>, %arg3: memref<1x8xf32, #tpu.memory_space<vmem>>, %arg4: memref<1x8xf32, #tpu.memory_space<vmem>>, %arg5: memref<64x8xf32, #tpu.memory_space<vmem>>, %arg6: memref<64x8xf32, #tpu.memory_space<vmem>>, %arg7: memref<64x8xf32, #tpu.memory_space<vmem>>) attributes {dimension_semantics = [#tpu.dimension_semantics<parallel>], iteration_bounds = array<i64: 2>, scalar_prefetch = 0 : i64, scratch_operands = 0 : i64, tpu.core_type = #tpu.core_type<tc>, window_params = [{transform_indices = @transform_0, window_bounds = array<i64: 64, 216>}, {pipeline_mode = #tpu.pipeline_mode<synchronous>, transform_indices = @transform_1, window_bounds = array<i64: 216, 8>}, {pipeline_mode = #tpu.pipeline_mode<synchronous>, transform_indices = @transform_2, window_bounds = array<i64: 1, 8>}, {pipeline_mode = #tpu.pipeline_mode<synchronous>, transform_indices = @transform_3, window_bounds = array<i64: 1, 8>}, {transform_indices = @transform_4, window_bounds = array<i64: 64, 8>}, {transform_indices = @transform_5, window_bounds = array<i64: 64, 8>}, {transform_indices = @transform_6, window_bounds = array<i64: 64, 8>}]} {
    %c0 = arith.constant 0 : index
    %c0_0 = arith.constant 0 : index
    %0 = vector.load %arg1[%c0, %c0_0] : memref<64x216xbf16, #tpu.memory_space<vmem>>, vector<64x216xbf16>
    %c0_1 = arith.constant 0 : index
    %c0_2 = arith.constant 0 : index
    %1 = vector.load %arg2[%c0_1, %c0_2] : memref<216x8xbf16, #tpu.memory_space<vmem>>, vector<216x8xbf16>
    %cst = arith.constant dense<0.000000e+00> : vector<64x8xf32>
    %2 = tpu.matmul %0, %1, %cst {dimension_numbers = #tpu.dot_dimension_numbers<[1], [0], [0], [1], [0, 0, 1, 1], [], []>} : vector<64x216xbf16>, vector<216x8xbf16>, vector<64x8xf32> -> vector<64x8xf32>
    %c0_3 = arith.constant 0 : index
    %c0_4 = arith.constant 0 : index
    %3 = vector.load %arg3[%c0_3, %c0_4] : memref<1x8xf32, #tpu.memory_space<vmem>>, vector<1x8xf32>
    %4 = vector.broadcast %3 : vector<1x8xf32> to vector<64x8xf32>
    %5 = arith.mulf %2, %4 : vector<64x8xf32>
    %c0_5 = arith.constant 0 : index
    %c0_6 = arith.constant 0 : index
    %6 = vector.load %arg4[%c0_5, %c0_6] : memref<1x8xf32, #tpu.memory_space<vmem>>, vector<1x8xf32>
    %7 = vector.broadcast %6 : vector<1x8xf32> to vector<64x8xf32>
    %8 = arith.addf %5, %7 : vector<64x8xf32>
    %c0_7 = arith.constant 0 : index
    %c0_8 = arith.constant 0 : index
    %9 = vector.load %arg5[%c0_7, %c0_8] : memref<64x8xf32, #tpu.memory_space<vmem>>, vector<64x8xf32>
    %10 = arith.addf %8, %9 : vector<64x8xf32>
    %cst_9 = arith.constant 0.000000e+00 : f32
    %11 = vector.broadcast %cst_9 : f32 to vector<64x8xf32>
    %12 = arith.maximumf %10, %11 : vector<64x8xf32>
    %c0_10 = arith.constant 0 : index
    %c0_11 = arith.constant 0 : index
    %13 = vector.load %arg6[%c0_10, %c0_11] : memref<64x8xf32, #tpu.memory_space<vmem>>, vector<64x8xf32>
    %14 = arith.mulf %12, %13 : vector<64x8xf32>
    %c0_12 = arith.constant 0 : index
    %c0_13 = arith.constant 0 : index
    %15 = vector.load %arg7[%c0_12, %c0_13] : memref<64x8xf32, #tpu.memory_space<vmem>>, vector<64x8xf32>
    tpu.vector_store %arg7[%c0_12, %c0_13], %14 {strides = array<i32>} : memref<64x8xf32, #tpu.memory_space<vmem>>, vector<64x8xf32>,
    return
  }
  func.func @transform_0(%arg0: i32) -> (i32, i32) {
    %c0_i32 = arith.constant 0 : i32
    %c0_i32_0 = arith.constant 0 : i32
    return %arg0, %c0_i32 : i32, i32
  }
  func.func @transform_1(%arg0: i32) -> (i32, i32) {
    %c0_i32 = arith.constant 0 : i32
    %c0_i32_0 = arith.constant 0 : i32
    %c0_i32_1 = arith.constant 0 : i32
    return %c0_i32, %c0_i32_0 : i32, i32
  }
  func.func @transform_2(%arg0: i32) -> (i32, i32) {
    %c0_i32 = arith.constant 0 : i32
    %c0_i32_0 = arith.constant 0 : i32
    %c0_i32_1 = arith.constant 0 : i32
    return %c0_i32, %c0_i32_0 : i32, i32
  }
  func.func @transform_3(%arg0: i32) -> (i32, i32) {
    %c0_i32 = arith.constant 0 : i32
    %c0_i32_0 = arith.constant 0 : i32
    %c0_i32_1 = arith.constant 0 : i32
    return %c0_i32, %c0_i32_0 : i32, i32
  }
  func.func @transform_4(%arg0: i32) -> (i32, i32) {
    %c0_i32 = arith.constant 0 : i32
    %c0_i32_0 = arith.constant 0 : i32
    return %arg0, %c0_i32 : i32, i32
  }
  func.func @transform_5(%arg0: i32) -> (i32, i32) {
    %c0_i32 = arith.constant 0 : i32
    %c0_i32_0 = arith.constant 0 : i32
    return %arg0, %c0_i32 : i32, i32
  }
  func.func @transform_6(%arg0: i32) -> (i32, i32) {
    %c0_i32 = arith.constant 0 : i32
    %c0_i32_0 = arith.constant 0 : i32
    return %arg0, %c0_i32 : i32, i32
  }
}

module attributes {stable_mosaic.version = 11 : i64} {
  func.func @_dual_gemm_kernel(%arg0: i32, %arg1: memref<8x216xbf16, #tpu.memory_space<vmem>>, %arg2: memref<216x16xbf16, #tpu.memory_space<vmem>>, %arg3: memref<1x16xf32, #tpu.memory_space<vmem>>, %arg4: memref<1x16xf32, #tpu.memory_space<vmem>>, %arg5: memref<8x8xbf16, #tpu.memory_space<vmem>>, %arg6: memref<8x16xbf16, #tpu.memory_space<vmem>>, %arg7: memref<1x16xf32, #tpu.memory_space<vmem>>, %arg8: memref<1x16xf32, #tpu.memory_space<vmem>>, %arg9: memref<8x16xf32, #tpu.memory_space<vmem>>, %arg10: memref<8x16xf32, #tpu.memory_space<vmem>>) attributes {dimension_semantics = [#tpu.dimension_semantics<parallel>], iteration_bounds = array<i64: 2>, scalar_prefetch = 0 : i64, scratch_operands = 0 : i64, tpu.core_type = #tpu.core_type<tc>, window_params = [{transform_indices = @transform_0, window_bounds = array<i64: 8, 216>}, {pipeline_mode = #tpu.pipeline_mode<synchronous>, transform_indices = @transform_1, window_bounds = array<i64: 216, 16>}, {pipeline_mode = #tpu.pipeline_mode<synchronous>, transform_indices = @transform_2, window_bounds = array<i64: 1, 16>}, {pipeline_mode = #tpu.pipeline_mode<synchronous>, transform_indices = @transform_3, window_bounds = array<i64: 1, 16>}, {transform_indices = @transform_4, window_bounds = array<i64: 8, 8>}, {pipeline_mode = #tpu.pipeline_mode<synchronous>, transform_indices = @transform_5, window_bounds = array<i64: 8, 16>}, {pipeline_mode = #tpu.pipeline_mode<synchronous>, transform_indices = @transform_6, window_bounds = array<i64: 1, 16>}, {pipeline_mode = #tpu.pipeline_mode<synchronous>, transform_indices = @transform_7, window_bounds = array<i64: 1, 16>}, {transform_indices = @transform_8, window_bounds = array<i64: 8, 16>}, {transform_indices = @transform_9, window_bounds = array<i64: 8, 16>}]} {
    %c0 = arith.constant 0 : index
    %c0_0 = arith.constant 0 : index
    %0 = vector.load %arg1[%c0, %c0_0] : memref<8x216xbf16, #tpu.memory_space<vmem>>, vector<8x216xbf16>
    %c0_1 = arith.constant 0 : index
    %c0_2 = arith.constant 0 : index
    %1 = vector.load %arg2[%c0_1, %c0_2] : memref<216x16xbf16, #tpu.memory_space<vmem>>, vector<216x16xbf16>
    %cst = arith.constant dense<0.000000e+00> : vector<8x16xf32>
    %2 = tpu.matmul %0, %1, %cst {dimension_numbers = #tpu.dot_dimension_numbers<[1], [0], [0], [1], [0, 0, 1, 1], [], []>} : vector<8x216xbf16>, vector<216x16xbf16>, vector<8x16xf32> -> vector<8x16xf32>
    %c0_3 = arith.constant 0 : index
    %c0_4 = arith.constant 0 : index
    %3 = vector.load %arg3[%c0_3, %c0_4] : memref<1x16xf32, #tpu.memory_space<vmem>>, vector<1x16xf32>
    %4 = vector.broadcast %3 : vector<1x16xf32> to vector<8x16xf32>
    %5 = arith.mulf %2, %4 : vector<8x16xf32>
    %c0_5 = arith.constant 0 : index
    %c0_6 = arith.constant 0 : index
    %6 = vector.load %arg4[%c0_5, %c0_6] : memref<1x16xf32, #tpu.memory_space<vmem>>, vector<1x16xf32>
    %7 = vector.broadcast %6 : vector<1x16xf32> to vector<8x16xf32>
    %8 = arith.addf %5, %7 : vector<8x16xf32>
    %cst_7 = arith.constant 0.000000e+00 : f32
    %9 = vector.broadcast %cst_7 : f32 to vector<8x16xf32>
    %10 = arith.maximumf %8, %9 : vector<8x16xf32>
    %c0_8 = arith.constant 0 : index
    %c0_9 = arith.constant 0 : index
    %11 = vector.load %arg9[%c0_8, %c0_9] : memref<8x16xf32, #tpu.memory_space<vmem>>, vector<8x16xf32>
    tpu.vector_store %arg9[%c0_8, %c0_9], %10 {strides = array<i32>} : memref<8x16xf32, #tpu.memory_space<vmem>>, vector<8x16xf32>,
    %c0_10 = arith.constant 0 : index
    %c0_11 = arith.constant 0 : index
    %12 = vector.load %arg5[%c0_10, %c0_11] : memref<8x8xbf16, #tpu.memory_space<vmem>>, vector<8x8xbf16>
    %c0_12 = arith.constant 0 : index
    %c0_13 = arith.constant 0 : index
    %13 = vector.load %arg6[%c0_12, %c0_13] : memref<8x16xbf16, #tpu.memory_space<vmem>>, vector<8x16xbf16>
    %cst_14 = arith.constant dense<0.000000e+00> : vector<8x16xf32>
    %14 = tpu.matmul %12, %13, %cst_14 {dimension_numbers = #tpu.dot_dimension_numbers<[1], [0], [0], [1], [0, 0, 1, 1], [], []>} : vector<8x8xbf16>, vector<8x16xbf16>, vector<8x16xf32> -> vector<8x16xf32>
    %c0_15 = arith.constant 0 : index
    %c0_16 = arith.constant 0 : index
    %15 = vector.load %arg7[%c0_15, %c0_16] : memref<1x16xf32, #tpu.memory_space<vmem>>, vector<1x16xf32>
    %16 = vector.broadcast %15 : vector<1x16xf32> to vector<8x16xf32>
    %17 = arith.mulf %14, %16 : vector<8x16xf32>
    %c0_17 = arith.constant 0 : index
    %c0_18 = arith.constant 0 : index
    %18 = vector.load %arg8[%c0_17, %c0_18] : memref<1x16xf32, #tpu.memory_space<vmem>>, vector<1x16xf32>
    %19 = vector.broadcast %18 : vector<1x16xf32> to vector<8x16xf32>
    %20 = arith.addf %17, %19 : vector<8x16xf32>
    %c0_19 = arith.constant 0 : index
    %c0_20 = arith.constant 0 : index
    %21 = vector.load %arg10[%c0_19, %c0_20] : memref<8x16xf32, #tpu.memory_space<vmem>>, vector<8x16xf32>
    tpu.vector_store %arg10[%c0_19, %c0_20], %20 {strides = array<i32>} : memref<8x16xf32, #tpu.memory_space<vmem>>, vector<8x16xf32>,
    return
  }
  func.func @transform_0(%arg0: i32) -> (i32, i32) {
    %c0_i32 = arith.constant 0 : i32
    %c0_i32_0 = arith.constant 0 : i32
    return %arg0, %c0_i32 : i32, i32
  }
  func.func @transform_1(%arg0: i32) -> (i32, i32) {
    %c0_i32 = arith.constant 0 : i32
    %c0_i32_0 = arith.constant 0 : i32
    %c0_i32_1 = arith.constant 0 : i32
    return %c0_i32, %c0_i32_0 : i32, i32
  }
  func.func @transform_2(%arg0: i32) -> (i32, i32) {
    %c0_i32 = arith.constant 0 : i32
    %c0_i32_0 = arith.constant 0 : i32
    %c0_i32_1 = arith.constant 0 : i32
    return %c0_i32, %c0_i32_0 : i32, i32
  }
  func.func @transform_3(%arg0: i32) -> (i32, i32) {
    %c0_i32 = arith.constant 0 : i32
    %c0_i32_0 = arith.constant 0 : i32
    %c0_i32_1 = arith.constant 0 : i32
    return %c0_i32, %c0_i32_0 : i32, i32
  }
  func.func @transform_4(%arg0: i32) -> (i32, i32) {
    %c0_i32 = arith.constant 0 : i32
    %c0_i32_0 = arith.constant 0 : i32
    return %arg0, %c0_i32 : i32, i32
  }
  func.func @transform_5(%arg0: i32) -> (i32, i32) {
    %c0_i32 = arith.constant 0 : i32
    %c0_i32_0 = arith.constant 0 : i32
    %c0_i32_1 = arith.constant 0 : i32
    return %c0_i32, %c0_i32_0 : i32, i32
  }
  func.func @transform_6(%arg0: i32) -> (i32, i32) {
    %c0_i32 = arith.constant 0 : i32
    %c0_i32_0 = arith.constant 0 : i32
    %c0_i32_1 = arith.constant 0 : i32
    return %c0_i32, %c0_i32_0 : i32, i32
  }
  func.func @transform_7(%arg0: i32) -> (i32, i32) {
    %c0_i32 = arith.constant 0 : i32
    %c0_i32_0 = arith.constant 0 : i32
    %c0_i32_1 = arith.constant 0 : i32
    return %c0_i32, %c0_i32_0 : i32, i32
  }
  func.func @transform_8(%arg0: i32) -> (i32, i32) {
    %c0_i32 = arith.constant 0 : i32
    %c0_i32_0 = arith.constant 0 : i32
    return %arg0, %c0_i32 : i32, i32
  }
  func.func @transform_9(%arg0: i32) -> (i32, i32) {
    %c0_i32 = arith.constant 0 : i32
    %c0_i32_0 = arith.constant 0 : i32
    return %arg0, %c0_i32 : i32, i32
  }
}

module attributes {stable_mosaic.version = 11 : i64} {
  func.func @_gemm_epilogue_kernel(%arg0: i32, %arg1: memref<8x432xbf16, #tpu.memory_space<vmem>>, %arg2: memref<432x16xbf16, #tpu.memory_space<vmem>>, %arg3: memref<1x16xf32, #tpu.memory_space<vmem>>, %arg4: memref<1x16xf32, #tpu.memory_space<vmem>>, %arg5: memref<8x16xf32, #tpu.memory_space<vmem>>, %arg6: memref<8x16xf32, #tpu.memory_space<vmem>>, %arg7: memref<8x16xf32, #tpu.memory_space<vmem>>) attributes {dimension_semantics = [#tpu.dimension_semantics<parallel>], iteration_bounds = array<i64: 2>, scalar_prefetch = 0 : i64, scratch_operands = 0 : i64, tpu.core_type = #tpu.core_type<tc>, window_params = [{transform_indices = @transform_0, window_bounds = array<i64: 8, 432>}, {pipeline_mode = #tpu.pipeline_mode<synchronous>, transform_indices = @transform_1, window_bounds = array<i64: 432, 16>}, {pipeline_mode = #tpu.pipeline_mode<synchronous>, transform_indices = @transform_2, window_bounds = array<i64: 1, 16>}, {pipeline_mode = #tpu.pipeline_mode<synchronous>, transform_indices = @transform_3, window_bounds = array<i64: 1, 16>}, {transform_indices = @transform_4, window_bounds = array<i64: 8, 16>}, {transform_indices = @transform_5, window_bounds = array<i64: 8, 16>}, {transform_indices = @transform_6, window_bounds = array<i64: 8, 16>}]} {
    %c0 = arith.constant 0 : index
    %c0_0 = arith.constant 0 : index
    %0 = vector.load %arg1[%c0, %c0_0] : memref<8x432xbf16, #tpu.memory_space<vmem>>, vector<8x432xbf16>
    %c0_1 = arith.constant 0 : index
    %c0_2 = arith.constant 0 : index
    %1 = vector.load %arg2[%c0_1, %c0_2] : memref<432x16xbf16, #tpu.memory_space<vmem>>, vector<432x16xbf16>
    %cst = arith.constant dense<0.000000e+00> : vector<8x16xf32>
    %2 = tpu.matmul %0, %1, %cst {dimension_numbers = #tpu.dot_dimension_numbers<[1], [0], [0], [1], [0, 0, 1, 1], [], []>} : vector<8x432xbf16>, vector<432x16xbf16>, vector<8x16xf32> -> vector<8x16xf32>
    %c0_3 = arith.constant 0 : index
    %c0_4 = arith.constant 0 : index
    %3 = vector.load %arg3[%c0_3, %c0_4] : memref<1x16xf32, #tpu.memory_space<vmem>>, vector<1x16xf32>
    %4 = vector.broadcast %3 : vector<1x16xf32> to vector<8x16xf32>
    %5 = arith.mulf %2, %4 : vector<8x16xf32>
    %c0_5 = arith.constant 0 : index
    %c0_6 = arith.constant 0 : index
    %6 = vector.load %arg4[%c0_5, %c0_6] : memref<1x16xf32, #tpu.memory_space<vmem>>, vector<1x16xf32>
    %7 = vector.broadcast %6 : vector<1x16xf32> to vector<8x16xf32>
    %8 = arith.addf %5, %7 : vector<8x16xf32>
    %c0_7 = arith.constant 0 : index
    %c0_8 = arith.constant 0 : index
    %9 = vector.load %arg5[%c0_7, %c0_8] : memref<8x16xf32, #tpu.memory_space<vmem>>, vector<8x16xf32>
    %10 = arith.addf %8, %9 : vector<8x16xf32>
    %cst_9 = arith.constant 0.000000e+00 : f32
    %11 = vector.broadcast %cst_9 : f32 to vector<8x16xf32>
    %12 = arith.maximumf %10, %11 : vector<8x16xf32>
    %c0_10 = arith.constant 0 : index
    %c0_11 = arith.constant 0 : index
    %13 = vector.load %arg6[%c0_10, %c0_11] : memref<8x16xf32, #tpu.memory_space<vmem>>, vector<8x16xf32>
    %14 = arith.mulf %12, %13 : vector<8x16xf32>
    %c0_12 = arith.constant 0 : index
    %c0_13 = arith.constant 0 : index
    %15 = vector.load %arg7[%c0_12, %c0_13] : memref<8x16xf32, #tpu.memory_space<vmem>>, vector<8x16xf32>
    tpu.vector_store %arg7[%c0_12, %c0_13], %14 {strides = array<i32>} : memref<8x16xf32, #tpu.memory_space<vmem>>, vector<8x16xf32>,
    return
  }
  func.func @transform_0(%arg0: i32) -> (i32, i32) {
    %c0_i32 = arith.constant 0 : i32
    %c0_i32_0 = arith.constant 0 : i32
    return %arg0, %c0_i32 : i32, i32
  }
  func.func @transform_1(%arg0: i32) -> (i32, i32) {
    %c0_i32 = arith.constant 0 : i32
    %c0_i32_0 = arith.constant 0 : i32
    %c0_i32_1 = arith.constant 0 : i32
    return %c0_i32, %c0_i32_0 : i32, i32
  }
  func.func @transform_2(%arg0: i32) -> (i32, i32) {
    %c0_i32 = arith.constant 0 : i32
    %c0_i32_0 = arith.constant 0 : i32
    %c0_i32_1 = arith.constant 0 : i32
    return %c0_i32, %c0_i32_0 : i32, i32
  }
  func.func @transform_3(%arg0: i32) -> (i32, i32) {
    %c0_i32 = arith.constant 0 : i32
    %c0_i32_0 = arith.constant 0 : i32
    %c0_i32_1 = arith.constant 0 : i32
    return %c0_i32, %c0_i32_0 : i32, i32
  }
  func.func @transform_4(%arg0: i32) -> (i32, i32) {
    %c0_i32 = arith.constant 0 : i32
    %c0_i32_0 = arith.constant 0 : i32
    return %arg0, %c0_i32 : i32, i32
  }
  func.func @transform_5(%arg0: i32) -> (i32, i32) {
    %c0_i32 = arith.constant 0 : i32
    %c0_i32_0 = arith.constant 0 : i32
    return %arg0, %c0_i32 : i32, i32
  }
  func.func @transform_6(%arg0: i32) -> (i32, i32) {
    %c0_i32 = arith.constant 0 : i32
    %c0_i32_0 = arith.constant 0 : i32
    return %arg0, %c0_i32 : i32, i32
  }
}

module attributes {stable_mosaic.version = 11 : i64} {
  func.func @_dual_gemm_kernel(%arg0: i32, %arg1: memref<2x432xbf16, #tpu.memory_space<vmem>>, %arg2: memref<432x32xbf16, #tpu.memory_space<vmem>>, %arg3: memref<1x32xf32, #tpu.memory_space<vmem>>, %arg4: memref<1x32xf32, #tpu.memory_space<vmem>>, %arg5: memref<2x16xbf16, #tpu.memory_space<vmem>>, %arg6: memref<16x32xbf16, #tpu.memory_space<vmem>>, %arg7: memref<1x32xf32, #tpu.memory_space<vmem>>, %arg8: memref<1x32xf32, #tpu.memory_space<vmem>>, %arg9: memref<2x32xf32, #tpu.memory_space<vmem>>, %arg10: memref<2x32xf32, #tpu.memory_space<vmem>>) attributes {dimension_semantics = [#tpu.dimension_semantics<parallel>], iteration_bounds = array<i64: 1>, scalar_prefetch = 0 : i64, scratch_operands = 0 : i64, tpu.core_type = #tpu.core_type<tc>, window_params = [{transform_indices = @transform_0, window_bounds = array<i64: 2, 432>}, {pipeline_mode = #tpu.pipeline_mode<synchronous>, transform_indices = @transform_1, window_bounds = array<i64: 432, 32>}, {pipeline_mode = #tpu.pipeline_mode<synchronous>, transform_indices = @transform_2, window_bounds = array<i64: 1, 32>}, {pipeline_mode = #tpu.pipeline_mode<synchronous>, transform_indices = @transform_3, window_bounds = array<i64: 1, 32>}, {transform_indices = @transform_4, window_bounds = array<i64: 2, 16>}, {pipeline_mode = #tpu.pipeline_mode<synchronous>, transform_indices = @transform_5, window_bounds = array<i64: 16, 32>}, {pipeline_mode = #tpu.pipeline_mode<synchronous>, transform_indices = @transform_6, window_bounds = array<i64: 1, 32>}, {pipeline_mode = #tpu.pipeline_mode<synchronous>, transform_indices = @transform_7, window_bounds = array<i64: 1, 32>}, {transform_indices = @transform_8, window_bounds = array<i64: 2, 32>}, {transform_indices = @transform_9, window_bounds = array<i64: 2, 32>}]} {
    %c0 = arith.constant 0 : index
    %c0_0 = arith.constant 0 : index
    %0 = vector.load %arg1[%c0, %c0_0] : memref<2x432xbf16, #tpu.memory_space<vmem>>, vector<2x432xbf16>
    %c0_1 = arith.constant 0 : index
    %c0_2 = arith.constant 0 : index
    %1 = vector.load %arg2[%c0_1, %c0_2] : memref<432x32xbf16, #tpu.memory_space<vmem>>, vector<432x32xbf16>
    %cst = arith.constant dense<0.000000e+00> : vector<2x32xf32>
    %2 = tpu.matmul %0, %1, %cst {dimension_numbers = #tpu.dot_dimension_numbers<[1], [0], [0], [1], [0, 0, 1, 1], [], []>} : vector<2x432xbf16>, vector<432x32xbf16>, vector<2x32xf32> -> vector<2x32xf32>
    %c0_3 = arith.constant 0 : index
    %c0_4 = arith.constant 0 : index
    %3 = vector.load %arg3[%c0_3, %c0_4] : memref<1x32xf32, #tpu.memory_space<vmem>>, vector<1x32xf32>
    %4 = vector.broadcast %3 : vector<1x32xf32> to vector<2x32xf32>
    %5 = arith.mulf %2, %4 : vector<2x32xf32>
    %c0_5 = arith.constant 0 : index
    %c0_6 = arith.constant 0 : index
    %6 = vector.load %arg4[%c0_5, %c0_6] : memref<1x32xf32, #tpu.memory_space<vmem>>, vector<1x32xf32>
    %7 = vector.broadcast %6 : vector<1x32xf32> to vector<2x32xf32>
    %8 = arith.addf %5, %7 : vector<2x32xf32>
    %cst_7 = arith.constant 0.000000e+00 : f32
    %9 = vector.broadcast %cst_7 : f32 to vector<2x32xf32>
    %10 = arith.maximumf %8, %9 : vector<2x32xf32>
    %c0_8 = arith.constant 0 : index
    %c0_9 = arith.constant 0 : index
    %11 = vector.load %arg9[%c0_8, %c0_9] : memref<2x32xf32, #tpu.memory_space<vmem>>, vector<2x32xf32>
    tpu.vector_store %arg9[%c0_8, %c0_9], %10 {strides = array<i32>} : memref<2x32xf32, #tpu.memory_space<vmem>>, vector<2x32xf32>,
    %c0_10 = arith.constant 0 : index
    %c0_11 = arith.constant 0 : index
    %12 = vector.load %arg5[%c0_10, %c0_11] : memref<2x16xbf16, #tpu.memory_space<vmem>>, vector<2x16xbf16>
    %c0_12 = arith.constant 0 : index
    %c0_13 = arith.constant 0 : index
    %13 = vector.load %arg6[%c0_12, %c0_13] : memref<16x32xbf16, #tpu.memory_space<vmem>>, vector<16x32xbf16>
    %cst_14 = arith.constant dense<0.000000e+00> : vector<2x32xf32>
    %14 = tpu.matmul %12, %13, %cst_14 {dimension_numbers = #tpu.dot_dimension_numbers<[1], [0], [0], [1], [0, 0, 1, 1], [], []>} : vector<2x16xbf16>, vector<16x32xbf16>, vector<2x32xf32> -> vector<2x32xf32>
    %c0_15 = arith.constant 0 : index
    %c0_16 = arith.constant 0 : index
    %15 = vector.load %arg7[%c0_15, %c0_16] : memref<1x32xf32, #tpu.memory_space<vmem>>, vector<1x32xf32>
    %16 = vector.broadcast %15 : vector<1x32xf32> to vector<2x32xf32>
    %17 = arith.mulf %14, %16 : vector<2x32xf32>
    %c0_17 = arith.constant 0 : index
    %c0_18 = arith.constant 0 : index
    %18 = vector.load %arg8[%c0_17, %c0_18] : memref<1x32xf32, #tpu.memory_space<vmem>>, vector<1x32xf32>
    %19 = vector.broadcast %18 : vector<1x32xf32> to vector<2x32xf32>
    %20 = arith.addf %17, %19 : vector<2x32xf32>
    %c0_19 = arith.constant 0 : index
    %c0_20 = arith.constant 0 : index
    %21 = vector.load %arg10[%c0_19, %c0_20] : memref<2x32xf32, #tpu.memory_space<vmem>>, vector<2x32xf32>
    tpu.vector_store %arg10[%c0_19, %c0_20], %20 {strides = array<i32>} : memref<2x32xf32, #tpu.memory_space<vmem>>, vector<2x32xf32>,
    return
  }
  func.func @transform_0(%arg0: i32) -> (i32, i32) {
    %c0_i32 = arith.constant 0 : i32
    %c0_i32_0 = arith.constant 0 : i32
    return %arg0, %c0_i32 : i32, i32
  }
  func.func @transform_1(%arg0: i32) -> (i32, i32) {
    %c0_i32 = arith.constant 0 : i32
    %c0_i32_0 = arith.constant 0 : i32
    %c0_i32_1 = arith.constant 0 : i32
    return %c0_i32, %c0_i32_0 : i32, i32
  }
  func.func @transform_2(%arg0: i32) -> (i32, i32) {
    %c0_i32 = arith.constant 0 : i32
    %c0_i32_0 = arith.constant 0 : i32
    %c0_i32_1 = arith.constant 0 : i32
    return %c0_i32, %c0_i32_0 : i32, i32
  }
  func.func @transform_3(%arg0: i32) -> (i32, i32) {
    %c0_i32 = arith.constant 0 : i32
    %c0_i32_0 = arith.constant 0 : i32
    %c0_i32_1 = arith.constant 0 : i32
    return %c0_i32, %c0_i32_0 : i32, i32
  }
  func.func @transform_4(%arg0: i32) -> (i32, i32) {
    %c0_i32 = arith.constant 0 : i32
    %c0_i32_0 = arith.constant 0 : i32
    return %arg0, %c0_i32 : i32, i32
  }
  func.func @transform_5(%arg0: i32) -> (i32, i32) {
    %c0_i32 = arith.constant 0 : i32
    %c0_i32_0 = arith.constant 0 : i32
    %c0_i32_1 = arith.constant 0 : i32
    return %c0_i32, %c0_i32_0 : i32, i32
  }
  func.func @transform_6(%arg0: i32) -> (i32, i32) {
    %c0_i32 = arith.constant 0 : i32
    %c0_i32_0 = arith.constant 0 : i32
    %c0_i32_1 = arith.constant 0 : i32
    return %c0_i32, %c0_i32_0 : i32, i32
  }
  func.func @transform_7(%arg0: i32) -> (i32, i32) {
    %c0_i32 = arith.constant 0 : i32
    %c0_i32_0 = arith.constant 0 : i32
    %c0_i32_1 = arith.constant 0 : i32
    return %c0_i32, %c0_i32_0 : i32, i32
  }
  func.func @transform_8(%arg0: i32) -> (i32, i32) {
    %c0_i32 = arith.constant 0 : i32
    %c0_i32_0 = arith.constant 0 : i32
    return %arg0, %c0_i32 : i32, i32
  }
  func.func @transform_9(%arg0: i32) -> (i32, i32) {
    %c0_i32 = arith.constant 0 : i32
    %c0_i32_0 = arith.constant 0 : i32
    return %arg0, %c0_i32 : i32, i32
  }
}

module attributes {stable_mosaic.version = 11 : i64} {
  func.func @_gemm_epilogue_kernel(%arg0: i32, %arg1: memref<2x864xbf16, #tpu.memory_space<vmem>>, %arg2: memref<864x32xbf16, #tpu.memory_space<vmem>>, %arg3: memref<1x32xf32, #tpu.memory_space<vmem>>, %arg4: memref<1x32xf32, #tpu.memory_space<vmem>>, %arg5: memref<2x32xf32, #tpu.memory_space<vmem>>, %arg6: memref<2x32xf32, #tpu.memory_space<vmem>>) attributes {dimension_semantics = [#tpu.dimension_semantics<parallel>], iteration_bounds = array<i64: 1>, scalar_prefetch = 0 : i64, scratch_operands = 0 : i64, tpu.core_type = #tpu.core_type<tc>, window_params = [{transform_indices = @transform_0, window_bounds = array<i64: 2, 864>}, {pipeline_mode = #tpu.pipeline_mode<synchronous>, transform_indices = @transform_1, window_bounds = array<i64: 864, 32>}, {pipeline_mode = #tpu.pipeline_mode<synchronous>, transform_indices = @transform_2, window_bounds = array<i64: 1, 32>}, {pipeline_mode = #tpu.pipeline_mode<synchronous>, transform_indices = @transform_3, window_bounds = array<i64: 1, 32>}, {transform_indices = @transform_4, window_bounds = array<i64: 2, 32>}, {transform_indices = @transform_5, window_bounds = array<i64: 2, 32>}]} {
    %c0 = arith.constant 0 : index
    %c0_0 = arith.constant 0 : index
    %0 = vector.load %arg1[%c0, %c0_0] : memref<2x864xbf16, #tpu.memory_space<vmem>>, vector<2x864xbf16>
    %c0_1 = arith.constant 0 : index
    %c0_2 = arith.constant 0 : index
    %1 = vector.load %arg2[%c0_1, %c0_2] : memref<864x32xbf16, #tpu.memory_space<vmem>>, vector<864x32xbf16>
    %cst = arith.constant dense<0.000000e+00> : vector<2x32xf32>
    %2 = tpu.matmul %0, %1, %cst {dimension_numbers = #tpu.dot_dimension_numbers<[1], [0], [0], [1], [0, 0, 1, 1], [], []>} : vector<2x864xbf16>, vector<864x32xbf16>, vector<2x32xf32> -> vector<2x32xf32>
    %c0_3 = arith.constant 0 : index
    %c0_4 = arith.constant 0 : index
    %3 = vector.load %arg3[%c0_3, %c0_4] : memref<1x32xf32, #tpu.memory_space<vmem>>, vector<1x32xf32>
    %4 = vector.broadcast %3 : vector<1x32xf32> to vector<2x32xf32>
    %5 = arith.mulf %2, %4 : vector<2x32xf32>
    %c0_5 = arith.constant 0 : index
    %c0_6 = arith.constant 0 : index
    %6 = vector.load %arg4[%c0_5, %c0_6] : memref<1x32xf32, #tpu.memory_space<vmem>>, vector<1x32xf32>
    %7 = vector.broadcast %6 : vector<1x32xf32> to vector<2x32xf32>
    %8 = arith.addf %5, %7 : vector<2x32xf32>
    %c0_7 = arith.constant 0 : index
    %c0_8 = arith.constant 0 : index
    %9 = vector.load %arg5[%c0_7, %c0_8] : memref<2x32xf32, #tpu.memory_space<vmem>>, vector<2x32xf32>
    %10 = arith.addf %8, %9 : vector<2x32xf32>
    %cst_9 = arith.constant 0.000000e+00 : f32
    %11 = vector.broadcast %cst_9 : f32 to vector<2x32xf32>
    %12 = arith.maximumf %10, %11 : vector<2x32xf32>
    %c0_10 = arith.constant 0 : index
    %c0_11 = arith.constant 0 : index
    %13 = vector.load %arg6[%c0_10, %c0_11] : memref<2x32xf32, #tpu.memory_space<vmem>>, vector<2x32xf32>
    tpu.vector_store %arg6[%c0_10, %c0_11], %12 {strides = array<i32>} : memref<2x32xf32, #tpu.memory_space<vmem>>, vector<2x32xf32>,
    return
  }
  func.func @transform_0(%arg0: i32) -> (i32, i32) {
    %c0_i32 = arith.constant 0 : i32
    %c0_i32_0 = arith.constant 0 : i32
    return %arg0, %c0_i32 : i32, i32
  }
  func.func @transform_1(%arg0: i32) -> (i32, i32) {
    %c0_i32 = arith.constant 0 : i32
    %c0_i32_0 = arith.constant 0 : i32
    %c0_i32_1 = arith.constant 0 : i32
    return %c0_i32, %c0_i32_0 : i32, i32
  }
  func.func @transform_2(%arg0: i32) -> (i32, i32) {
    %c0_i32 = arith.constant 0 : i32
    %c0_i32_0 = arith.constant 0 : i32
    %c0_i32_1 = arith.constant 0 : i32
    return %c0_i32, %c0_i32_0 : i32, i32
  }
  func.func @transform_3(%arg0: i32) -> (i32, i32) {
    %c0_i32 = arith.constant 0 : i32
    %c0_i32_0 = arith.constant 0 : i32
    %c0_i32_1 = arith.constant 0 : i32
    return %c0_i32, %c0_i32_0 : i32, i32
  }
  func.func @transform_4(%arg0: i32) -> (i32, i32) {
    %c0_i32 = arith.constant 0 : i32
    %c0_i32_0 = arith.constant 0 : i32
    return %arg0, %c0_i32 : i32, i32
  }
  func.func @transform_5(%arg0: i32) -> (i32, i32) {
    %c0_i32 = arith.constant 0 : i32
    %c0_i32_0 = arith.constant 0 : i32
    return %arg0, %c0_i32 : i32, i32
  }
}

</mosaic_0001>

<bundles_post_ra>
// kernel: interactive_hnn_forward.9
= control target key start
LH: loop header
LB: loop body
LE: loop exit
PB: predicated region body
PF: predicated region fallthrough
CT: control target
= control target key end

     0   :  { %s3626_s18 = smov 0   ;;  %s3628_s19 = smov 0   ;;  %s4515_s0 = inlined_call_operand.vmem [shape: bf16[8,1024,27], index: 0, kind: input, shape index: {}]   ;;  %s4516_s1 = inlined_call_operand.vmem [shape: bf16[27,4], index: 1, kind: input, shape index: {}]   ;;  %s4517_s2 = inlined_call_operand.vmem [shape: f32[1,4], index: 2, kind: input, shape index: {}]   ;;  %s4518_s3 = inlined_call_operand.vmem [shape: f32[1,4], index: 3, kind: input, shape index: {}]   ;;  %s4519_s4 = inlined_call_operand.vmem [shape: f32[2,1,4], index: 4, kind: input, shape index: {}]   ;;  %s4520_s5 = inlined_call_operand.vmem [shape: f32[1024,4], index: 5, kind: output, shape index: {}]  }
   0x1   :  { %s3630_s20 = smov 0   ;;  %s3632_s21 = smov 0  }
   0x2   :  { %s3634_s22 = smov 0   ;;  %s3636_s23 = smov 0  }
   0x3   :  { %s3638_s24 = smov 0  }
   0x4 LB: > { %s24_s25 = sadd.s32 1, %s3585_s22  ;;  %s27_s26 = sadd.s32 1, %s3589_s23  ;;  %s3593_s24 = sphi %s3638_s24, %s15_s24   ;;  %s3589_s23 = sphi %s3636_s23, %s4527_s23   ;;  %s3585_s22 = sphi %s3634_s22, %s4526_s22   ;;  %s3581_s21 = sphi %s3632_s21, %s4525_s21   ;;  %s3577_s20 = sphi %s3630_s20, %s4524_s20   ;;  %s3573_s19 = sphi %s3628_s19, %s4523_s19   ;;  %s3569_s18 = sphi %s3626_s18, %s4522_s18  }
   0x5   : > { %p25_p0 = scmp.ge.s32.totalorder %s24_s25, 4  ;;  %p45_p1 = scmp.ne.s32.totalorder %s3573_s19, %s3569_s18 }
   0x6   : > { %p46_p2 = scmp.eq.s32.totalorder %s3593_s24, 0  ;;  %s2911_s27 = sshll.u32 %s3589_s23, 2 }
   0x7   : > { %s4529_s25 = smov (%p25_p0, %s24_s25), 0  ;;  %s4531_s26 = smov (!%p25_p0, %s27_s26), %s3589_s23 }
   0x8   : > { %p29_p3 = scmp.ge.s32.totalorder %s4531_s26, 2  ;;  %p47_p4 = por %p46_p2, %p45_p1 }
   0x9   : > { %s32_s28 = sadd.s32 %s3585_s22, %s2911_s27  ;;  %s38_s7 = sadd.s32 1, %s3573_s19 }
   0xa   : > { %s4533_s26 = smov (%p29_p3, %s4531_s26), 0  ;;  %p2916_p6 = scmp.ge.s32.totalorder %s3593_s24, 8 }
   0xb   : > { %s2912_s29 = sshll.u32 %s4533_s26, 2 }
   0xc   : > { %s34_s30 = sadd.s32 %s2912_s29, %s4529_s25  ;;  %199 = sbr.rel (%p2916_p6) target bundleno = 55 (0x37), region = 28 }
   0xd   : > { %s35_s6 = ssub.s32 %s32_s28, %s34_s30 }
   0xe   : > { %p36_p5 = scmp.eq.s32.totalorder %s35_s6, 0 }
  0x10   : > { %s3677_s8 = scalar_select %p36_p5, %s3573_s19, %s38_s7  }
  0x13   : > { %202 = sbr.rel (!%p47_p4) target bundleno = 55 (0x37), region = 32  ;;  %s204_s9 = sand.u32 (%p47_p4), 1, %s3573_s19  }
  0x14   : > { %s3173_s10 = sshll.u32 (%p47_p4), %s32_s28, 6  ;;  %s2917_s11 = sshll.u32 (%p47_p4), %s204_s9, 9 }
  0x15   : > { %s3684_s14 = scalar_lea.vmem (%p47_p4), %s4515_s0, %s3173_s10  ;;  %s3689_s15 = scalar_lea.vmem (%p47_p4), [#allocation2], %s2917_s11 }
  0x16   : > { %v227_v0 = vld [vmem:[%s3684_s14] sm:$0xff] (%p47_p4)   ;;  %v231_v1 = vld [vmem:[%s3684_s14 + $0x8] sm:$0xff] (%p47_p4)   ;;  %v235_v2 = vld [vmem:[%s3684_s14 + $0x10] sm:$0xff] (%p47_p4)  }
  0x17   : > { %228 = vst [vmem:[%s3689_s15] sm:$0xff] (%p47_p4), %v227_v0   ;;  %232 = vst [vmem:[%s3689_s15 + $0x8] sm:$0xff] (%p47_p4), %v231_v1   ;;  %v239_v3 = vld [vmem:[%s3684_s14 + $0x18] sm:$0xff] (%p47_p4)   ;;  %v243_v4 = vld [vmem:[%s3684_s14 + $0x20] sm:$0xff] (%p47_p4)  }
  0x18   : > { %236 = vst [vmem:[%s3689_s15 + $0x10] sm:$0xff] (%p47_p4), %v235_v2   ;;  %v247_v5 = vld [vmem:[%s3684_s14 + $0x28] sm:$0xff] (%p47_p4)   ;;  %240 = vst [vmem:[%s3689_s15 + $0x18] sm:$0xff] (%p47_p4), %v239_v3   ;;  %v251_v6 = vld [vmem:[%s3684_s14 + $0x30] sm:$0xff] (%p47_p4)  }
  0x19   : > { %244 = vst [vmem:[%s3689_s15 + $0x20] sm:$0xff] (%p47_p4), %v243_v4   ;;  %248 = vst [vmem:[%s3689_s15 + $0x28] sm:$0xff] (%p47_p4), %v247_v5   ;;  %v255_v7 = vld [vmem:[%s3684_s14 + $0x38] sm:$0xff] (%p47_p4)   ;;  %v259_v8 = vld [vmem:[%s3684_s14 + $0x200] sm:$0xff] (%p47_p4)  }
  0x1a   : > { %252 = vst [vmem:[%s3689_s15 + $0x30] sm:$0xff] %v251_v6   ;;  %256 = vst [vmem:[%s3689_s15 + $0x38] sm:$0xff] %v255_v7   ;;  %v263_v9 = vld [vmem:[%s3684_s14 + $0x208] sm:$0xff]   ;;  %v267_v10 = vld [vmem:[%s3684_s14 + $0x210] sm:$0xff]  }
  0x1b   : > { %260 = vst [vmem:[%s3689_s15 + $0x40] sm:$0xff] %v259_v8   ;;  %v271_v11 = vld [vmem:[%s3684_s14 + $0x218] sm:$0xff]   ;;  %264 = vst [vmem:[%s3689_s15 + $0x48] sm:$0xff] %v263_v9   ;;  %v275_v12 = vld [vmem:[%s3684_s14 + $0x220] sm:$0xff]  }
  0x1c   : > { %268 = vst [vmem:[%s3689_s15 + $0x50] sm:$0xff] %v267_v10   ;;  %272 = vst [vmem:[%s3689_s15 + $0x58] sm:$0xff] %v271_v11   ;;  %v279_v13 = vld [vmem:[%s3684_s14 + $0x228] sm:$0xff]   ;;  %v283_v14 = vld [vmem:[%s3684_s14 + $0x230] sm:$0xff]  }
  0x1d   : > { %276 = vst [vmem:[%s3689_s15 + $0x60] sm:$0xff] %v275_v12   ;;  %280 = vst [vmem:[%s3689_s15 + $0x68] sm:$0xff] %v279_v13   ;;  %v287_v15 = vld [vmem:[%s3684_s14 + $0x238] sm:$0xff]   ;;  %v291_v16 = vld [vmem:[%s3684_s14 + $0x400] sm:$0xff]  }
  0x1e   : > { %284 = vst [vmem:[%s3689_s15 + $0x70] sm:$0xff] %v283_v14   ;;  %v295_v17 = vld [vmem:[%s3684_s14 + $0x408] sm:$0xff]   ;;  %288 = vst [vmem:[%s3689_s15 + $0x78] sm:$0xff] %v287_v15   ;;  %v299_v18 = vld [vmem:[%s3684_s14 + $0x410] sm:$0xff]  }
  0x1f   : > { %292 = vst [vmem:[%s3689_s15 + $0x80] sm:$0xff] %v291_v16   ;;  %296 = vst [vmem:[%s3689_s15 + $0x88] sm:$0xff] %v295_v17   ;;  %v303_v19 = vld [vmem:[%s3684_s14 + $0x418] sm:$0xff]   ;;  %v307_v20 = vld [vmem:[%s3684_s14 + $0x420] sm:$0xff]  }
  0x20   : > { %300 = vst [vmem:[%s3689_s15 + $0x90] sm:$0xff] %v299_v18   ;;  %304 = vst [vmem:[%s3689_s15 + $0x98] sm:$0xff] %v303_v19   ;;  %v311_v21 = vld [vmem:[%s3684_s14 + $0x428] sm:$0xff]   ;;  %v315_v22 = vld [vmem:[%s3684_s14 + $0x430] sm:$0xff]  }
  0x21   : > { %308 = vst [vmem:[%s3689_s15 + $0xa0] sm:$0xff] %v307_v20   ;;  %v319_v23 = vld [vmem:[%s3684_s14 + $0x438] sm:$0xff]   ;;  %312 = vst [vmem:[%s3689_s15 + $0xa8] sm:$0xff] %v311_v21   ;;  %v323_v24 = vld [vmem:[%s3684_s14 + $0x600] sm:$0xff]  }
  0x22   : > { %316 = vst [vmem:[%s3689_s15 + $0xb0] sm:$0xff] %v315_v22   ;;  %320 = vst [vmem:[%s3689_s15 + $0xb8] sm:$0xff] %v319_v23   ;;  %v327_v25 = vld [vmem:[%s3684_s14 + $0x608] sm:$0xff]   ;;  %v331_v26 = vld [vmem:[%s3684_s14 + $0x610] sm:$0xff]  }
  0x23   : > { %324 = vst [vmem:[%s3689_s15 + $0xc0] sm:$0xff] %v323_v24   ;;  %328 = vst [vmem:[%s3689_s15 + $0xc8] sm:$0xff] %v327_v25   ;;  %v335_v27 = vld [vmem:[%s3684_s14 + $0x618] sm:$0xff]   ;;  %v339_v28 = vld [vmem:[%s3684_s14 + $0x620] sm:$0xff]  }
  0x24   : > { %332 = vst [vmem:[%s3689_s15 + $0xd0] sm:$0xff] %v331_v26   ;;  %v343_v29 = vld [vmem:[%s3684_s14 + $0x628] sm:$0xff]   ;;  %336 = vst [vmem:[%s3689_s15 + $0xd8] sm:$0xff] %v335_v27   ;;  %v347_v30 = vld [vmem:[%s3684_s14 + $0x630] sm:$0xff]  }
  0x25   : > { %340 = vst [vmem:[%s3689_s15 + $0xe0] sm:$0xff] %v339_v28   ;;  %344 = vst [vmem:[%s3689_s15 + $0xe8] sm:$0xff] %v343_v29   ;;  %v351_v31 = vld [vmem:[%s3684_s14 + $0x638] sm:$0xff]   ;;  %v355_v32 = vld [vmem:[%s3684_s14 + $0x800] sm:$0xff]  }
  0x26   : > { %348 = vst [vmem:[%s3689_s15 + $0xf0] sm:$0xff] %v347_v30   ;;  %352 = vst [vmem:[%s3689_s15 + $0xf8] sm:$0xff] %v351_v31   ;;  %v359_v33 = vld [vmem:[%s3684_s14 + $0x808] sm:$0xff]   ;;  %v363_v34 = vld [vmem:[%s3684_s14 + $0x810] sm:$0xff]  }
  0x27   : > { %356 = vst [vmem:[%s3689_s15 + $0x100] sm:$0xff] %v355_v32   ;;  %v367_v35 = vld [vmem:[%s3684_s14 + $0x818] sm:$0xff]   ;;  %360 = vst [vmem:[%s3689_s15 + $0x108] sm:$0xff] %v359_v33   ;;  %v371_v36 = vld [vmem:[%s3684_s14 + $0x820] sm:$0xff]  }
  0x28   : > { %364 = vst [vmem:[%s3689_s15 + $0x110] sm:$0xff] %v363_v34   ;;  %368 = vst [vmem:[%s3689_s15 + $0x118] sm:$0xff] %v367_v35   ;;  %v375_v37 = vld [vmem:[%s3684_s14 + $0x828] sm:$0xff]   ;;  %v379_v38 = vld [vmem:[%s3684_s14 + $0x830] sm:$0xff]  }
  0x29   : > { %372 = vst [vmem:[%s3689_s15 + $0x120] sm:$0xff] %v371_v36   ;;  %376 = vst [vmem:[%s3689_s15 + $0x128] sm:$0xff] %v375_v37   ;;  %v383_v39 = vld [vmem:[%s3684_s14 + $0x838] sm:$0xff]   ;;  %v387_v40 = vld [vmem:[%s3684_s14 + $0xa00] sm:$0xff]  }
  0x2a   : > { %380 = vst [vmem:[%s3689_s15 + $0x130] sm:$0xff] %v379_v38   ;;  %v391_v41 = vld [vmem:[%s3684_s14 + $0xa08] sm:$0xff]   ;;  %384 = vst [vmem:[%s3689_s15 + $0x138] sm:$0xff] %v383_v39   ;;  %v395_v42 = vld [vmem:[%s3684_s14 + $0xa10] sm:$0xff]  }
  0x2b   : > { %388 = vst [vmem:[%s3689_s15 + $0x140] sm:$0xff] %v387_v40   ;;  %392 = vst [vmem:[%s3689_s15 + $0x148] sm:$0xff] %v391_v41   ;;  %v399_v43 = vld [vmem:[%s3684_s14 + $0xa18] sm:$0xff]   ;;  %v403_v44 = vld [vmem:[%s3684_s14 + $0xa20] sm:$0xff]  }
  0x2c   : > { %396 = vst [vmem:[%s3689_s15 + $0x150] sm:$0xff] %v395_v42   ;;  %400 = vst [vmem:[%s3689_s15 + $0x158] sm:$0xff] %v399_v43   ;;  %v407_v45 = vld [vmem:[%s3684_s14 + $0xa28] sm:$0xff]   ;;  %v411_v46 = vld [vmem:[%s3684_s14 + $0xa30] sm:$0xff]  }
  0x2d   : > { %404 = vst [vmem:[%s3689_s15 + $0x160] sm:$0xff] %v403_v44   ;;  %v415_v47 = vld [vmem:[%s3684_s14 + $0xa38] sm:$0xff]   ;;  %408 = vst [vmem:[%s3689_s15 + $0x168] sm:$0xff] %v407_v45   ;;  %v419_v48 = vld [vmem:[%s3684_s14 + $0xc00] sm:$0xff]  }
  0x2e   : > { %412 = vst [vmem:[%s3689_s15 + $0x170] sm:$0xff] %v411_v46   ;;  %416 = vst [vmem:[%s3689_s15 + $0x178] sm:$0xff] %v415_v47   ;;  %v423_v49 = vld [vmem:[%s3684_s14 + $0xc08] sm:$0xff]   ;;  %v427_v50 = vld [vmem:[%s3684_s14 + $0xc10] sm:$0xff]  }
  0x2f   : > { %420 = vst [vmem:[%s3689_s15 + $0x180] sm:$0xff] %v419_v48   ;;  %424 = vst [vmem:[%s3689_s15 + $0x188] sm:$0xff] %v423_v49   ;;  %v431_v51 = vld [vmem:[%s3684_s14 + $0xc18] sm:$0xff]   ;;  %v435_v52 = vld [vmem:[%s3684_s14 + $0xc20] sm:$0xff]  }
  0x30   : > { %428 = vst [vmem:[%s3689_s15 + $0x190] sm:$0xff] %v427_v50   ;;  %v439_v53 = vld [vmem:[%s3684_s14 + $0xc28] sm:$0xff]   ;;  %432 = vst [vmem:[%s3689_s15 + $0x198] sm:$0xff] %v431_v51   ;;  %v443_v54 = vld [vmem:[%s3684_s14 + $0xc30] sm:$0xff]  }
  0x31   : > { %436 = vst [vmem:[%s3689_s15 + $0x1a0] sm:$0xff] %v435_v52   ;;  %440 = vst [vmem:[%s3689_s15 + $0x1a8] sm:$0xff] %v439_v53   ;;  %v447_v55 = vld [vmem:[%s3684_s14 + $0xc38] sm:$0xff]   ;;  %v451_v56 = vld [vmem:[%s3684_s14 + $0xe00] sm:$0xff]  }
  0x32   : > { %444 = vst [vmem:[%s3689_s15 + $0x1b0] sm:$0xff] %v443_v54   ;;  %448 = vst [vmem:[%s3689_s15 + $0x1b8] sm:$0xff] %v447_v55   ;;  %v455_v57 = vld [vmem:[%s3684_s14 + $0xe08] sm:$0xff]   ;;  %v459_v58 = vld [vmem:[%s3684_s14 + $0xe10] sm:$0xff]  }
  0x33   : > { %452 = vst [vmem:[%s3689_s15 + $0x1c0] sm:$0xff] %v451_v56   ;;  %v463_v59 = vld [vmem:[%s3684_s14 + $0xe18] sm:$0xff]   ;;  %456 = vst [vmem:[%s3689_s15 + $0x1c8] sm:$0xff] %v455_v57   ;;  %v467_v60 = vld [vmem:[%s3684_s14 + $0xe20] sm:$0xff]  }
  0x34   : > { %460 = vst [vmem:[%s3689_s15 + $0x1d0] sm:$0xff] %v459_v58   ;;  %464 = vst [vmem:[%s3689_s15 + $0x1d8] sm:$0xff] %v463_v59   ;;  %v471_v61 = vld [vmem:[%s3684_s14 + $0xe28] sm:$0xff]   ;;  %v475_v62 = vld [vmem:[%s3684_s14 + $0xe30] sm:$0xff]  }
  0x35   : > { %468 = vst [vmem:[%s3689_s15 + $0x1e0] sm:$0xff] %v467_v60   ;;  %472 = vst [vmem:[%s3689_s15 + $0x1e8] sm:$0xff] %v471_v61   ;;  %v479_v63 = vld [vmem:[%s3684_s14 + $0xe38] sm:$0xff]  }
  0x36   : > { %476 = vst [vmem:[%s3689_s15 + $0x1f0] sm:$0xff] %v475_v62   ;;  %480 = vst [vmem:[%s3689_s15 + $0x1f8] sm:$0xff] %v479_v63  }
  0x37 PF: > { %p2921_p7 = scmp.ge.s32.totalorder %s3593_s24, 1  ;;  %p766_p8 = scmp.lt.s32.totalorder %s3593_s24, 9 }
  0x39   : > { %p767_p9 = pnand %p2921_p7, %p766_p8 }
  0x3a   : > { %v3821_v0 = vld [vmem:[%s4516_s1] sm:$0xff] (!%p767_p9)   ;;  %vm920_vm0 = vcmask (!%p767_p9), 1044480   ;;  %v3472_v1 = vld [vmem:[%s4516_s1 + $0x8] sm:$0x3f] (!%p767_p9)   ;;  %vm921_vm1 = vcmask (!%p767_p9), 1045504   ;;  %s773_s29 = sand.u32 (!%p767_p9), 1, %s3569_s18  }
  0x3b   : > { %770 = sbr.rel (%p767_p9) target bundleno = 422 (0x1a6), region = 77  ;;  %3254 = vmatprep.subr.bf16.mxu0 (!%p767_p9), %v3821_v0  ;;  %3274 = vmatprep.subr.bf16.mxu1 (!%p767_p9), %v3821_v0  ;;  %v3595_v2 = vmov (!%p767_p9), 65535   ;;  %s2922_s30 = sshll.u32 (!%p767_p9), %s773_s29, 9  ;;  %vm895_vm2 = vcmask (!%p767_p9), 220160   ;;  %vm2801_vm3 = vcmask (!%p767_p9), 31744  }
  0x3c   : > { %3255 = vmatpush3.bf16.msra.mxu0 (!%p767_p9), %v3821_v0  ;;  %3275 = vmatpush3.bf16.msra.mxu1 (!%p767_p9), %v3821_v0  ;;  %v922_v3 = vsel (!%p767_p9), %vm920_vm0, 4294967295, %v3595_v2  ;;  %s3833_s6 = scalar_lea.vmem (!%p767_p9), [#allocation2], %s2922_s30  ;;  %s2923_s11 = sshll.u32 (!%p767_p9), %s3581_s21, 2 }
  0x3d   : > { %v923_v4 = vsel (!%p767_p9), %vm921_vm1, %v922_v3, 0  ;;  %v3473_v6 = vld [vmem:[%s3833_s6] sm:$0xff] (!%p767_p9)   ;;  %v3475_v8 = vld [vmem:[%s3833_s6 + $0x8] sm:$0xff] (!%p767_p9)   ;;  %v3477_v10 = vld [vmem:[%s3833_s6 + $0x10] sm:$0xff] (!%p767_p9)   ;;  %s4286_s12 = sadd.s32 (!%p767_p9), %s3577_s20, %s2923_s11  ;;  %p808_p10 = scmp.lt.s32.totalorder (!%p767_p9), %s3581_s21, 1 }
  0x3e   : > { %v3831_v5 = vand.u32 (!%p767_p9), %v3472_v1, %v923_v4  ;;  %v3474_v7 = vld [vmem:[%s3833_s6 + $0x40] sm:$0xff] (!%p767_p9)   ;;  %v3476_v9 = vld [vmem:[%s3833_s6 + $0x48] sm:$0xff] (!%p767_p9)   ;;  %3258 = vmatprep.mubr.msk.bf16.mxu0 (!%p767_p9), %vm895_vm2, %v3473_v6  ;;  %v3478_v11 = vld [vmem:[%s3833_s6 + $0x50] sm:$0xff] (!%p767_p9)   ;;  %s2924_s20 = sshll.u32 (!%p767_p9), %s4286_s12, 4 }
  0x3f   : > { %3278 = vmatprep.mubr.msk.bf16.mxu1 (!%p767_p9), %vm895_vm2, %v3474_v7  ;;  %v3479_v12 = vld [vmem:[%s3833_s6 + $0x18] sm:$0xff] (!%p767_p9)   ;;  %v3481_v14 = vld [vmem:[%s3833_s6 + $0x20] sm:$0xff] (!%p767_p9)   ;;  %v3483_v16 = vld [vmem:[%s3833_s6 + $0x28] sm:$0xff] (!%p767_p9)   ;;  %p4313_p11 = scmp.lt.s32.totalorder (!%p767_p9), %s2924_s20, 127 }
  0x40   : > { %3256 = vmatprep.subr.bf16.mxu0 (!%p767_p9), %v3831_v5  ;;  %3276 = vmatprep.subr.bf16.mxu1 (!%p767_p9), %v3831_v5  ;;  %v3480_v13 = vld [vmem:[%s3833_s6 + $0x58] sm:$0xff] (!%p767_p9)   ;;  %v3482_v15 = vld [vmem:[%s3833_s6 + $0x60] sm:$0xff] (!%p767_p9)   ;;  %v3484_v17 = vld [vmem:[%s3833_s6 + $0x68] sm:$0xff] (!%p767_p9)  }
  0x41   : > { %3257 = vmatpush3.bf16.msra.mxu0 (!%p767_p9), %v3831_v5  ;;  %3277 = vmatpush3.bf16.msra.mxu1 (!%p767_p9), %v3831_v5  ;;  %v3485_v18 = vld [vmem:[%s3833_s6 + $0x30] sm:$0xff] (!%p767_p9)   ;;  %v3487_v20 = vld [vmem:[%s3833_s6 + $0x38] sm:$0xff] (!%p767_p9)   ;;  %v3489_v22 = vld [vmem:[%s3833_s6 + $0x80] sm:$0xff] (!%p767_p9)  }
  0x42   : > { %3294 = vmatprep.subr.bf16.mxu0 %v3821_v0  ;;  %3314 = vmatprep.subr.bf16.mxu1 %v3821_v0  ;;  %v3486_v19 = vld [vmem:[%s3833_s6 + $0x70] sm:$0xff]   ;;  %v3488_v21 = vld [vmem:[%s3833_s6 + $0x78] sm:$0xff]   ;;  %v3490_v23 = vld [vmem:[%s3833_s6 + $0xc0] sm:$0xff]   ;;  %s4535_s21 = smov (!%p808_p10, %s3581_s21), 1  ;;  %s4537_s20 = smov (!%p4313_p11, %s2924_s20), 127 }
  0x43   : > { %v3491_v24 = vld [vmem:[%s3833_s6 + $0x88] sm:$0xff]   ;;  %v3493_v26 = vld [vmem:[%s3833_s6 + $0x90] sm:$0xff]   ;;  %v3495_v28 = vld [vmem:[%s3833_s6 + $0x98] sm:$0xff]   ;;  %s810_s16 = scalar_lea.vmem %s4519_s4, %s4535_s21  ;;  %s2925_s17 = sshll.u32 %s4537_s20, 3 }
  0x44   : > { %3259 = vmatmul.mubr.msk.bf16.vlgmr.msra.gmra.mrb[0].mxu0 %vm895_vm2, %v3475_v8  ;;  %3279 = vmatmul.mubr.msk.bf16.vlgmr.msra.gmra.mrb[0].mxu1 %vm895_vm2, %v3476_v9  ;;  %v3492_v25 = vld [vmem:[%s3833_s6 + $0xc8] sm:$0xff]   ;;  %v3494_v27 = vld [vmem:[%s3833_s6 + $0xd0] sm:$0xff]   ;;  %v3496_v29 = vld [vmem:[%s3833_s6 + $0xd8] sm:$0xff]   ;;  %s4371_s28 = scalar_lea.vmem %s4520_s5, %s2925_s17 }
  0x45   : > { %3295 = vmatpush3.bf16.msra.mxu0 %v3821_v0  ;;  %3315 = vmatpush3.bf16.msra.mxu1 %v3821_v0  ;;  %v3497_v30 = vld [vmem:[%s3833_s6 + $0xa0] sm:$0xff]   ;;  %v3499_v32 = vld [vmem:[%s3833_s6 + $0xa8] sm:$0xff]   ;;  %v3501_v34 = vld [vmem:[%s3833_s6 + $0xb0] sm:$0xff]  }
  0x46   : > { %3262 = vmatprep.mubr.msk.bf16.mxu0 %vm895_vm2, %v3477_v10  ;;  %3282 = vmatprep.mubr.msk.bf16.mxu1 %vm895_vm2, %v3478_v11  ;;  %v3498_v31 = vld [vmem:[%s3833_s6 + $0xe0] sm:$0xff]   ;;  %v3500_v33 = vld [vmem:[%s3833_s6 + $0xe8] sm:$0xff]   ;;  %v3502_v35 = vld [vmem:[%s3833_s6 + $0xf0] sm:$0xff]  }
  0x47   : > { %3296 = vmatprep.subr.bf16.mxu0 %v3831_v5  ;;  %3316 = vmatprep.subr.bf16.mxu1 %v3831_v5  ;;  %v3503_v36 = vld [vmem:[%s3833_s6 + $0xb8] sm:$0xff]   ;;  %v3505_v38 = vld [vmem:[%s3833_s6 + $0x100] sm:$0xff]   ;;  %v3507_v40 = vld [vmem:[%s3833_s6 + $0x108] sm:$0xff]  }
  0x48   : > { %v3504_v37 = vld [vmem:[%s3833_s6 + $0xf8] sm:$0xff]   ;;  %v3506_v39 = vld [vmem:[%s3833_s6 + $0x140] sm:$0xff]   ;;  %v3508_v41 = vld [vmem:[%s3833_s6 + $0x148] sm:$0xff]  }
  0x49   : > { %3297 = vmatpush3.bf16.msra.mxu0 %v3831_v5  ;;  %3317 = vmatpush3.bf16.msra.mxu1 %v3831_v5  ;;  %v3509_v42 = vld [vmem:[%s3833_s6 + $0x110] sm:$0xff]   ;;  %v3511_v44 = vld [vmem:[%s3833_s6 + $0x118] sm:$0xff]   ;;  %v3513_v46 = vld [vmem:[%s3833_s6 + $0x120] sm:$0xff]  }
  0x4a   : > { %3334 = vmatprep.subr.bf16.mxu0 %v3821_v0  ;;  %3354 = vmatprep.subr.bf16.mxu1 %v3821_v0  ;;  %v3510_v43 = vld [vmem:[%s3833_s6 + $0x150] sm:$0xff]   ;;  %v3512_v45 = vld [vmem:[%s3833_s6 + $0x158] sm:$0xff]   ;;  %v3514_v47 = vld [vmem:[%s3833_s6 + $0x160] sm:$0xff]  }
  0x4b   : > { %v3515_v48 = vld [vmem:[%s3833_s6 + $0x128] sm:$0xff]   ;;  %v3517_v50 = vld [vmem:[%s3833_s6 + $0x130] sm:$0xff]   ;;  %v3519_v52 = vld [vmem:[%s3833_s6 + $0x138] sm:$0xff]  }
  0x4c   : > { %3263 = vmatmul.mubr.msk.bf16.gmra.mrb[4].mxu0 %vm895_vm2, %v3479_v12  ;;  %3283 = vmatmul.mubr.msk.bf16.gmra.mrb[4].mxu1 %vm895_vm2, %v3480_v13  ;;  %v3516_v49 = vld [vmem:[%s3833_s6 + $0x168] sm:$0xff]   ;;  %v3518_v51 = vld [vmem:[%s3833_s6 + $0x170] sm:$0xff]   ;;  %v3520_v53 = vld [vmem:[%s3833_s6 + $0x178] sm:$0xff]  }
  0x4d   : > { %3266 = vmatprep.mubr.msk.bf16.mxu0 %vm895_vm2, %v3481_v14  ;;  %3286 = vmatprep.mubr.msk.bf16.mxu1 %vm895_vm2, %v3482_v15  ;;  %v3521_v54 = vld [vmem:[%s3833_s6 + $0x180] sm:$0xff]   ;;  %v3523_v56 = vld [vmem:[%s3833_s6 + $0x188] sm:$0xff]   ;;  %v3525_v58 = vld [vmem:[%s3833_s6 + $0x190] sm:$0xff]  }
  0x4e   : > { %v3522_v55 = vld [vmem:[%s3833_s6 + $0x1c0] sm:$0xff]   ;;  %v3524_v57 = vld [vmem:[%s3833_s6 + $0x1c8] sm:$0xff]   ;;  %v3526_v59 = vld [vmem:[%s3833_s6 + $0x1d0] sm:$0xff]  }
  0x4f   : > { %v3527_v60 = vld [vmem:[%s3833_s6 + $0x198] sm:$0xff]   ;;  %v3529_v62 = vld [vmem:[%s3833_s6 + $0x1a0] sm:$0xff]   ;;  %v3532_v1 = vld [vmem:[%s3833_s6 + $0x1e8] sm:$0xff]  }
  0x50   : > { %v3528_v61 = vld [vmem:[%s3833_s6 + $0x1d8] sm:$0xff]   ;;  %v3530_v63 = vld [vmem:[%s3833_s6 + $0x1e0] sm:$0xff]   ;;  %v3533_v2 = vld [vmem:[%s3833_s6 + $0x1b0] sm:$0xff]  }
  0x51   : > { %v3534_v3 = vld [vmem:[%s3833_s6 + $0x1f0] sm:$0xff]   ;;  %v3535_v4 = vld [vmem:[%s3833_s6 + $0x1b8] sm:$0xff]  }
  0x52   : > { %v3994_v6 = vld [vmem:[%s4517_s2] ss:$0 sm:$0xff] }
  0x53   : > { %v3999_v7 = vld [vmem:[%s4518_s3] ss:$0 sm:$0xff] }
  0x54   : > { %3267 = vmatmul.mubr.msk.bf16.gmra.mrb[8].mxu0 %vm895_vm2, %v3483_v16  ;;  %3287 = vmatmul.mubr.msk.bf16.gmra.mrb[8].mxu1 %vm895_vm2, %v3484_v17 }
  0x55   : > { %3270 = vmatprep.mubr.msk.bf16.mxu0 %vm895_vm2, %v3485_v18  ;;  %3290 = vmatprep.mubr.msk.bf16.mxu1 %vm895_vm2, %v3486_v19 }
  0x5c   : > { %3271 = vmatmul.mubr.msk.bf16.gmra.mrb[12].mxu0 %vm895_vm2, %v3487_v20  ;;  %3291 = vmatmul.mubr.msk.bf16.gmra.mrb[12].mxu1 %vm895_vm2, %v3488_v21 }
  0x5d   : > { %3298 = vmatprep.mubr.msk.bf16.mxu0 %vm895_vm2, %v3489_v22  ;;  %3318 = vmatprep.mubr.msk.bf16.mxu1 %vm895_vm2, %v3490_v23 }
  0x64   : > { %3299 = vmatmul.mubr.msk.bf16.vlgmr.msra.gmra.mrb[16].mxu0 %vm895_vm2, %v3491_v24  ;;  %3319 = vmatmul.mubr.msk.bf16.vlgmr.msra.gmra.mrb[16].mxu1 %vm895_vm2, %v3492_v25 }
  0x65   : > { %3335 = vmatpush3.bf16.msra.mxu0 %v3821_v0  ;;  %3355 = vmatpush3.bf16.msra.mxu1 %v3821_v0 }
  0x66   : > { %3302 = vmatprep.mubr.msk.bf16.mxu0 %vm895_vm2, %v3493_v26  ;;  %3322 = vmatprep.mubr.msk.bf16.mxu1 %vm895_vm2, %v3494_v27 }
  0x67   : > { %3336 = vmatprep.subr.bf16.mxu0 %v3831_v5  ;;  %3356 = vmatprep.subr.bf16.mxu1 %v3831_v5 }
  0x69   : > { %3337 = vmatpush3.bf16.msra.mxu0 %v3831_v5  ;;  %3357 = vmatpush3.bf16.msra.mxu1 %v3831_v5 }
  0x6a   : > { %3374 = vmatprep.subr.bf16.mxu0 %v3821_v0  ;;  %3394 = vmatprep.subr.bf16.mxu1 %v3821_v0 }
  0x6c   : > { %3303 = vmatmul.mubr.msk.bf16.gmra.mrb[20].mxu0 %vm895_vm2, %v3495_v28  ;;  %3323 = vmatmul.mubr.msk.bf16.gmra.mrb[20].mxu1 %vm895_vm2, %v3496_v29 }
  0x6d   : > { %3306 = vmatprep.mubr.msk.bf16.mxu0 %vm895_vm2, %v3497_v30  ;;  %3326 = vmatprep.mubr.msk.bf16.mxu1 %vm895_vm2, %v3498_v31 }
  0x74   : > { %3307 = vmatmul.mubr.msk.bf16.gmra.mrb[24].mxu0 %vm895_vm2, %v3499_v32  ;;  %3327 = vmatmul.mubr.msk.bf16.gmra.mrb[24].mxu1 %vm895_vm2, %v3500_v33 }
  0x75   : > { %3310 = vmatprep.mubr.msk.bf16.mxu0 %vm895_vm2, %v3501_v34  ;;  %3330 = vmatprep.mubr.msk.bf16.mxu1 %vm895_vm2, %v3502_v35 }
  0x7c   : > { %3311 = vmatmul.mubr.msk.bf16.gmra.mrb[28].mxu0 %vm895_vm2, %v3503_v36  ;;  %3331 = vmatmul.mubr.msk.bf16.gmra.mrb[28].mxu1 %vm895_vm2, %v3504_v37 }
  0x7d   : > { %3338 = vmatprep.mubr.msk.bf16.mxu0 %vm895_vm2, %v3505_v38  ;;  %3358 = vmatprep.mubr.msk.bf16.mxu1 %vm895_vm2, %v3506_v39 }
  0x84   : > { %3339 = vmatmul.mubr.msk.bf16.vlgmr.msra.gmra.mrb[32].mxu0 %vm895_vm2, %v3507_v40  ;;  %3359 = vmatmul.mubr.msk.bf16.vlgmr.msra.gmra.mrb[32].mxu1 %vm895_vm2, %v3508_v41 }
  0x85   : > { %3375 = vmatpush3.bf16.msra.mxu0 %v3821_v0  ;;  %3395 = vmatpush3.bf16.msra.mxu1 %v3821_v0  ;;  %v3531_v0 = vld [vmem:[%s3833_s6 + $0x1a8] sm:$0xff]  }
  0x86   : > { %3342 = vmatprep.mubr.msk.bf16.mxu0 %vm895_vm2, %v3509_v42  ;;  %3362 = vmatprep.mubr.msk.bf16.mxu1 %vm895_vm2, %v3510_v43 }
  0x87   : > { %3376 = vmatprep.subr.bf16.mxu0 %v3831_v5  ;;  %3396 = vmatprep.subr.bf16.mxu1 %v3831_v5 }
  0x89   : > { %3377 = vmatpush3.bf16.msra.mxu0 %v3831_v5  ;;  %3397 = vmatpush3.bf16.msra.mxu1 %v3831_v5  ;;  %v3536_v5 = vld [vmem:[%s3833_s6 + $0x1f8] sm:$0xff]  }
  0x8c   : > { %3343 = vmatmul.mubr.msk.bf16.gmra.mrb[36].mxu0 %vm895_vm2, %v3511_v44  ;;  %3363 = vmatmul.mubr.msk.bf16.gmra.mrb[36].mxu1 %vm895_vm2, %v3512_v45 }
  0x8d   : > { %3346 = vmatprep.mubr.msk.bf16.mxu0 %vm895_vm2, %v3513_v46  ;;  %3366 = vmatprep.mubr.msk.bf16.mxu1 %vm895_vm2, %v3514_v47 }
  0x94   : > { %3347 = vmatmul.mubr.msk.bf16.gmra.mrb[40].mxu0 %vm895_vm2, %v3515_v48  ;;  %3367 = vmatmul.mubr.msk.bf16.gmra.mrb[40].mxu1 %vm895_vm2, %v3516_v49 }
  0x95   : > { %3350 = vmatprep.mubr.msk.bf16.mxu0 %vm895_vm2, %v3517_v50  ;;  %3370 = vmatprep.mubr.msk.bf16.mxu1 %vm895_vm2, %v3518_v51 }
  0x9c   : > { %3351 = vmatmul.mubr.msk.bf16.gmra.mrb[44].mxu0 %vm895_vm2, %v3519_v52  ;;  %3371 = vmatmul.mubr.msk.bf16.gmra.mrb[44].mxu1 %vm895_vm2, %v3520_v53 }
  0x9d   : > { %3378 = vmatprep.mubr.msk.bf16.mxu0 %vm895_vm2, %v3521_v54  ;;  %3398 = vmatprep.mubr.msk.bf16.mxu1 %vm895_vm2, %v3522_v55 }
  0xa4   : > { %3379 = vmatmul.mubr.msk.bf16.vlgmr.msra.gmra.mrb[48].mxu0 %vm895_vm2, %v3523_v56  ;;  %3399 = vmatmul.mubr.msk.bf16.vlgmr.msra.gmra.mrb[48].mxu1 %vm895_vm2, %v3524_v57 }
  0xa5   : > { %3382 = vmatprep.mubr.msk.bf16.mxu0 %vm895_vm2, %v3525_v58  ;;  %3402 = vmatprep.mubr.msk.bf16.mxu1 %vm895_vm2, %v3526_v59 }
  0xac   : > { %3383 = vmatmul.mubr.msk.bf16.gmra.mrb[52].mxu0 %vm895_vm2, %v3527_v60  ;;  %3403 = vmatmul.mubr.msk.bf16.gmra.mrb[52].mxu1 %vm895_vm2, %v3528_v61 }
  0xad   : > { %3386 = vmatprep.mubr.msk.bf16.mxu0 %vm895_vm2, %v3529_v62  ;;  %3406 = vmatprep.mubr.msk.bf16.mxu1 %vm895_vm2, %v3530_v63 }
  0xb4   : > { %3387 = vmatmul.mubr.msk.bf16.gmra.mrb[56].mxu0 %vm895_vm2, %v3531_v0  ;;  %3407 = vmatmul.mubr.msk.bf16.gmra.mrb[56].mxu1 %vm895_vm2, %v3532_v1 }
  0xb5   : > { %3390 = vmatprep.mubr.msk.bf16.mxu0 %vm895_vm2, %v3533_v2  ;;  %3410 = vmatprep.mubr.msk.bf16.mxu1 %vm895_vm2, %v3534_v3 }
  0xbc   : > { %3391 = vmatmul.mubr.msk.bf16.gmra.mrb[60].mxu0 %vm895_vm2, %v3535_v4  ;;  %3411 = vmatmul.mubr.msk.bf16.gmra.mrb[60].mxu1 %vm895_vm2, %v3536_v5 }
 0x117   : > { %v3260_v8 = vpop.f32.mrb[0].mxu0  ;;  %v3280_v9 = vpop.f32.mrb[0].mxu1 }
 0x118   : > { %v1032_v10 = vmul.f32 %v3260_v8, %v3994_v6  ;;  %v1264_v11 = vmul.f32 %v3280_v9, %v3994_v6  ;;  %v961_v12 = vpop.f32.mrb[1].mxu0  ;;  %v1199_v13 = vpop.f32.mrb[1].mxu1 }
 0x119   : > { %v1030_v14 = vmul.f32 %v3994_v6, %v961_v12  ;;  %v1262_v15 = vmul.f32 %v3994_v6, %v1199_v13  ;;  %v3261_v16 = vpop.f32.mrb[2].mxu0  ;;  %v3281_v17 = vpop.f32.mrb[2].mxu1 }
 0x11a   : > { %v1054_v18 = vadd.f32 %v3999_v7, %v1032_v10  ;;  %v1280_v19 = vadd.f32 %v3999_v7, %v1264_v11  ;;  %v1033_v20 = vmul.f32 %v3261_v16, %v3994_v6  ;;  %v1265_v21 = vmul.f32 %v3281_v17, %v3994_v6  ;;  %v964_v22 = vpop.f32.mrb[3].mxu0  ;;  %v1202_v23 = vpop.f32.mrb[3].mxu1 }
 0x11b   : > { %v1052_v24 = vadd.f32 %v3999_v7, %v1030_v14  ;;  %v1278_v25 = vadd.f32 %v3999_v7, %v1262_v15  ;;  %v1031_v26 = vmul.f32 %v3994_v6, %v964_v22  ;;  %v1263_v27 = vmul.f32 %v3994_v6, %v1202_v23 }
 0x11c   : > { %v1070_v28 = vmax.f32 %v1054_v18, 0.0  ;;  %v1296_v29 = vmax.f32 %v1280_v19, 0.0  ;;  %v1055_v30 = vadd.f32 %v3999_v7, %v1033_v20  ;;  %v1281_v31 = vadd.f32 %v3999_v7, %v1265_v21 }
 0x11d   : > { %v1068_v32 = vmax.f32 %v1052_v24, 0.0  ;;  %v1294_v33 = vmax.f32 %v1278_v25, 0.0  ;;  %v1053_v34 = vadd.f32 %v3999_v7, %v1031_v26  ;;  %v1279_v35 = vadd.f32 %v3999_v7, %v1263_v27 }
 0x11e   : > { %v4017_v36 = vmax.f32 %v1070_v28, %v1296_v29  ;;  %v1071_v37 = vmax.f32 %v1055_v30, 0.0  ;;  %v1297_v38 = vmax.f32 %v1281_v31, 0.0 }
 0x11f   : > { %v4019_v39 = vmax.f32 %v1068_v32, %v1294_v33  ;;  %v1069_v40 = vmax.f32 %v1053_v34, 0.0  ;;  %v1295_v41 = vmax.f32 %v1279_v35, 0.0  ;;  %v3264_v42 = vpop.f32.mrb[4].mxu0  ;;  %v3284_v43 = vpop.f32.mrb[4].mxu1 }
 0x120   : > { %v4021_v44 = vmax.f32 %v1071_v37, %v1297_v38  ;;  %v1036_v45 = vmul.f32 %v3264_v42, %v3994_v6  ;;  %v1268_v46 = vmul.f32 %v3284_v43, %v3994_v6  ;;  %v977_v47 = vpop.f32.mrb[5].mxu0  ;;  %v1215_v48 = vpop.f32.mrb[5].mxu1 }
 0x121   : > { %v4025_v49 = vmax.f32 %v1069_v40, %v1295_v41  ;;  %v1034_v50 = vmul.f32 %v3994_v6, %v977_v47  ;;  %v1266_v51 = vmul.f32 %v3994_v6, %v1215_v48  ;;  %v3265_v52 = vpop.f32.mrb[6].mxu0  ;;  %v3285_v53 = vpop.f32.mrb[6].mxu1 }
 0x122   : > { %v1058_v54 = vadd.f32 %v3999_v7, %v1036_v45  ;;  %v1284_v55 = vadd.f32 %v3999_v7, %v1268_v46  ;;  %v1037_v56 = vmul.f32 %v3265_v52, %v3994_v6  ;;  %v1269_v57 = vmul.f32 %v3285_v53, %v3994_v6  ;;  %v980_v58 = vpop.f32.mrb[7].mxu0  ;;  %v1218_v59 = vpop.f32.mrb[7].mxu1 }
 0x123   : > { %v1056_v60 = vadd.f32 %v3999_v7, %v1034_v50  ;;  %v1282_v61 = vadd.f32 %v3999_v7, %v1266_v51  ;;  %v1035_v62 = vmul.f32 %v3994_v6, %v980_v58  ;;  %v1267_v63 = vmul.f32 %v3994_v6, %v1218_v59 }
 0x124   : > { %v1074_v0 = vmax.f32 %v1058_v54, 0.0  ;;  %v1300_v1 = vmax.f32 %v1284_v55, 0.0  ;;  %v1059_v2 = vadd.f32 %v3999_v7, %v1037_v56  ;;  %v1285_v3 = vadd.f32 %v3999_v7, %v1269_v57 }
 0x125   : > { %v1072_v4 = vmax.f32 %v1056_v60, 0.0  ;;  %v1298_v5 = vmax.f32 %v1282_v61, 0.0  ;;  %v1057_v8 = vadd.f32 %v3999_v7, %v1035_v62  ;;  %v1283_v9 = vadd.f32 %v3999_v7, %v1267_v63 }
 0x126   : > { %v4041_v10 = vmax.f32 %v1074_v0, %v1300_v1  ;;  %v1075_v11 = vmax.f32 %v1059_v2, 0.0  ;;  %v1301_v12 = vmax.f32 %v1285_v3, 0.0 }
 0x127   : > { %v4043_v13 = vmax.f32 %v1072_v4, %v1298_v5  ;;  %v1073_v14 = vmax.f32 %v1057_v8, 0.0  ;;  %v1299_v15 = vmax.f32 %v1283_v9, 0.0  ;;  %v3268_v16 = vpop.f32.mrb[8].mxu0  ;;  %v3288_v17 = vpop.f32.mrb[8].mxu1 }
 0x128   : > { %v4045_v18 = vmax.f32 %v1075_v11, %v1301_v12  ;;  %v1040_v19 = vmul.f32 %v3268_v16, %v3994_v6  ;;  %v1272_v20 = vmul.f32 %v3288_v17, %v3994_v6  ;;  %v993_v21 = vpop.f32.mrb[9].mxu0  ;;  %v1231_v22 = vpop.f32.mrb[9].mxu1 }
 0x129   : > { %v4049_v23 = vmax.f32 %v1073_v14, %v1299_v15  ;;  %v1038_v24 = vmul.f32 %v3994_v6, %v993_v21  ;;  %v1270_v25 = vmul.f32 %v3994_v6, %v1231_v22  ;;  %v3269_v26 = vpop.f32.mrb[10].mxu0  ;;  %v3289_v27 = vpop.f32.mrb[10].mxu1 }
 0x12a   : > { %v1062_v28 = vadd.f32 %v3999_v7, %v1040_v19  ;;  %v1288_v29 = vadd.f32 %v3999_v7, %v1272_v20  ;;  %v1041_v30 = vmul.f32 %v3269_v26, %v3994_v6  ;;  %v1273_v31 = vmul.f32 %v3289_v27, %v3994_v6  ;;  %v996_v32 = vpop.f32.mrb[11].mxu0  ;;  %v1234_v33 = vpop.f32.mrb[11].mxu1 }
 0x12b   : > { %v1060_v34 = vadd.f32 %v3999_v7, %v1038_v24  ;;  %v1286_v35 = vadd.f32 %v3999_v7, %v1270_v25  ;;  %v1039_v37 = vmul.f32 %v3994_v6, %v996_v32  ;;  %v1271_v38 = vmul.f32 %v3994_v6, %v1234_v33 }
 0x12c   : > { %v1078_v40 = vmax.f32 %v1062_v28, 0.0  ;;  %v1304_v41 = vmax.f32 %v1288_v29, 0.0  ;;  %v1063_v42 = vadd.f32 %v3999_v7, %v1041_v30  ;;  %v1289_v43 = vadd.f32 %v3999_v7, %v1273_v31 }
 0x12d   : > { %v1076_v45 = vmax.f32 %v1060_v34, 0.0  ;;  %v1302_v46 = vmax.f32 %v1286_v35, 0.0  ;;  %v1061_v47 = vadd.f32 %v3999_v7, %v1039_v37  ;;  %v1287_v48 = vadd.f32 %v3999_v7, %v1271_v38 }
 0x12e   : > { %v4065_v50 = vmax.f32 %v1078_v40, %v1304_v41  ;;  %v1079_v51 = vmax.f32 %v1063_v42, 0.0  ;;  %v1305_v52 = vmax.f32 %v1289_v43, 0.0 }
 0x12f   : > { %v4067_v53 = vmax.f32 %v1076_v45, %v1302_v46  ;;  %v1077_v54 = vmax.f32 %v1061_v47, 0.0  ;;  %v1303_v55 = vmax.f32 %v1287_v48, 0.0  ;;  %v3272_v56 = vpop.f32.mrb[12].mxu0  ;;  %v3292_v57 = vpop.f32.mrb[12].mxu1 }
 0x130   : > { %v4069_v58 = vmax.f32 %v1079_v51, %v1305_v52  ;;  %v1044_v59 = vmul.f32 %v3272_v56, %v3994_v6  ;;  %v1276_v60 = vmul.f32 %v3292_v57, %v3994_v6  ;;  %v1009_v61 = vpop.f32.mrb[13].mxu0  ;;  %v1247_v62 = vpop.f32.mrb[13].mxu1 }
 0x131   : > { %v4073_v63 = vmax.f32 %v1077_v54, %v1303_v55  ;;  %v1042_v0 = vmul.f32 %v3994_v6, %v1009_v61  ;;  %v1274_v1 = vmul.f32 %v3994_v6, %v1247_v62  ;;  %v3273_v2 = vpop.f32.mrb[14].mxu0  ;;  %v3293_v3 = vpop.f32.mrb[14].mxu1 }
 0x132   : > { %v1066_v4 = vadd.f32 %v3999_v7, %v1044_v59  ;;  %v1292_v5 = vadd.f32 %v3999_v7, %v1276_v60  ;;  %v1045_v8 = vmul.f32 %v3273_v2, %v3994_v6  ;;  %v1277_v9 = vmul.f32 %v3293_v3, %v3994_v6  ;;  %v1012_v11 = vpop.f32.mrb[15].mxu0  ;;  %v1250_v12 = vpop.f32.mrb[15].mxu1 }
 0x133   : > { %v1064_v14 = vadd.f32 %v3999_v7, %v1042_v0  ;;  %v1290_v15 = vadd.f32 %v3999_v7, %v1274_v1  ;;  %v1043_v16 = vmul.f32 %v3994_v6, %v1012_v11  ;;  %v1275_v17 = vmul.f32 %v3994_v6, %v1250_v12 }
 0x134   : > { %v1082_v19 = vmax.f32 %v1066_v4, 0.0  ;;  %v1308_v20 = vmax.f32 %v1292_v5, 0.0  ;;  %v1067_v21 = vadd.f32 %v3999_v7, %v1045_v8  ;;  %v1293_v22 = vadd.f32 %v3999_v7, %v1277_v9 }
 0x135   : > { %v1080_v24 = vmax.f32 %v1064_v14, 0.0  ;;  %v1306_v25 = vmax.f32 %v1290_v15, 0.0  ;;  %v1065_v26 = vadd.f32 %v3999_v7, %v1043_v16  ;;  %v1291_v27 = vadd.f32 %v3999_v7, %v1275_v17 }
 0x136   : > { %v4089_v28 = vmax.f32 %v1082_v19, %v1308_v20  ;;  %v1083_v29 = vmax.f32 %v1067_v21, 0.0  ;;  %v1309_v30 = vmax.f32 %v1293_v22, 0.0 }
 0x137   : > { %v4091_v31 = vmax.f32 %v1080_v24, %v1306_v25  ;;  %v1081_v32 = vmax.f32 %v1065_v26, 0.0  ;;  %v1307_v33 = vmax.f32 %v1291_v27, 0.0  ;;  %v3300_v34 = vpop.f32.mrb[16].mxu0  ;;  %v3320_v35 = vpop.f32.mrb[16].mxu1 }
 0x138   : > { %v4093_v37 = vmax.f32 %v1083_v29, %v1309_v30  ;;  %v1506_v38 = vmul.f32 %v3300_v34, %v3994_v6  ;;  %v1748_v40 = vmul.f32 %v3320_v35, %v3994_v6  ;;  %v1441_v41 = vpop.f32.mrb[17].mxu0  ;;  %v1683_v42 = vpop.f32.mrb[17].mxu1 }
 0x139   : > { %v4097_v43 = vmax.f32 %v1081_v32, %v1307_v33  ;;  %v1504_v45 = vmul.f32 %v3994_v6, %v1441_v41  ;;  %v1746_v46 = vmul.f32 %v3994_v6, %v1683_v42  ;;  %v3301_v47 = vpop.f32.mrb[18].mxu0  ;;  %v3321_v48 = vpop.f32.mrb[18].mxu1 }
 0x13a   : > { %v1522_v51 = vadd.f32 %v3999_v7, %v1506_v38  ;;  %v1764_v52 = vadd.f32 %v3999_v7, %v1748_v40  ;;  %v1507_v54 = vmul.f32 %v3301_v47, %v3994_v6  ;;  %v1749_v55 = vmul.f32 %v3321_v48, %v3994_v6  ;;  %v1444_v56 = vpop.f32.mrb[19].mxu0  ;;  %v1686_v57 = vpop.f32.mrb[19].mxu1 }
 0x13b   : > { %v1520_v59 = vadd.f32 %v3999_v7, %v1504_v45  ;;  %v1762_v60 = vadd.f32 %v3999_v7, %v1746_v46  ;;  %v1505_v61 = vmul.f32 %v3994_v6, %v1444_v56  ;;  %v1747_v62 = vmul.f32 %v3994_v6, %v1686_v57 }
 0x13c   : > { %v1538_v0 = vmax.f32 %v1522_v51, 0.0  ;;  %v1780_v1 = vmax.f32 %v1764_v52, 0.0  ;;  %v1523_v2 = vadd.f32 %v3999_v7, %v1507_v54  ;;  %v1765_v3 = vadd.f32 %v3999_v7, %v1749_v55 }
 0x13d   : > { %v1536_v4 = vmax.f32 %v1520_v59, 0.0  ;;  %v1778_v5 = vmax.f32 %v1762_v60, 0.0  ;;  %v1521_v8 = vadd.f32 %v3999_v7, %v1505_v61  ;;  %v1763_v9 = vadd.f32 %v3999_v7, %v1747_v62 }
 0x13e   : > { %v1554_v11 = vmax.f32 %v4017_v36, %v1538_v0  ;;  %v1539_v12 = vmax.f32 %v1523_v2, 0.0  ;;  %v1781_v15 = vmax.f32 %v1765_v3, 0.0 }
 0x13f   : > { %v1552_v14 = vmax.f32 %v4019_v39, %v1536_v4  ;;  %v1537_v16 = vmax.f32 %v1521_v8, 0.0  ;;  %v1779_v17 = vmax.f32 %v1763_v9, 0.0  ;;  %v3304_v19 = vpop.f32.mrb[20].mxu0  ;;  %v3324_v20 = vpop.f32.mrb[20].mxu1 }
 0x140   : > { %v4115_v21 = vmax.f32 %v1554_v11, %v1780_v1  ;;  %v1555_v22 = vmax.f32 %v4021_v44, %v1539_v12  ;;  %v1510_v24 = vmul.f32 %v3304_v19, %v3994_v6  ;;  %v1752_v25 = vmul.f32 %v3324_v20, %v3994_v6  ;;  %v1457_v26 = vpop.f32.mrb[21].mxu0  ;;  %v1699_v27 = vpop.f32.mrb[21].mxu1 }
 0x141   : > { %v4120_v29 = vmax.f32 %v1552_v14, %v1778_v5  ;;  %v1553_v36 = vmax.f32 %v4025_v49, %v1537_v16  ;;  %v1508_v39 = vmul.f32 %v3994_v6, %v1457_v26  ;;  %v1750_v30 = vmul.f32 %v3994_v6, %v1699_v27  ;;  %v3305_v32 = vpop.f32.mrb[22].mxu0  ;;  %v3325_v33 = vpop.f32.mrb[22].mxu1 }
 0x142   : > { %v4125_v34 = vmax.f32 %v1555_v22, %v1781_v15  ;;  %v1526_v44 = vadd.f32 %v3999_v7, %v1510_v24  ;;  %v1768_v35 = vadd.f32 %v3999_v7, %v1752_v25  ;;  %v1511_v38 = vmul.f32 %v3305_v32, %v3994_v6  ;;  %v1460_v40 = vpop.f32.mrb[23].mxu0  ;;  %v1702_v41 = vpop.f32.mrb[23].mxu1 }
 0x143   : > { %v4130_v42 = vmax.f32 %v1553_v36, %v1779_v17  ;;  %v1524_v49 = vadd.f32 %v3999_v7, %v1508_v39  ;;  %v1766_v45 = vadd.f32 %v3999_v7, %v1750_v30  ;;  %v1753_v46 = vmul.f32 %v3325_v33, %v3994_v6 }
 0x144   : > { %v1542_v47 = vmax.f32 %v1526_v44, 0.0  ;;  %v1784_v48 = vmax.f32 %v1768_v35, 0.0  ;;  %v1527_v51 = vadd.f32 %v3999_v7, %v1511_v38  ;;  %v1509_v52 = vmul.f32 %v3994_v6, %v1460_v40 }
 0x145   : > { %v1540_v54 = vmax.f32 %v1524_v49, 0.0  ;;  %v1782_v55 = vmax.f32 %v1766_v45, 0.0  ;;  %v1769_v56 = vadd.f32 %v3999_v7, %v1753_v46  ;;  %v1751_v57 = vmul.f32 %v3994_v6, %v1702_v41 }
 0x146   : > { %v1558_v59 = vmax.f32 %v4041_v10, %v1542_v47  ;;  %v1543_v60 = vmax.f32 %v1527_v51, 0.0  ;;  %v1525_v61 = vadd.f32 %v3999_v7, %v1509_v52 }
 0x147   : > { %v1556_v62 = vmax.f32 %v4043_v13, %v1540_v54  ;;  %v1785_v0 = vmax.f32 %v1769_v56, 0.0  ;;  %v1767_v1 = vadd.f32 %v3999_v7, %v1751_v57  ;;  %v3308_v2 = vpop.f32.mrb[24].mxu0  ;;  %v3328_v3 = vpop.f32.mrb[24].mxu1 }
 0x148   : > { %v4143_v4 = vmax.f32 %v1558_v59, %v1784_v48  ;;  %v1559_v5 = vmax.f32 %v4045_v18, %v1543_v60  ;;  %v1541_v8 = vmax.f32 %v1525_v61, 0.0  ;;  %v1514_v9 = vmul.f32 %v3308_v2, %v3994_v6  ;;  %v1473_v11 = vpop.f32.mrb[25].mxu0  ;;  %v1715_v12 = vpop.f32.mrb[25].mxu1 }
 0x149   : > { %v4147_v10 = vmax.f32 %v1556_v62, %v1782_v55  ;;  %v1783_v14 = vmax.f32 %v1767_v1, 0.0  ;;  %v1756_v15 = vmul.f32 %v3328_v3, %v3994_v6  ;;  %v1512_v13 = vmul.f32 %v3994_v6, %v1473_v11  ;;  %v3309_v16 = vpop.f32.mrb[26].mxu0  ;;  %v3329_v17 = vpop.f32.mrb[26].mxu1 }
 0x14a   : > { %v4151_v19 = vmax.f32 %v1559_v5, %v1785_v0  ;;  %v1557_v20 = vmax.f32 %v4049_v23, %v1541_v8  ;;  %v1530_v18 = vadd.f32 %v3999_v7, %v1514_v9  ;;  %v1754_v22 = vmul.f32 %v3994_v6, %v1715_v12  ;;  %v1476_v24 = vpop.f32.mrb[27].mxu0  ;;  %v1718_v25 = vpop.f32.mrb[27].mxu1 }
 0x14b   : > { %v1772_v26 = vadd.f32 %v3999_v7, %v1756_v15  ;;  %v1528_v27 = vadd.f32 %v3999_v7, %v1512_v13  ;;  %v1515_v36 = vmul.f32 %v3309_v16, %v3994_v6  ;;  %v1757_v39 = vmul.f32 %v3329_v17, %v3994_v6 }
 0x14c   : > { %v4160_v30 = vmax.f32 %v1557_v20, %v1783_v14  ;;  %v1546_v32 = vmax.f32 %v1530_v18, 0.0  ;;  %v1770_v33 = vadd.f32 %v3999_v7, %v1754_v22  ;;  %v1513_v23 = vmul.f32 %v3994_v6, %v1476_v24 }
 0x14d   : > { %v1788_v44 = vmax.f32 %v1772_v26, 0.0  ;;  %v1544_v35 = vmax.f32 %v1528_v27, 0.0  ;;  %v1531_v38 = vadd.f32 %v3999_v7, %v1515_v36  ;;  %v1773_v40 = vadd.f32 %v3999_v7, %v1757_v39 }
 0x14e   : > { %v1562_v41 = vmax.f32 %v4065_v50, %v1546_v32  ;;  %v1786_v49 = vmax.f32 %v1770_v33, 0.0  ;;  %v1529_v45 = vadd.f32 %v3999_v7, %v1513_v23  ;;  %v1755_v46 = vmul.f32 %v3994_v6, %v1718_v25 }
 0x14f   : > { %v1560_v47 = vmax.f32 %v4067_v53, %v1544_v35  ;;  %v1547_v48 = vmax.f32 %v1531_v38, 0.0  ;;  %v1789_v51 = vmax.f32 %v1773_v40, 0.0  ;;  %v3312_v52 = vpop.f32.mrb[28].mxu0  ;;  %v3332_v54 = vpop.f32.mrb[28].mxu1 }
 0x150   : > { %v4170_v55 = vmax.f32 %v1562_v41, %v1788_v44  ;;  %v1545_v56 = vmax.f32 %v1529_v45, 0.0  ;;  %v1771_v57 = vadd.f32 %v3999_v7, %v1755_v46  ;;  %v1518_v59 = vmul.f32 %v3312_v52, %v3994_v6  ;;  %v1489_v60 = vpop.f32.mrb[29].mxu0  ;;  %v1731_v50 = vpop.f32.mrb[29].mxu1 }
 0x151   : > { %v4174_v61 = vmax.f32 %v1560_v47, %v1786_v49  ;;  %v1563_v62 = vmax.f32 %v4069_v58, %v1547_v48  ;;  %v1760_v0 = vmul.f32 %v3332_v54, %v3994_v6  ;;  %v1516_v53 = vmul.f32 %v3994_v6, %v1489_v60  ;;  %v3313_v1 = vpop.f32.mrb[30].mxu0  ;;  %v3333_v2 = vpop.f32.mrb[30].mxu1 }
 0x152   : > { %v1561_v3 = vmax.f32 %v4073_v63, %v1545_v56  ;;  %v1787_v5 = vmax.f32 %v1771_v57, 0.0  ;;  %v1534_v8 = vadd.f32 %v3999_v7, %v1518_v59  ;;  %v1758_v9 = vmul.f32 %v3994_v6, %v1731_v50  ;;  %v1492_v11 = vpop.f32.mrb[31].mxu0  ;;  %v1734_v12 = vpop.f32.mrb[31].mxu1 }
 0x153   : > { %v4182_v14 = vmax.f32 %v1563_v62, %v1789_v51  ;;  %v1776_v15 = vadd.f32 %v3999_v7, %v1760_v0  ;;  %v1532_v58 = vadd.f32 %v3999_v7, %v1516_v53  ;;  %v1519_v13 = vmul.f32 %v3313_v1, %v3994_v6 }
 0x154   : > { %v4187_v16 = vmax.f32 %v1561_v3, %v1787_v5  ;;  %v1550_v17 = vmax.f32 %v1534_v8, 0.0  ;;  %v1774_v63 = vadd.f32 %v3999_v7, %v1758_v9  ;;  %v1761_v20 = vmul.f32 %v3333_v2, %v3994_v6 }
 0x155   : > { %v1792_v18 = vmax.f32 %v1776_v15, 0.0  ;;  %v1548_v22 = vmax.f32 %v1532_v58, 0.0  ;;  %v1535_v24 = vadd.f32 %v3999_v7, %v1519_v13  ;;  %v1517_v25 = vmul.f32 %v3994_v6, %v1492_v11 }
 0x156   : > { %v1566_v26 = vmax.f32 %v4089_v28, %v1550_v17  ;;  %v1790_v27 = vmax.f32 %v1774_v63, 0.0  ;;  %v1777_v36 = vadd.f32 %v3999_v7, %v1761_v20  ;;  %v1759_v39 = vmul.f32 %v3994_v6, %v1734_v12 }
 0x157   : > { %v1564_v32 = vmax.f32 %v4091_v31, %v1548_v22  ;;  %v1551_v33 = vmax.f32 %v1535_v24, 0.0  ;;  %v1533_v23 = vadd.f32 %v3999_v7, %v1517_v25  ;;  %v3340_v44 = vpop.f32.mrb[32].mxu0  ;;  %v3360_v35 = vpop.f32.mrb[32].mxu1 }
 0x158   : > { %v4198_v38 = vmax.f32 %v1566_v26, %v1792_v18  ;;  %v1793_v40 = vmax.f32 %v1777_v36, 0.0  ;;  %v1775_v41 = vadd.f32 %v3999_v7, %v1759_v39  ;;  %v1990_v49 = vmul.f32 %v3340_v44, %v3994_v6  ;;  %v1925_v28 = vpop.f32.mrb[33].mxu0  ;;  %v2167_v45 = vpop.f32.mrb[33].mxu1 }
 0x159   : > { %v4202_v46 = vmax.f32 %v1564_v32, %v1790_v27  ;;  %v1567_v47 = vmax.f32 %v4093_v37, %v1551_v33  ;;  %v1549_v48 = vmax.f32 %v1533_v23, 0.0  ;;  %v2232_v31 = vmul.f32 %v3360_v35, %v3994_v6  ;;  %v3341_v51 = vpop.f32.mrb[34].mxu0  ;;  %v3361_v52 = vpop.f32.mrb[34].mxu1 }
 0x15a   : > { %v1791_v54 = vmax.f32 %v1775_v41, 0.0  ;;  %v2006_v56 = vadd.f32 %v3999_v7, %v1990_v49  ;;  %v1988_v57 = vmul.f32 %v3994_v6, %v1925_v28  ;;  %v2230_v59 = vmul.f32 %v3994_v6, %v2167_v45  ;;  %v1928_v60 = vpop.f32.mrb[35].mxu0  ;;  %v2170_v50 = vpop.f32.mrb[35].mxu1 }
 0x15b   : > { %v4209_v62 = vmax.f32 %v1567_v47, %v1793_v40  ;;  %v1565_v0 = vmax.f32 %v4097_v43, %v1549_v48  ;;  %v2248_v37 = vadd.f32 %v3999_v7, %v2232_v31  ;;  %v1991_v53 = vmul.f32 %v3341_v51, %v3994_v6 }
 0x15c   : > { %v2022_v1 = vmax.f32 %v2006_v56, 0.0  ;;  %v2004_v2 = vadd.f32 %v3999_v7, %v1988_v57  ;;  %v2246_v3 = vadd.f32 %v3999_v7, %v2230_v59  ;;  %v2233_v5 = vmul.f32 %v3361_v52, %v3994_v6 }
 0x15d   : > { %v4217_v8 = vmax.f32 %v1565_v0, %v1791_v54  ;;  %v2264_v9 = vmax.f32 %v2248_v37, 0.0  ;;  %v2007_v11 = vadd.f32 %v3999_v7, %v1991_v53  ;;  %v1989_v12 = vmul.f32 %v3994_v6, %v1928_v60 }
 0x15e   : > { %v2038_v43 = vmax.f32 %v4115_v21, %v2022_v1  ;;  %v2020_v15 = vmax.f32 %v2004_v2, 0.0  ;;  %v2262_v58 = vmax.f32 %v2246_v3, 0.0  ;;  %v2249_v13 = vadd.f32 %v3999_v7, %v2233_v5 }
 0x15f   : > { %v2023_v17 = vmax.f32 %v2007_v11, 0.0  ;;  %v2005_v63 = vadd.f32 %v3999_v7, %v1989_v12  ;;  %v2231_v20 = vmul.f32 %v3994_v6, %v2170_v50  ;;  %v3344_v18 = vpop.f32.mrb[36].mxu0  ;;  %v3364_v22 = vpop.f32.mrb[36].mxu1 }
 0x160   : > { %v4225_v24 = vmax.f32 %v2038_v43, %v2264_v9  ;;  %v2036_v25 = vmax.f32 %v4120_v29, %v2020_v15  ;;  %v2265_v26 = vmax.f32 %v2249_v13, 0.0  ;;  %v1994_v27 = vmul.f32 %v3344_v18, %v3994_v6  ;;  %v1941_v36 = vpop.f32.mrb[37].mxu0  ;;  %v2183_v21 = vpop.f32.mrb[37].mxu1 }
 0x161   : > { %v2039_v39 = vmax.f32 %v4125_v34, %v2023_v17  ;;  %v2021_v32 = vmax.f32 %v2005_v63, 0.0  ;;  %v2247_v33 = vadd.f32 %v3999_v7, %v2231_v20  ;;  %v2236_v23 = vmul.f32 %v3364_v22, %v3994_v6  ;;  %v3345_v44 = vpop.f32.mrb[38].mxu0  ;;  %v3365_v35 = vpop.f32.mrb[38].mxu1 }
 0x162   : > { %v4232_v40 = vmax.f32 %v2036_v25, %v2262_v58  ;;  %v2010_v41 = vadd.f32 %v3999_v7, %v1994_v27  ;;  %v1992_v29 = vmul.f32 %v3994_v6, %v1941_v36  ;;  %v2234_v49 = vmul.f32 %v3994_v6, %v2183_v21  ;;  %v1944_v28 = vpop.f32.mrb[39].mxu0  ;;  %v2186_v45 = vpop.f32.mrb[39].mxu1 }
 0x163   : > { %v4237_v47 = vmax.f32 %v2039_v39, %v2265_v26  ;;  %v2037_v34 = vmax.f32 %v4130_v42, %v2021_v32  ;;  %v2263_v48 = vmax.f32 %v2247_v33, 0.0  ;;  %v2252_v31 = vadd.f32 %v3999_v7, %v2236_v23 }
 0x164   : > { %v2026_v51 = vmax.f32 %v2010_v41, 0.0  ;;  %v2008_v52 = vadd.f32 %v3999_v7, %v1992_v29  ;;  %v2250_v54 = vadd.f32 %v3999_v7, %v2234_v49  ;;  %v1995_v56 = vmul.f32 %v3345_v44, %v3994_v6 }
 0x165   : > { %v4244_v57 = vmax.f32 %v2037_v34, %v2263_v48  ;;  %v2268_v59 = vmax.f32 %v2252_v31, 0.0  ;;  %v2237_v60 = vmul.f32 %v3365_v35, %v3994_v6  ;;  %v1993_v50 = vmul.f32 %v3994_v6, %v1944_v28 }
 0x166   : > { %v2042_v0 = vmax.f32 %v4143_v4, %v2026_v51  ;;  %v2024_v42 = vmax.f32 %v2008_v52, 0.0  ;;  %v2266_v37 = vmax.f32 %v2250_v54, 0.0  ;;  %v2011_v53 = vadd.f32 %v3999_v7, %v1995_v56 }
 0x167   : > { %v2253_v1 = vadd.f32 %v3999_v7, %v2237_v60  ;;  %v2009_v2 = vadd.f32 %v3999_v7, %v1993_v50  ;;  %v2235_v3 = vmul.f32 %v3994_v6, %v2186_v45  ;;  %v3348_v5 = vpop.f32.mrb[40].mxu0  ;;  %v3368_v9 = vpop.f32.mrb[40].mxu1 }
 0x168   : > { %v4253_v11 = vmax.f32 %v2042_v0, %v2268_v59  ;;  %v2040_v12 = vmax.f32 %v4147_v10, %v2024_v42  ;;  %v2027_v43 = vmax.f32 %v2011_v53, 0.0  ;;  %v1998_v15 = vmul.f32 %v3348_v5, %v3994_v6  ;;  %v1957_v4 = vpop.f32.mrb[41].mxu0  ;;  %v2199_v58 = vpop.f32.mrb[41].mxu1 }
 0x169   : > { %v2269_v13 = vmax.f32 %v2253_v1, 0.0  ;;  %v2025_v17 = vmax.f32 %v2009_v2, 0.0  ;;  %v2251_v63 = vadd.f32 %v3999_v7, %v2235_v3  ;;  %v2240_v20 = vmul.f32 %v3368_v9, %v3994_v6  ;;  %v3349_v18 = vpop.f32.mrb[42].mxu0  ;;  %v3369_v22 = vpop.f32.mrb[42].mxu1 }
 0x16a   : > { %v4259_v25 = vmax.f32 %v2040_v12, %v2266_v37  ;;  %v2043_v26 = vmax.f32 %v4151_v19, %v2027_v43  ;;  %v2014_v27 = vadd.f32 %v3999_v7, %v1998_v15  ;;  %v1996_v10 = vmul.f32 %v3994_v6, %v1957_v4  ;;  %v1960_v36 = vpop.f32.mrb[43].mxu0  ;;  %v2202_v21 = vpop.f32.mrb[43].mxu1 }
 0x16b   : > { %v2041_v39 = vmax.f32 %v4160_v30, %v2025_v17  ;;  %v2267_v32 = vmax.f32 %v2251_v63, 0.0  ;;  %v2256_v33 = vadd.f32 %v3999_v7, %v2240_v20  ;;  %v2238_v23 = vmul.f32 %v3994_v6, %v2199_v58 }
 0x16c   : > { %v4267_v44 = vmax.f32 %v2043_v26, %v2269_v13  ;;  %v2030_v35 = vmax.f32 %v2014_v27, 0.0  ;;  %v2012_v41 = vadd.f32 %v3999_v7, %v1996_v10  ;;  %v1999_v19 = vmul.f32 %v3349_v18, %v3994_v6 }
 0x16d   : > { %v4271_v29 = vmax.f32 %v2041_v39, %v2267_v32  ;;  %v2272_v49 = vmax.f32 %v2256_v33, 0.0  ;;  %v2254_v28 = vadd.f32 %v3999_v7, %v2238_v23  ;;  %v2241_v45 = vmul.f32 %v3369_v22, %v3994_v6 }
 0x16e   : > { %v2046_v30 = vmax.f32 %v4170_v55, %v2030_v35  ;;  %v2028_v34 = vmax.f32 %v2012_v41, 0.0  ;;  %v2015_v48 = vadd.f32 %v3999_v7, %v1999_v19  ;;  %v1997_v31 = vmul.f32 %v3994_v6, %v1960_v36 }
 0x16f   : > { %v2270_v51 = vmax.f32 %v2254_v28, 0.0  ;;  %v2257_v52 = vadd.f32 %v3999_v7, %v2241_v45  ;;  %v2239_v54 = vmul.f32 %v3994_v6, %v2202_v21  ;;  %v3352_v56 = vpop.f32.mrb[44].mxu0  ;;  %v3372_v59 = vpop.f32.mrb[44].mxu1 }
 0x170   : > { %v4281_v60 = vmax.f32 %v2046_v30, %v2272_v49  ;;  %v2044_v50 = vmax.f32 %v4174_v61, %v2028_v34  ;;  %v2031_v0 = vmax.f32 %v2015_v48, 0.0  ;;  %v2013_v42 = vadd.f32 %v3999_v7, %v1997_v31  ;;  %v1973_v55 = vpop.f32.mrb[45].mxu0  ;;  %v2215_v37 = vpop.f32.mrb[45].mxu1 }
 0x171   : > { %v2273_v53 = vmax.f32 %v2257_v52, 0.0  ;;  %v2255_v1 = vadd.f32 %v3999_v7, %v2239_v54  ;;  %v2002_v2 = vmul.f32 %v3352_v56, %v3994_v6  ;;  %v2244_v3 = vmul.f32 %v3372_v59, %v3994_v6  ;;  %v3353_v5 = vpop.f32.mrb[46].mxu0  ;;  %v3373_v9 = vpop.f32.mrb[46].mxu1 }
 0x172   : > { %v4291_v12 = vmax.f32 %v2044_v50, %v2270_v51  ;;  %v2047_v61 = vmax.f32 %v4182_v14, %v2031_v0  ;;  %v2029_v43 = vmax.f32 %v2013_v42, 0.0  ;;  %v2000_v15 = vmul.f32 %v3994_v6, %v1973_v55  ;;  %v1976_v4 = vpop.f32.mrb[47].mxu0  ;;  %v2218_v58 = vpop.f32.mrb[47].mxu1 }
 0x173   : > { %v2271_v13 = vmax.f32 %v2255_v1, 0.0  ;;  %v2018_v17 = vadd.f32 %v3999_v7, %v2002_v2  ;;  %v2260_v63 = vadd.f32 %v3999_v7, %v2244_v3  ;;  %v2242_v20 = vmul.f32 %v3994_v6, %v2215_v37 }
 0x174   : > { %v4299_v18 = vmax.f32 %v2047_v61, %v2273_v53  ;;  %v2045_v22 = vmax.f32 %v4187_v16, %v2029_v43  ;;  %v2016_v14 = vadd.f32 %v3999_v7, %v2000_v15  ;;  %v2003_v26 = vmul.f32 %v3353_v5, %v3994_v6 }
 0x175   : > { %v2034_v27 = vmax.f32 %v2018_v17, 0.0  ;;  %v2276_v10 = vmax.f32 %v2260_v63, 0.0  ;;  %v2258_v36 = vadd.f32 %v3999_v7, %v2242_v20  ;;  %v2245_v21 = vmul.f32 %v3373_v9, %v3994_v6 }
 0x176   : > { %v4307_v39 = vmax.f32 %v2045_v22, %v2271_v13  ;;  %v2032_v32 = vmax.f32 %v2016_v14, 0.0  ;;  %v2019_v33 = vadd.f32 %v3999_v7, %v2003_v26  ;;  %v2001_v16 = vmul.f32 %v3994_v6, %v1976_v4  ;;  %v4362_v22 = vld [vmem:[%s810_s16] ss:$0 sm:$0xff] }
 0x177   : > { %v2050_v23 = vmax.f32 %v4198_v38, %v2034_v27  ;;  %v2274_v35 = vmax.f32 %v2258_v36, 0.0  ;;  %v2261_v41 = vadd.f32 %v3999_v7, %v2245_v21  ;;  %v2243_v19 = vmul.f32 %v3994_v6, %v2218_v58  ;;  %v3380_v49 = vpop.f32.mrb[48].mxu0  ;;  %v3400_v28 = vpop.f32.mrb[48].mxu1 }
 0x178   : > { %v2048_v45 = vmax.f32 %v4202_v46, %v2032_v32  ;;  %v2035_v30 = vmax.f32 %v2019_v33, 0.0  ;;  %v2017_v34 = vadd.f32 %v3999_v7, %v2001_v16  ;;  %v2474_v48 = vmul.f32 %v3380_v49, %v3994_v6  ;;  %v2409_v38 = vpop.f32.mrb[49].mxu0  ;;  %v2651_v31 = vpop.f32.mrb[49].mxu1  ;;  %v4377_v49 = vld [vmem:[%s4518_s3] ss:$0 sm:$0xff] }
 0x179   : > { %v4328_v51 = vmax.f32 %v2050_v23, %v2276_v10  ;;  %v2277_v52 = vmax.f32 %v2261_v41, 0.0  ;;  %v2259_v54 = vadd.f32 %v3999_v7, %v2243_v19  ;;  %v2716_v56 = vmul.f32 %v3400_v28, %v3994_v6  ;;  %v3381_v46 = vpop.f32.mrb[50].mxu0  ;;  %v3401_v59 = vpop.f32.mrb[50].mxu1 }
 0x17a   : > { %v4332_v50 = vmax.f32 %v2048_v45, %v2274_v35  ;;  %v2051_v0 = vmax.f32 %v4209_v62, %v2035_v30  ;;  %v2033_v42 = vmax.f32 %v2017_v34, 0.0  ;;  %v2490_v55 = vadd.f32 %v3999_v7, %v2474_v48  ;;  %v2412_v37 = vpop.f32.mrb[51].mxu0  ;;  %v2654_v53 = vpop.f32.mrb[51].mxu1 }
 0x17b   : > { %v2275_v1 = vmax.f32 %v2259_v54, 0.0  ;;  %v2732_v2 = vadd.f32 %v3999_v7, %v2716_v56  ;;  %v2472_v3 = vmul.f32 %v3994_v6, %v2409_v38  ;;  %v2714_v5 = vmul.f32 %v3994_v6, %v2651_v31 }
 0x17c   : > { %v4345_v9 = vmax.f32 %v2051_v0, %v2277_v52  ;;  %v2049_v62 = vmax.f32 %v4217_v8, %v2033_v42  ;;  %v2506_v61 = vmax.f32 %v2490_v55, 0.0  ;;  %v2475_v43 = vmul.f32 %v3381_v46, %v3994_v6 }
 0x17d   : > { %v2748_v15 = vmax.f32 %v2732_v2, 0.0  ;;  %v2488_v4 = vadd.f32 %v3999_v7, %v2472_v3  ;;  %v2730_v58 = vadd.f32 %v3999_v7, %v2714_v5  ;;  %v2717_v13 = vmul.f32 %v3401_v59, %v3994_v6 }
 0x17e   : > { %v4356_v17 = vmax.f32 %v2049_v62, %v2275_v1  ;;  %v2522_v63 = vmax.f32 %v4225_v24, %v2506_v61  ;;  %v2491_v8 = vadd.f32 %v3999_v7, %v2475_v43  ;;  %v2473_v20 = vmul.f32 %v3994_v6, %v2412_v37 }
 0x17f   : > { %v2504_v14 = vmax.f32 %v2488_v4, 0.0  ;;  %v2746_v26 = vmax.f32 %v2730_v58, 0.0  ;;  %v2733_v27 = vadd.f32 %v3999_v7, %v2717_v13  ;;  %v2715_v10 = vmul.f32 %v3994_v6, %v2654_v53  ;;  %v3384_v36 = vpop.f32.mrb[52].mxu0  ;;  %v3404_v21 = vpop.f32.mrb[52].mxu1 }
 0x180   : > { %v2764_v32 = vmax.f32 %v2522_v63, %v2748_v15  ;;  %v2507_v33 = vmax.f32 %v2491_v8, 0.0  ;;  %v2489_v16 = vadd.f32 %v3999_v7, %v2473_v20  ;;  %v2478_v24 = vmul.f32 %v3384_v36, %v3994_v6  ;;  %v2425_v23 = vpop.f32.mrb[53].mxu0  ;;  %v2667_v35 = vpop.f32.mrb[53].mxu1  ;;  %v4383_v6 = vld [vmem:[%s4517_s2] ss:$0 sm:$0xff] }
 0x181   : > { %v2520_v41 = vmax.f32 %v4232_v40, %v2504_v14  ;;  %v2749_v19 = vmax.f32 %v2733_v27, 0.0  ;;  %v2731_v7 = vadd.f32 %v4377_v49, %v2715_v10  ;;  %v2720_v28 = vmul.f32 %v4383_v6, %v3404_v21  ;;  %v3385_v45 = vpop.f32.mrb[54].mxu0  ;;  %v3405_v30 = vpop.f32.mrb[54].mxu1 }
 0x182   : > { %v2787_v40 = vmul.f32 %v4362_v22, %v2764_v32  ;;  %v2523_v34 = vmax.f32 %v4237_v47, %v2507_v33  ;;  %v2505_v48 = vmax.f32 %v2489_v16, 0.0  ;;  %v2494_v38 = vadd.f32 %v4377_v49, %v2478_v24  ;;  %v2428_v31 = vpop.f32.mrb[55].mxu0  ;;  %v2670_v52 = vpop.f32.mrb[55].mxu1 }
 0x183   : > { %v2762_v54 = vmax.f32 %v2520_v41, %v2746_v26  ;;  %v2747_v56 = vmax.f32 %v2731_v7, 0.0  ;;  %v2736_v46 = vadd.f32 %v4377_v49, %v2720_v28  ;;  %v2476_v59 = vmul.f32 %v4383_v6, %v2425_v23 }
 0x184   : > { %2804 = vst.msk [vmem:[%s4371_s28 + $0x10] sm:$0xff] %vm2801_vm3, %v2787_v40  ;;  %v2765_v0 = vmax.f32 %v2523_v34, %v2749_v19  ;;  %v2521_v42 = vmax.f32 %v4244_v57, %v2505_v48  ;;  %v2510_v55 = vmax.f32 %v2494_v38, 0.0  ;;  %v2718_v47 = vmul.f32 %v4383_v6, %v2667_v35 }
 0x185   : > { %v2785_v37 = vmul.f32 %v4362_v22, %v2762_v54  ;;  %v2752_v53 = vmax.f32 %v2736_v46, 0.0  ;;  %v2492_v1 = vadd.f32 %v4377_v49, %v2476_v59  ;;  %v2479_v2 = vmul.f32 %v4383_v6, %v3385_v45 }
 0x186   : > { %v2788_v3 = vmul.f32 %v4362_v22, %v2765_v0  ;;  %v2763_v5 = vmax.f32 %v2521_v42, %v2747_v56  ;;  %v2526_v62 = vmax.f32 %v4253_v11, %v2510_v55  ;;  %v2734_v61 = vadd.f32 %v4377_v49, %v2718_v47 }
 0x187   : > { %2802 = vst.msk [vmem:[%s4371_s28] sm:$0xff] %vm2801_vm3, %v2785_v37  ;;  %v2508_v57 = vmax.f32 %v2492_v1, 0.0  ;;  %v2495_v43 = vadd.f32 %v4377_v49, %v2479_v2  ;;  %v2721_v15 = vmul.f32 %v4383_v6, %v3405_v30  ;;  %v2477_v4 = vmul.f32 %v4383_v6, %v2428_v31  ;;  %v3388_v58 = vpop.f32.mrb[56].mxu0  ;;  %v3408_v13 = vpop.f32.mrb[56].mxu1 }
 0x188   : > { %2805 = vst.msk [vmem:[%s4371_s28 + $0x18] sm:$0xff] %vm2801_vm3, %v2788_v3  ;;  %v2786_v63 = vmul.f32 %v4362_v22, %v2763_v5  ;;  %v2768_v8 = vmax.f32 %v2526_v62, %v2752_v53  ;;  %v2750_v11 = vmax.f32 %v2734_v61, 0.0  ;;  %v2719_v20 = vmul.f32 %v4383_v6, %v2670_v52  ;;  %v2441_v14 = vpop.f32.mrb[57].mxu0  ;;  %v2683_v26 = vpop.f32.mrb[57].mxu1 }
 0x189   : > { %v2524_v27 = vmax.f32 %v4259_v25, %v2508_v57  ;;  %v2511_v10 = vmax.f32 %v2495_v43, 0.0  ;;  %v2737_v36 = vadd.f32 %v4377_v49, %v2721_v15  ;;  %v2493_v21 = vadd.f32 %v4377_v49, %v2477_v4  ;;  %v3389_v32 = vpop.f32.mrb[58].mxu0  ;;  %v3409_v33 = vpop.f32.mrb[58].mxu1 }
 0x18a   : > { %2803 = vst.msk [vmem:[%s4371_s28 + $0x8] sm:$0xff] %vm2801_vm3, %v2786_v63  ;;  %v2791_v16 = vmul.f32 %v4362_v22, %v2768_v8  ;;  %v2735_v24 = vadd.f32 %v4377_v49, %v2719_v20  ;;  %v2482_v23 = vmul.f32 %v4383_v6, %v3388_v58  ;;  %v2724_v35 = vmul.f32 %v4383_v6, %v3408_v13  ;;  %v2444_v41 = vpop.f32.mrb[59].mxu0  ;;  %v2686_v25 = vpop.f32.mrb[59].mxu1 }
 0x18b   : > { %v2766_v19 = vmax.f32 %v2524_v27, %v2750_v11  ;;  %v2527_v7 = vmax.f32 %v4267_v44, %v2511_v10  ;;  %v2753_v28 = vmax.f32 %v2737_v36, 0.0  ;;  %v2509_v45 = vmax.f32 %v2493_v21, 0.0 }
 0x18c   : > { %2808 = vst.msk [vmem:[%s4371_s28 + $0x30] sm:$0xff] %vm2801_vm3, %v2791_v16  ;;  %v2751_v30 = vmax.f32 %v2735_v24, 0.0  ;;  %v2498_v40 = vadd.f32 %v4377_v49, %v2482_v23  ;;  %v2740_v34 = vadd.f32 %v4377_v49, %v2724_v35  ;;  %v2480_v48 = vmul.f32 %v4383_v6, %v2441_v14 }
 0x18d   : > { %v2789_v38 = vmul.f32 %v4362_v22, %v2766_v19  ;;  %v2769_v31 = vmax.f32 %v2527_v7, %v2753_v28  ;;  %v2525_v52 = vmax.f32 %v4271_v29, %v2509_v45  ;;  %v2722_v54 = vmul.f32 %v4383_v6, %v2683_v26 }
 0x18e   : > { %v2514_v44 = vmax.f32 %v2498_v40, 0.0  ;;  %v2756_v56 = vmax.f32 %v2740_v34, 0.0  ;;  %v2496_v46 = vadd.f32 %v4377_v49, %v2480_v48  ;;  %v2483_v59 = vmul.f32 %v4383_v6, %v3389_v32 }
 0x18f   : > { %2806 = vst.msk [vmem:[%s4371_s28 + $0x20] sm:$0xff] %vm2801_vm3, %v2789_v38  ;;  %v2792_v0 = vmul.f32 %v4362_v22, %v2769_v31  ;;  %v2767_v42 = vmax.f32 %v2525_v52, %v2751_v30  ;;  %v2738_v55 = vadd.f32 %v4377_v49, %v2722_v54  ;;  %v2725_v47 = vmul.f32 %v4383_v6, %v3409_v33  ;;  %v3392_v37 = vpop.f32.mrb[60].mxu0  ;;  %v3412_v29 = vpop.f32.mrb[60].mxu1 }
 0x190   : > { %v2530_v53 = vmax.f32 %v4281_v60, %v2514_v44  ;;  %v2512_v1 = vmax.f32 %v2496_v46, 0.0  ;;  %v2499_v2 = vadd.f32 %v4377_v49, %v2483_v59  ;;  %v2481_v3 = vmul.f32 %v4383_v6, %v2444_v41  ;;  %v2457_v5 = vpop.f32.mrb[61].mxu0  ;;  %v2699_v62 = vpop.f32.mrb[61].mxu1 }
 0x191   : > { %2809 = vst.msk [vmem:[%s4371_s28 + $0x38] sm:$0xff] %vm2801_vm3, %v2792_v0  ;;  %v2790_v61 = vmul.f32 %v4362_v22, %v2767_v42  ;;  %v2754_v57 = vmax.f32 %v2738_v55, 0.0  ;;  %v2741_v43 = vadd.f32 %v4377_v49, %v2725_v47  ;;  %v2723_v15 = vmul.f32 %v4383_v6, %v2686_v25  ;;  %v3393_v4 = vpop.f32.mrb[62].mxu0  ;;  %v3413_v58 = vpop.f32.mrb[62].mxu1 }
 0x192   : > { %v2772_v60 = vmax.f32 %v2530_v53, %v2756_v56  ;;  %v2528_v13 = vmax.f32 %v4291_v12, %v2512_v1  ;;  %v2515_v63 = vmax.f32 %v2499_v2, 0.0  ;;  %v2497_v8 = vadd.f32 %v4377_v49, %v2481_v3  ;;  %v2460_v11 = vpop.f32.mrb[63].mxu0  ;;  %v2702_v20 = vpop.f32.mrb[63].mxu1 }
 0x193   : > { %2807 = vst.msk [vmem:[%s4371_s28 + $0x28] sm:$0xff] %vm2801_vm3, %v2790_v61  ;;  %v2757_v14 = vmax.f32 %v2741_v43, 0.0  ;;  %v2739_v26 = vadd.f32 %v4377_v49, %v2723_v15  ;;  %v2486_v27 = vmul.f32 %v4383_v6, %v3392_v37  ;;  %v2728_v10 = vmul.f32 %v4383_v6, %v3412_v29 }
 0x194   : > { %v2795_v36 = vmul.f32 %v4362_v22, %v2772_v60  ;;  %v2770_v21 = vmax.f32 %v2528_v13, %v2754_v57  ;;  %v2531_v12 = vmax.f32 %v4299_v18, %v2515_v63  ;;  %v2513_v32 = vmax.f32 %v2497_v8, 0.0 }
 0x195   : > { %v2755_v33 = vmax.f32 %v2739_v26, 0.0  ;;  %v2502_v16 = vadd.f32 %v4377_v49, %v2486_v27  ;;  %v2744_v24 = vadd.f32 %v4377_v49, %v2728_v10  ;;  %v2484_v23 = vmul.f32 %v4383_v6, %v2457_v5 }
 0x196   : > { %2812 = vst.msk [vmem:[%s4371_s28 + $0x50] sm:$0xff] %vm2801_vm3, %v2795_v36  ;;  %v2793_v35 = vmul.f32 %v4362_v22, %v2770_v21  ;;  %v2773_v41 = vmax.f32 %v2531_v12, %v2757_v14  ;;  %v2529_v25 = vmax.f32 %v4307_v39, %v2513_v32  ;;  %v2726_v19 = vmul.f32 %v4383_v6, %v2699_v62 }
 0x197   : > { %v2518_v7 = vmax.f32 %v2502_v16, 0.0  ;;  %v2760_v18 = vmax.f32 %v2744_v24, 0.0  ;;  %v2500_v28 = vadd.f32 %v4377_v49, %v2484_v23  ;;  %v2487_v45 = vmul.f32 %v4383_v6, %v3393_v4 }
 0x198   : > { %2810 = vst.msk [vmem:[%s4371_s28 + $0x40] sm:$0xff] %vm2801_vm3, %v2793_v35  ;;  %v2796_v30 = vmul.f32 %v4362_v22, %v2773_v41  ;;  %v2771_v40 = vmax.f32 %v2529_v25, %v2755_v33  ;;  %v2742_v34 = vadd.f32 %v4377_v49, %v2726_v19  ;;  %v2729_v48 = vmul.f32 %v4383_v6, %v3413_v58 }
 0x199   : > { %v2534_v39 = vmax.f32 %v4328_v51, %v2518_v7  ;;  %v2516_v38 = vmax.f32 %v2500_v28, 0.0  ;;  %v2503_v31 = vadd.f32 %v4377_v49, %v2487_v45  ;;  %v2485_v52 = vmul.f32 %v4383_v6, %v2460_v11 }
 0x19a   : > { %2813 = vst.msk [vmem:[%s4371_s28 + $0x58] sm:$0xff] %vm2801_vm3, %v2796_v30  ;;  %v2794_v54 = vmul.f32 %v4362_v22, %v2771_v40  ;;  %v2758_v44 = vmax.f32 %v2742_v34, 0.0  ;;  %v2745_v56 = vadd.f32 %v4377_v49, %v2729_v48  ;;  %v2727_v46 = vmul.f32 %v4383_v6, %v2702_v20 }
 0x19b   : > { %v2776_v59 = vmax.f32 %v2534_v39, %v2760_v18  ;;  %v2532_v0 = vmax.f32 %v4332_v50, %v2516_v38  ;;  %v2519_v51 = vmax.f32 %v2503_v31, 0.0  ;;  %v2501_v42 = vadd.f32 %v4377_v49, %v2485_v52 }
 0x19c   : > { %2811 = vst.msk [vmem:[%s4371_s28 + $0x48] sm:$0xff] %vm2801_vm3, %v2794_v54  ;;  %v2761_v55 = vmax.f32 %v2745_v56, 0.0  ;;  %v2743_v47 = vadd.f32 %v4377_v49, %v2727_v46 }
 0x19d   : > { %v2799_v37 = vmul.f32 %v4362_v22, %v2776_v59  ;;  %v2774_v29 = vmax.f32 %v2532_v0, %v2758_v44  ;;  %v2535_v53 = vmax.f32 %v4345_v9, %v2519_v51  ;;  %v2517_v6 = vmax.f32 %v2501_v42, 0.0 }
 0x19e   : > { %v2759_v3 = vmax.f32 %v2743_v47, 0.0 }
 0x19f   : > { %2816 = vst.msk [vmem:[%s4371_s28 + $0x70] sm:$0xff] %vm2801_vm3, %v2799_v37  ;;  %v2797_v50 = vmul.f32 %v4362_v22, %v2774_v29  ;;  %v2777_v1 = vmax.f32 %v2535_v53, %v2761_v55  ;;  %v2533_v2 = vmax.f32 %v4356_v17, %v2517_v6 }
 0x1a1   : > { %2814 = vst.msk [vmem:[%s4371_s28 + $0x60] sm:$0xff] %vm2801_vm3, %v2797_v50  ;;  %v2800_v5 = vmul.f32 %v4362_v22, %v2777_v1  ;;  %v2775_v62 = vmax.f32 %v2533_v2, %v2759_v3 }
 0x1a3   : > { %2817 = vst.msk [vmem:[%s4371_s28 + $0x78] sm:$0xff] %vm2801_vm3, %v2800_v5  ;;  %v2798_v49 = vmul.f32 %v4362_v22, %v2775_v62 }
 0x1a5   : > { %2815 = vst.msk [vmem:[%s4371_s28 + $0x68] sm:$0xff] %vm2801_vm3, %v2798_v49 }
 0x1a6 PF: > { %s15_s24 = sadd.s32 1, %s3593_s24   ;;  %s4522_s18 = smov %s3573_s19 }
 0x1a7   : > { %p12_p12 = scmp.ge.s32.totalorder %s15_s24, 10   ;;  %s4523_s19 = smov %s3677_s8 }
 0x1a8   : > { %s4524_s20 = smov %s3585_s22  ;;  %s4525_s21 = smov %s3589_s23 }
 0x1a9   : > { %s4526_s22 = smov %s4529_s25  ;;  %s4527_s23 = smov %s4533_s26 }
 0x1aa   :  { %14 = sbr.rel (!%p12_p12) target bundleno = 4 (0x4), region = 126 }

// kernel: interactive_hnn_forward.10
= control target key start
LH: loop header
LB: loop body
LE: loop exit
PB: predicated region body
PF: predicated region fallthrough
CT: control target
= control target key end

     0   :  { %s1495_s15 = smov 0   ;;  %s1871_s0 = inlined_call_operand.vmem [shape: bf16[1024,108], index: 0, kind: input, shape index: {}]   ;;  %s1872_s1 = inlined_call_operand.vmem [shape: bf16[108,4], index: 1, kind: input, shape index: {}]   ;;  %s1873_s2 = inlined_call_operand.vmem [shape: f32[1,4], index: 2, kind: input, shape index: {}]   ;;  %s1874_s3 = inlined_call_operand.vmem [shape: f32[1,4], index: 3, kind: input, shape index: {}]   ;;  %s1875_s4 = inlined_call_operand.vmem [shape: f32[1024,4], index: 4, kind: output, shape index: {}]  }
   0x1 LB: > { %s1198_s16 = sadd.s32 4294967295, %s1468_s15   ;;  %p1202_p0 = scmp.ge.s32.totalorder %s1468_s15, 1  ;;  %s1468_s15 = sphi %s1495_s15, %s14_s15  }
   0x2   : > { %p163_p1 = scmp.lt.s32.totalorder %s1468_s15, 3 }
   0x4   : > { %p164_p2 = pnand %p1202_p0, %p163_p1 }
   0x5   : > { %v1423_v0 = vld [vmem:[%s1872_s1] sm:$0xff] (!%p164_p2)   ;;  %v1424_v1 = vld [vmem:[%s1872_s1 + $0x8] sm:$0xff] (!%p164_p2)   ;;  %s1203_s21 = sshll.u32 (!%p164_p2), %s1198_s16, 6  ;;  %v1425_v2 = vld [vmem:[%s1872_s1 + $0x10] sm:$0xff] (!%p164_p2)   ;;  %vm481_vm0 = vcmask (!%p164_p2), 883712   ;;  %vm578_vm1 = vcmask (!%p164_p2), 1045504  }
   0x6   : > { %167 = sbr.rel (%p164_p2) target bundleno = 312 (0x138), region = 36  ;;  %1321 = vmatprep.subr.bf16.mxu0 (!%p164_p2), %v1423_v0  ;;  %1399 = vmatprep.subr.bf16.mxu1 (!%p164_p2), %v1423_v0  ;;  %p190_p3 = scmp.lt.s32.totalorder (!%p164_p2), %s1203_s21, 127  ;;  %v1426_v3 = vld [vmem:[%s1872_s1 + $0x18] sm:$0xff] (!%p164_p2)   ;;  %v1427_v6 = vld [vmem:[%s1872_s1 + $0x20] sm:$0xff] (!%p164_p2)   ;;  %v1428_v7 = vld [vmem:[%s1872_s1 + $0x28] sm:$0xff] (!%p164_p2)   ;;  %vm1077_vm2 = vcmask (!%p164_p2), 31744  }
   0x7   : > { %1322 = vmatpush3.bf16.msra.mxu0 (!%p164_p2), %v1423_v0  ;;  %1406 = vmatpush3.bf16.msra.mxu1 (!%p164_p2), %v1423_v0  ;;  %v1429_v8 = vld [vmem:[%s1872_s1 + $0x30] sm:$0x3f] (!%p164_p2)   ;;  %v1599_v40 = vld [vmem:[%s1873_s2] ss:$0 sm:$0xff] (!%p164_p2) }
   0x8   : > { %1323 = vmatprep.subr.bf16.mxu0 (!%p164_p2), %v1424_v1  ;;  %1400 = vmatprep.subr.bf16.mxu1 (!%p164_p2), %v1424_v1  ;;  %v580_v9 = vsel (!%p164_p2), %vm578_vm1, %v1429_v8, 0  ;;  %v1604_v42 = vld [vmem:[%s1874_s3] ss:$0 sm:$0xff] (!%p164_p2) }
   0xb   : > { %1324 = vmatpush3.bf16.msra.mxu0 (!%p164_p2), %v1424_v1  ;;  %1407 = vmatpush3.bf16.msra.mxu1 (!%p164_p2), %v1424_v1 }
   0xc   : > { %1325 = vmatprep.subr.bf16.mxu0 (!%p164_p2), %v1425_v2  ;;  %1401 = vmatprep.subr.bf16.mxu1 (!%p164_p2), %v1425_v2 }
   0xd   : > { %s1877_s21 = smov (!%p190_p3, %s1203_s21), 127 }
   0xe   : > { %s1204_s24 = sshll.u32 %s1877_s21, 2  ;;  %s1206_s14 = sshll.u32 %s1877_s21, 3 }
   0xf   : > { %s1521_s29 = scalar_lea.vmem %s1871_s0, %s1204_s24  ;;  %1326 = vmatpush3.bf16.msra.mxu0 %v1425_v2  ;;  %1408 = vmatpush3.bf16.msra.mxu1 %v1425_v2  ;;  %s1618_s18 = scalar_lea.vmem %s1875_s4, %s1206_s14 }
  0x10   : > { %v1430_v4 = vld [vmem:[%s1521_s29] sm:$0xff]   ;;  %1327 = vmatprep.subr.bf16.mxu0 %v1426_v3  ;;  %1402 = vmatprep.subr.bf16.mxu1 %v1426_v3  ;;  %v1432_v10 = vld [vmem:[%s1521_s29 + $0x8] sm:$0xff]   ;;  %v1434_v12 = vld [vmem:[%s1521_s29 + $0x10] sm:$0xff]  }
  0x11   : > { %v1431_v5 = vld [vmem:[%s1521_s29 + $0x80] sm:$0xff]   ;;  %1335 = vmatprep.mubr.msk.bf16.mxu0 %vm481_vm0, %v1430_v4  ;;  %v1433_v11 = vld [vmem:[%s1521_s29 + $0x88] sm:$0xff]   ;;  %v1435_v13 = vld [vmem:[%s1521_s29 + $0x90] sm:$0xff]  }
  0x12   : > { %1367 = vmatprep.mubr.msk.bf16.mxu1 %vm481_vm0, %v1431_v5  ;;  %v1436_v14 = vld [vmem:[%s1521_s29 + $0x18] sm:$0xff]   ;;  %v1438_v16 = vld [vmem:[%s1521_s29 + $0x20] sm:$0xff]   ;;  %v1440_v18 = vld [vmem:[%s1521_s29 + $0x28] sm:$0xff]  }
  0x13   : > { %1328 = vmatpush3.bf16.msra.mxu0 %v1426_v3  ;;  %1409 = vmatpush3.bf16.msra.mxu1 %v1426_v3  ;;  %v1437_v15 = vld [vmem:[%s1521_s29 + $0x98] sm:$0xff]   ;;  %v1439_v17 = vld [vmem:[%s1521_s29 + $0xa0] sm:$0xff]   ;;  %v1441_v19 = vld [vmem:[%s1521_s29 + $0xa8] sm:$0xff]  }
  0x14   : > { %1329 = vmatprep.subr.bf16.mxu0 %v1427_v6  ;;  %1403 = vmatprep.subr.bf16.mxu1 %v1427_v6  ;;  %v1442_v20 = vld [vmem:[%s1521_s29 + $0x30] sm:$0xff]   ;;  %v1444_v22 = vld [vmem:[%s1521_s29 + $0x38] sm:$0xff]   ;;  %v1446_v24 = vld [vmem:[%s1521_s29 + $0x40] sm:$0xff]  }
  0x15   : > { %v1443_v21 = vld [vmem:[%s1521_s29 + $0xb0] sm:$0xff]   ;;  %v1445_v23 = vld [vmem:[%s1521_s29 + $0xb8] sm:$0xff]   ;;  %v1447_v25 = vld [vmem:[%s1521_s29 + $0xc0] sm:$0xff]  }
  0x16   : > { %v1448_v26 = vld [vmem:[%s1521_s29 + $0x48] sm:$0xff]   ;;  %v1450_v28 = vld [vmem:[%s1521_s29 + $0x50] sm:$0xff]   ;;  %v1452_v30 = vld [vmem:[%s1521_s29 + $0x58] sm:$0xff]  }
  0x17   : > { %1330 = vmatpush3.bf16.msra.mxu0 %v1427_v6  ;;  %1410 = vmatpush3.bf16.msra.mxu1 %v1427_v6  ;;  %v1449_v27 = vld [vmem:[%s1521_s29 + $0xc8] sm:$0xff]   ;;  %v1451_v29 = vld [vmem:[%s1521_s29 + $0xd0] sm:$0xff]   ;;  %v1453_v31 = vld [vmem:[%s1521_s29 + $0xd8] sm:$0xff]  }
  0x18   : > { %1331 = vmatprep.subr.bf16.mxu0 %v1428_v7  ;;  %1404 = vmatprep.subr.bf16.mxu1 %v1428_v7  ;;  %v1454_v32 = vld [vmem:[%s1521_s29 + $0x60] sm:$0xff]   ;;  %v1456_v34 = vld [vmem:[%s1521_s29 + $0x68] sm:$0xff]   ;;  %v1458_v36 = vld [vmem:[%s1521_s29 + $0x70] sm:$0xff]  }
  0x19   : > { %v1455_v33 = vld [vmem:[%s1521_s29 + $0xe0] sm:$0xff]   ;;  %v1457_v35 = vld [vmem:[%s1521_s29 + $0xe8] sm:$0xff]   ;;  %v1459_v37 = vld [vmem:[%s1521_s29 + $0xf0] sm:$0xff]  }
  0x1a   : > { %v1460_v38 = vld [vmem:[%s1521_s29 + $0x78] sm:$0xff]  }
  0x1b   : > { %1332 = vmatpush3.bf16.msra.mxu0 %v1428_v7  ;;  %1411 = vmatpush3.bf16.msra.mxu1 %v1428_v7  ;;  %v1461_v39 = vld [vmem:[%s1521_s29 + $0xf8] sm:$0xff]  }
  0x1c   : > { %1413 = vmatprep.subr.msk.bf16.mxu0 %vm578_vm1, %v1429_v8  ;;  %1414 = vmatprep.subr.msk.bf16.mxu1 %vm578_vm1, %v1429_v8 }
  0x1f   : > { %1334 = vmatpush3.bf16.msra.mxu0 %v580_v9  ;;  %1412 = vmatpush3.bf16.msra.mxu1 %v580_v9 }
  0x22   : > { %1336 = vmatmul.mubr.msk.bf16.vlgmr.msra.gmra.mrb[0].mxu0 %vm481_vm0, %v1432_v10  ;;  %1368 = vmatmul.mubr.msk.bf16.vlgmr.msra.gmra.mrb[0].mxu1 %vm481_vm0, %v1433_v11 }
  0x23   : > { %1339 = vmatprep.mubr.msk.bf16.mxu0 %vm481_vm0, %v1434_v12  ;;  %1371 = vmatprep.mubr.msk.bf16.mxu1 %vm481_vm0, %v1435_v13 }
  0x2a   : > { %1340 = vmatmul.mubr.msk.bf16.gmra.mrb[4].mxu0 %vm481_vm0, %v1436_v14  ;;  %1372 = vmatmul.mubr.msk.bf16.gmra.mrb[4].mxu1 %vm481_vm0, %v1437_v15 }
  0x2b   : > { %1343 = vmatprep.mubr.msk.bf16.mxu0 %vm481_vm0, %v1438_v16  ;;  %1375 = vmatprep.mubr.msk.bf16.mxu1 %vm481_vm0, %v1439_v17 }
  0x32   : > { %1344 = vmatmul.mubr.msk.bf16.gmra.mrb[8].mxu0 %vm481_vm0, %v1440_v18  ;;  %1376 = vmatmul.mubr.msk.bf16.gmra.mrb[8].mxu1 %vm481_vm0, %v1441_v19 }
  0x33   : > { %1347 = vmatprep.mubr.msk.bf16.mxu0 %vm481_vm0, %v1442_v20  ;;  %1379 = vmatprep.mubr.msk.bf16.mxu1 %vm481_vm0, %v1443_v21 }
  0x3a   : > { %1348 = vmatmul.mubr.msk.bf16.gmra.mrb[12].mxu0 %vm481_vm0, %v1444_v22  ;;  %1380 = vmatmul.mubr.msk.bf16.gmra.mrb[12].mxu1 %vm481_vm0, %v1445_v23 }
  0x3b   : > { %1351 = vmatprep.mubr.msk.bf16.mxu0 %vm481_vm0, %v1446_v24  ;;  %1383 = vmatprep.mubr.msk.bf16.mxu1 %vm481_vm0, %v1447_v25 }
  0x42   : > { %1352 = vmatmul.mubr.msk.bf16.gmra.mrb[16].mxu0 %vm481_vm0, %v1448_v26  ;;  %1384 = vmatmul.mubr.msk.bf16.gmra.mrb[16].mxu1 %vm481_vm0, %v1449_v27 }
  0x43   : > { %1355 = vmatprep.mubr.msk.bf16.mxu0 %vm481_vm0, %v1450_v28  ;;  %1387 = vmatprep.mubr.msk.bf16.mxu1 %vm481_vm0, %v1451_v29 }
  0x4a   : > { %1356 = vmatmul.mubr.msk.bf16.gmra.mrb[20].mxu0 %vm481_vm0, %v1452_v30  ;;  %1388 = vmatmul.mubr.msk.bf16.gmra.mrb[20].mxu1 %vm481_vm0, %v1453_v31 }
  0x4b   : > { %1359 = vmatprep.mubr.msk.bf16.mxu0 %vm481_vm0, %v1454_v32  ;;  %1391 = vmatprep.mubr.msk.bf16.mxu1 %vm481_vm0, %v1455_v33 }
  0x52   : > { %1360 = vmatmul.mubr.msk.bf16.gmra.mrb[24].mxu0 %vm481_vm0, %v1456_v34  ;;  %1392 = vmatmul.mubr.msk.bf16.gmra.mrb[24].mxu1 %vm481_vm0, %v1457_v35 }
  0x53   : > { %1363 = vmatprep.mubr.msk.bf16.mxu0 %vm481_vm0, %v1458_v36  ;;  %1395 = vmatprep.mubr.msk.bf16.mxu1 %vm481_vm0, %v1459_v37 }
  0x5a   : > { %1364 = vmatmul.mubr.msk.bf16.gmra.mrb[28].mxu0 %vm481_vm0, %v1460_v38  ;;  %1396 = vmatmul.mubr.msk.bf16.gmra.mrb[28].mxu1 %vm481_vm0, %v1461_v39 }
  0xf5   : > { %v1337_v41 = vpop.f32.mrb[0].mxu0  ;;  %v1369_v43 = vpop.f32.mrb[0].mxu1 }
  0xf6   : > { %v880_v44 = vmul.f32 %v1337_v41, %v1599_v40  ;;  %v912_v45 = vmul.f32 %v1369_v43, %v1599_v40  ;;  %v616_v46 = vpop.f32.mrb[1].mxu0  ;;  %v744_v47 = vpop.f32.mrb[1].mxu1 }
  0xf7   : > { %v878_v48 = vmul.f32 %v1599_v40, %v616_v46  ;;  %v910_v49 = vmul.f32 %v1599_v40, %v744_v47  ;;  %v1338_v50 = vpop.f32.mrb[2].mxu0  ;;  %v1370_v51 = vpop.f32.mrb[2].mxu1 }
  0xf8   : > { %v951_v52 = vadd.f32 %v1604_v42, %v880_v44  ;;  %v983_v53 = vadd.f32 %v1604_v42, %v912_v45  ;;  %v881_v54 = vmul.f32 %v1338_v50, %v1599_v40  ;;  %v913_v55 = vmul.f32 %v1370_v51, %v1599_v40  ;;  %v619_v56 = vpop.f32.mrb[3].mxu0  ;;  %v747_v57 = vpop.f32.mrb[3].mxu1 }
  0xf9   : > { %v949_v58 = vadd.f32 %v1604_v42, %v878_v48  ;;  %v981_v59 = vadd.f32 %v1604_v42, %v910_v49  ;;  %v879_v60 = vmul.f32 %v1599_v40, %v619_v56  ;;  %v911_v61 = vmul.f32 %v1599_v40, %v747_v57 }
  0xfa   : > { %v1015_v62 = vmax.f32 %v951_v52, 0.0  ;;  %v1047_v63 = vmax.f32 %v983_v53, 0.0  ;;  %v952_v0 = vadd.f32 %v1604_v42, %v881_v54  ;;  %v984_v1 = vadd.f32 %v1604_v42, %v913_v55 }
  0xfb   : > { %v1013_v2 = vmax.f32 %v949_v58, 0.0  ;;  %v1045_v3 = vmax.f32 %v981_v59, 0.0  ;;  %v950_v4 = vadd.f32 %v1604_v42, %v879_v60  ;;  %v982_v5 = vadd.f32 %v1604_v42, %v911_v61 }
  0xfc   : > { %1080 = vst.msk [vmem:[%s1618_s18 + $0x10] sm:$0xff] %vm1077_vm2, %v1015_v62  ;;  %1112 = vst.msk [vmem:[%s1618_s18 + $0x110] sm:$0xff] %vm1077_vm2, %v1047_v63  ;;  %v1016_v6 = vmax.f32 %v952_v0, 0.0  ;;  %v1048_v7 = vmax.f32 %v984_v1, 0.0 }
  0xfd   : > { %1078 = vst.msk [vmem:[%s1618_s18] sm:$0xff] %vm1077_vm2, %v1013_v2  ;;  %1110 = vst.msk [vmem:[%s1618_s18 + $0x100] sm:$0xff] %vm1077_vm2, %v1045_v3  ;;  %v1014_v8 = vmax.f32 %v950_v4, 0.0  ;;  %v1046_v9 = vmax.f32 %v982_v5, 0.0  ;;  %v1341_v10 = vpop.f32.mrb[4].mxu0  ;;  %v1373_v11 = vpop.f32.mrb[4].mxu1 }
  0xfe   : > { %1081 = vst.msk [vmem:[%s1618_s18 + $0x18] sm:$0xff] %vm1077_vm2, %v1016_v6  ;;  %1113 = vst.msk [vmem:[%s1618_s18 + $0x118] sm:$0xff] %vm1077_vm2, %v1048_v7  ;;  %v884_v12 = vmul.f32 %v1341_v10, %v1599_v40  ;;  %v916_v13 = vmul.f32 %v1373_v11, %v1599_v40  ;;  %v632_v14 = vpop.f32.mrb[5].mxu0  ;;  %v760_v15 = vpop.f32.mrb[5].mxu1 }
  0xff   : > { %1079 = vst.msk [vmem:[%s1618_s18 + $0x8] sm:$0xff] %vm1077_vm2, %v1014_v8  ;;  %1111 = vst.msk [vmem:[%s1618_s18 + $0x108] sm:$0xff] %vm1077_vm2, %v1046_v9  ;;  %v882_v16 = vmul.f32 %v1599_v40, %v632_v14  ;;  %v914_v17 = vmul.f32 %v1599_v40, %v760_v15  ;;  %v1342_v18 = vpop.f32.mrb[6].mxu0  ;;  %v1374_v19 = vpop.f32.mrb[6].mxu1 }
 0x100   : > { %v955_v20 = vadd.f32 %v1604_v42, %v884_v12  ;;  %v987_v21 = vadd.f32 %v1604_v42, %v916_v13  ;;  %v885_v22 = vmul.f32 %v1342_v18, %v1599_v40  ;;  %v917_v23 = vmul.f32 %v1374_v19, %v1599_v40  ;;  %v635_v24 = vpop.f32.mrb[7].mxu0  ;;  %v763_v25 = vpop.f32.mrb[7].mxu1 }
 0x101   : > { %v953_v26 = vadd.f32 %v1604_v42, %v882_v16  ;;  %v985_v27 = vadd.f32 %v1604_v42, %v914_v17  ;;  %v883_v28 = vmul.f32 %v1599_v40, %v635_v24  ;;  %v915_v29 = vmul.f32 %v1599_v40, %v763_v25 }
 0x102   : > { %v1019_v30 = vmax.f32 %v955_v20, 0.0  ;;  %v1051_v31 = vmax.f32 %v987_v21, 0.0  ;;  %v956_v32 = vadd.f32 %v1604_v42, %v885_v22  ;;  %v988_v33 = vadd.f32 %v1604_v42, %v917_v23 }
 0x103   : > { %v1017_v34 = vmax.f32 %v953_v26, 0.0  ;;  %v1049_v35 = vmax.f32 %v985_v27, 0.0  ;;  %v954_v36 = vadd.f32 %v1604_v42, %v883_v28  ;;  %v986_v37 = vadd.f32 %v1604_v42, %v915_v29 }
 0x104   : > { %1084 = vst.msk [vmem:[%s1618_s18 + $0x30] sm:$0xff] %vm1077_vm2, %v1019_v30  ;;  %1116 = vst.msk [vmem:[%s1618_s18 + $0x130] sm:$0xff] %vm1077_vm2, %v1051_v31  ;;  %v1020_v38 = vmax.f32 %v956_v32, 0.0  ;;  %v1052_v39 = vmax.f32 %v988_v33, 0.0 }
 0x105   : > { %1082 = vst.msk [vmem:[%s1618_s18 + $0x20] sm:$0xff] %vm1077_vm2, %v1017_v34  ;;  %1114 = vst.msk [vmem:[%s1618_s18 + $0x120] sm:$0xff] %vm1077_vm2, %v1049_v35  ;;  %v1018_v41 = vmax.f32 %v954_v36, 0.0  ;;  %v1050_v43 = vmax.f32 %v986_v37, 0.0  ;;  %v1345_v44 = vpop.f32.mrb[8].mxu0  ;;  %v1377_v45 = vpop.f32.mrb[8].mxu1 }
 0x106   : > { %1085 = vst.msk [vmem:[%s1618_s18 + $0x38] sm:$0xff] %vm1077_vm2, %v1020_v38  ;;  %1117 = vst.msk [vmem:[%s1618_s18 + $0x138] sm:$0xff] %vm1077_vm2, %v1052_v39  ;;  %v888_v46 = vmul.f32 %v1345_v44, %v1599_v40  ;;  %v920_v47 = vmul.f32 %v1377_v45, %v1599_v40  ;;  %v648_v48 = vpop.f32.mrb[9].mxu0  ;;  %v776_v49 = vpop.f32.mrb[9].mxu1 }
 0x107   : > { %1083 = vst.msk [vmem:[%s1618_s18 + $0x28] sm:$0xff] %vm1077_vm2, %v1018_v41  ;;  %1115 = vst.msk [vmem:[%s1618_s18 + $0x128] sm:$0xff] %vm1077_vm2, %v1050_v43  ;;  %v886_v50 = vmul.f32 %v1599_v40, %v648_v48  ;;  %v918_v51 = vmul.f32 %v1599_v40, %v776_v49  ;;  %v1346_v52 = vpop.f32.mrb[10].mxu0  ;;  %v1378_v53 = vpop.f32.mrb[10].mxu1 }
 0x108   : > { %v959_v54 = vadd.f32 %v1604_v42, %v888_v46  ;;  %v991_v55 = vadd.f32 %v1604_v42, %v920_v47  ;;  %v889_v56 = vmul.f32 %v1346_v52, %v1599_v40  ;;  %v921_v57 = vmul.f32 %v1378_v53, %v1599_v40  ;;  %v651_v58 = vpop.f32.mrb[11].mxu0  ;;  %v779_v59 = vpop.f32.mrb[11].mxu1 }
 0x109   : > { %v957_v60 = vadd.f32 %v1604_v42, %v886_v50  ;;  %v989_v61 = vadd.f32 %v1604_v42, %v918_v51  ;;  %v887_v62 = vmul.f32 %v1599_v40, %v651_v58  ;;  %v919_v63 = vmul.f32 %v1599_v40, %v779_v59 }
 0x10a   : > { %v1023_v0 = vmax.f32 %v959_v54, 0.0  ;;  %v1055_v1 = vmax.f32 %v991_v55, 0.0  ;;  %v960_v2 = vadd.f32 %v1604_v42, %v889_v56  ;;  %v992_v3 = vadd.f32 %v1604_v42, %v921_v57 }
 0x10b   : > { %v1021_v4 = vmax.f32 %v957_v60, 0.0  ;;  %v1053_v5 = vmax.f32 %v989_v61, 0.0  ;;  %v958_v6 = vadd.f32 %v1604_v42, %v887_v62  ;;  %v990_v7 = vadd.f32 %v1604_v42, %v919_v63 }
 0x10c   : > { %1088 = vst.msk [vmem:[%s1618_s18 + $0x50] sm:$0xff] %vm1077_vm2, %v1023_v0  ;;  %1120 = vst.msk [vmem:[%s1618_s18 + $0x150] sm:$0xff] %vm1077_vm2, %v1055_v1  ;;  %v1024_v8 = vmax.f32 %v960_v2, 0.0  ;;  %v1056_v9 = vmax.f32 %v992_v3, 0.0 }
 0x10d   : > { %1086 = vst.msk [vmem:[%s1618_s18 + $0x40] sm:$0xff] %vm1077_vm2, %v1021_v4  ;;  %1118 = vst.msk [vmem:[%s1618_s18 + $0x140] sm:$0xff] %vm1077_vm2, %v1053_v5  ;;  %v1022_v10 = vmax.f32 %v958_v6, 0.0  ;;  %v1054_v11 = vmax.f32 %v990_v7, 0.0  ;;  %v1349_v12 = vpop.f32.mrb[12].mxu0  ;;  %v1381_v13 = vpop.f32.mrb[12].mxu1 }
 0x10e   : > { %1089 = vst.msk [vmem:[%s1618_s18 + $0x58] sm:$0xff] %vm1077_vm2, %v1024_v8  ;;  %1121 = vst.msk [vmem:[%s1618_s18 + $0x158] sm:$0xff] %vm1077_vm2, %v1056_v9  ;;  %v892_v14 = vmul.f32 %v1349_v12, %v1599_v40  ;;  %v924_v15 = vmul.f32 %v1381_v13, %v1599_v40  ;;  %v664_v16 = vpop.f32.mrb[13].mxu0  ;;  %v792_v17 = vpop.f32.mrb[13].mxu1 }
 0x10f   : > { %1087 = vst.msk [vmem:[%s1618_s18 + $0x48] sm:$0xff] %vm1077_vm2, %v1022_v10  ;;  %1119 = vst.msk [vmem:[%s1618_s18 + $0x148] sm:$0xff] %vm1077_vm2, %v1054_v11  ;;  %v890_v18 = vmul.f32 %v1599_v40, %v664_v16  ;;  %v922_v19 = vmul.f32 %v1599_v40, %v792_v17  ;;  %v1350_v20 = vpop.f32.mrb[14].mxu0  ;;  %v1382_v21 = vpop.f32.mrb[14].mxu1 }
 0x110   : > { %v963_v22 = vadd.f32 %v1604_v42, %v892_v14  ;;  %v995_v23 = vadd.f32 %v1604_v42, %v924_v15  ;;  %v893_v24 = vmul.f32 %v1350_v20, %v1599_v40  ;;  %v925_v25 = vmul.f32 %v1382_v21, %v1599_v40  ;;  %v667_v26 = vpop.f32.mrb[15].mxu0  ;;  %v795_v27 = vpop.f32.mrb[15].mxu1 }
 0x111   : > { %v961_v28 = vadd.f32 %v1604_v42, %v890_v18  ;;  %v993_v29 = vadd.f32 %v1604_v42, %v922_v19  ;;  %v891_v30 = vmul.f32 %v1599_v40, %v667_v26  ;;  %v923_v31 = vmul.f32 %v1599_v40, %v795_v27 }
 0x112   : > { %v1027_v32 = vmax.f32 %v963_v22, 0.0  ;;  %v1059_v33 = vmax.f32 %v995_v23, 0.0  ;;  %v964_v34 = vadd.f32 %v1604_v42, %v893_v24  ;;  %v996_v35 = vadd.f32 %v1604_v42, %v925_v25 }
 0x113   : > { %v1025_v36 = vmax.f32 %v961_v28, 0.0  ;;  %v1057_v37 = vmax.f32 %v993_v29, 0.0  ;;  %v962_v38 = vadd.f32 %v1604_v42, %v891_v30  ;;  %v994_v39 = vadd.f32 %v1604_v42, %v923_v31 }
 0x114   : > { %1092 = vst.msk [vmem:[%s1618_s18 + $0x70] sm:$0xff] %vm1077_vm2, %v1027_v32  ;;  %1124 = vst.msk [vmem:[%s1618_s18 + $0x170] sm:$0xff] %vm1077_vm2, %v1059_v33  ;;  %v1028_v41 = vmax.f32 %v964_v34, 0.0  ;;  %v1060_v43 = vmax.f32 %v996_v35, 0.0 }
 0x115   : > { %1090 = vst.msk [vmem:[%s1618_s18 + $0x60] sm:$0xff] %vm1077_vm2, %v1025_v36  ;;  %1122 = vst.msk [vmem:[%s1618_s18 + $0x160] sm:$0xff] %vm1077_vm2, %v1057_v37  ;;  %v1026_v44 = vmax.f32 %v962_v38, 0.0  ;;  %v1058_v45 = vmax.f32 %v994_v39, 0.0  ;;  %v1353_v46 = vpop.f32.mrb[16].mxu0  ;;  %v1385_v47 = vpop.f32.mrb[16].mxu1 }
 0x116   : > { %1093 = vst.msk [vmem:[%s1618_s18 + $0x78] sm:$0xff] %vm1077_vm2, %v1028_v41  ;;  %1125 = vst.msk [vmem:[%s1618_s18 + $0x178] sm:$0xff] %vm1077_vm2, %v1060_v43  ;;  %v896_v48 = vmul.f32 %v1353_v46, %v1599_v40  ;;  %v928_v49 = vmul.f32 %v1385_v47, %v1599_v40  ;;  %v680_v50 = vpop.f32.mrb[17].mxu0  ;;  %v808_v51 = vpop.f32.mrb[17].mxu1 }
 0x117   : > { %1091 = vst.msk [vmem:[%s1618_s18 + $0x68] sm:$0xff] %vm1077_vm2, %v1026_v44  ;;  %1123 = vst.msk [vmem:[%s1618_s18 + $0x168] sm:$0xff] %vm1077_vm2, %v1058_v45  ;;  %v894_v52 = vmul.f32 %v1599_v40, %v680_v50  ;;  %v926_v53 = vmul.f32 %v1599_v40, %v808_v51  ;;  %v1354_v54 = vpop.f32.mrb[18].mxu0  ;;  %v1386_v55 = vpop.f32.mrb[18].mxu1 }
 0x118   : > { %v967_v56 = vadd.f32 %v1604_v42, %v896_v48  ;;  %v999_v57 = vadd.f32 %v1604_v42, %v928_v49  ;;  %v897_v58 = vmul.f32 %v1354_v54, %v1599_v40  ;;  %v929_v59 = vmul.f32 %v1386_v55, %v1599_v40  ;;  %v683_v60 = vpop.f32.mrb[19].mxu0  ;;  %v811_v61 = vpop.f32.mrb[19].mxu1 }
 0x119   : > { %v965_v62 = vadd.f32 %v1604_v42, %v894_v52  ;;  %v997_v63 = vadd.f32 %v1604_v42, %v926_v53  ;;  %v895_v0 = vmul.f32 %v1599_v40, %v683_v60  ;;  %v927_v1 = vmul.f32 %v1599_v40, %v811_v61 }
 0x11a   : > { %v1031_v2 = vmax.f32 %v967_v56, 0.0  ;;  %v1063_v3 = vmax.f32 %v999_v57, 0.0  ;;  %v968_v4 = vadd.f32 %v1604_v42, %v897_v58  ;;  %v1000_v5 = vadd.f32 %v1604_v42, %v929_v59 }
 0x11b   : > { %v1029_v6 = vmax.f32 %v965_v62, 0.0  ;;  %v1061_v7 = vmax.f32 %v997_v63, 0.0  ;;  %v966_v8 = vadd.f32 %v1604_v42, %v895_v0  ;;  %v998_v9 = vadd.f32 %v1604_v42, %v927_v1 }
 0x11c   : > { %1096 = vst.msk [vmem:[%s1618_s18 + $0x90] sm:$0xff] %vm1077_vm2, %v1031_v2  ;;  %1128 = vst.msk [vmem:[%s1618_s18 + $0x190] sm:$0xff] %vm1077_vm2, %v1063_v3  ;;  %v1032_v10 = vmax.f32 %v968_v4, 0.0  ;;  %v1064_v11 = vmax.f32 %v1000_v5, 0.0 }
 0x11d   : > { %1094 = vst.msk [vmem:[%s1618_s18 + $0x80] sm:$0xff] %vm1077_vm2, %v1029_v6  ;;  %1126 = vst.msk [vmem:[%s1618_s18 + $0x180] sm:$0xff] %vm1077_vm2, %v1061_v7  ;;  %v1030_v12 = vmax.f32 %v966_v8, 0.0  ;;  %v1062_v13 = vmax.f32 %v998_v9, 0.0  ;;  %v1357_v14 = vpop.f32.mrb[20].mxu0  ;;  %v1389_v15 = vpop.f32.mrb[20].mxu1 }
 0x11e   : > { %1097 = vst.msk [vmem:[%s1618_s18 + $0x98] sm:$0xff] %vm1077_vm2, %v1032_v10  ;;  %1129 = vst.msk [vmem:[%s1618_s18 + $0x198] sm:$0xff] %vm1077_vm2, %v1064_v11  ;;  %v900_v16 = vmul.f32 %v1357_v14, %v1599_v40  ;;  %v932_v17 = vmul.f32 %v1389_v15, %v1599_v40  ;;  %v696_v18 = vpop.f32.mrb[21].mxu0  ;;  %v824_v19 = vpop.f32.mrb[21].mxu1 }
 0x11f   : > { %1095 = vst.msk [vmem:[%s1618_s18 + $0x88] sm:$0xff] %vm1077_vm2, %v1030_v12  ;;  %1127 = vst.msk [vmem:[%s1618_s18 + $0x188] sm:$0xff] %vm1077_vm2, %v1062_v13  ;;  %v898_v20 = vmul.f32 %v1599_v40, %v696_v18  ;;  %v930_v21 = vmul.f32 %v1599_v40, %v824_v19  ;;  %v1358_v22 = vpop.f32.mrb[22].mxu0  ;;  %v1390_v23 = vpop.f32.mrb[22].mxu1 }
 0x120   : > { %v971_v24 = vadd.f32 %v1604_v42, %v900_v16  ;;  %v1003_v25 = vadd.f32 %v1604_v42, %v932_v17  ;;  %v901_v26 = vmul.f32 %v1358_v22, %v1599_v40  ;;  %v933_v27 = vmul.f32 %v1390_v23, %v1599_v40  ;;  %v699_v28 = vpop.f32.mrb[23].mxu0  ;;  %v827_v29 = vpop.f32.mrb[23].mxu1 }
 0x121   : > { %v969_v30 = vadd.f32 %v1604_v42, %v898_v20  ;;  %v1001_v31 = vadd.f32 %v1604_v42, %v930_v21  ;;  %v899_v32 = vmul.f32 %v1599_v40, %v699_v28  ;;  %v931_v33 = vmul.f32 %v1599_v40, %v827_v29 }
 0x122   : > { %v1035_v34 = vmax.f32 %v971_v24, 0.0  ;;  %v1067_v35 = vmax.f32 %v1003_v25, 0.0  ;;  %v972_v36 = vadd.f32 %v1604_v42, %v901_v26  ;;  %v1004_v37 = vadd.f32 %v1604_v42, %v933_v27 }
 0x123   : > { %v1033_v38 = vmax.f32 %v969_v30, 0.0  ;;  %v1065_v39 = vmax.f32 %v1001_v31, 0.0  ;;  %v970_v41 = vadd.f32 %v1604_v42, %v899_v32  ;;  %v1002_v43 = vadd.f32 %v1604_v42, %v931_v33 }
 0x124   : > { %1100 = vst.msk [vmem:[%s1618_s18 + $0xb0] sm:$0xff] %vm1077_vm2, %v1035_v34  ;;  %1132 = vst.msk [vmem:[%s1618_s18 + $0x1b0] sm:$0xff] %vm1077_vm2, %v1067_v35  ;;  %v1036_v44 = vmax.f32 %v972_v36, 0.0  ;;  %v1068_v45 = vmax.f32 %v1004_v37, 0.0 }
 0x125   : > { %1098 = vst.msk [vmem:[%s1618_s18 + $0xa0] sm:$0xff] %vm1077_vm2, %v1033_v38  ;;  %1130 = vst.msk [vmem:[%s1618_s18 + $0x1a0] sm:$0xff] %vm1077_vm2, %v1065_v39  ;;  %v1034_v46 = vmax.f32 %v970_v41, 0.0  ;;  %v1066_v47 = vmax.f32 %v1002_v43, 0.0  ;;  %v1361_v48 = vpop.f32.mrb[24].mxu0  ;;  %v1393_v49 = vpop.f32.mrb[24].mxu1 }
 0x126   : > { %1101 = vst.msk [vmem:[%s1618_s18 + $0xb8] sm:$0xff] %vm1077_vm2, %v1036_v44  ;;  %1133 = vst.msk [vmem:[%s1618_s18 + $0x1b8] sm:$0xff] %vm1077_vm2, %v1068_v45  ;;  %v904_v50 = vmul.f32 %v1361_v48, %v1599_v40  ;;  %v936_v51 = vmul.f32 %v1393_v49, %v1599_v40  ;;  %v712_v52 = vpop.f32.mrb[25].mxu0  ;;  %v840_v53 = vpop.f32.mrb[25].mxu1 }
 0x127   : > { %1099 = vst.msk [vmem:[%s1618_s18 + $0xa8] sm:$0xff] %vm1077_vm2, %v1034_v46  ;;  %1131 = vst.msk [vmem:[%s1618_s18 + $0x1a8] sm:$0xff] %vm1077_vm2, %v1066_v47  ;;  %v902_v54 = vmul.f32 %v1599_v40, %v712_v52  ;;  %v934_v55 = vmul.f32 %v1599_v40, %v840_v53  ;;  %v1362_v56 = vpop.f32.mrb[26].mxu0  ;;  %v1394_v57 = vpop.f32.mrb[26].mxu1 }
 0x128   : > { %v975_v58 = vadd.f32 %v1604_v42, %v904_v50  ;;  %v1007_v59 = vadd.f32 %v1604_v42, %v936_v51  ;;  %v905_v60 = vmul.f32 %v1362_v56, %v1599_v40  ;;  %v937_v61 = vmul.f32 %v1394_v57, %v1599_v40  ;;  %v715_v62 = vpop.f32.mrb[27].mxu0  ;;  %v843_v63 = vpop.f32.mrb[27].mxu1 }
 0x129   : > { %v973_v0 = vadd.f32 %v1604_v42, %v902_v54  ;;  %v1005_v1 = vadd.f32 %v1604_v42, %v934_v55  ;;  %v903_v2 = vmul.f32 %v1599_v40, %v715_v62  ;;  %v935_v3 = vmul.f32 %v1599_v40, %v843_v63 }
 0x12a   : > { %v1039_v4 = vmax.f32 %v975_v58, 0.0  ;;  %v1071_v5 = vmax.f32 %v1007_v59, 0.0  ;;  %v976_v6 = vadd.f32 %v1604_v42, %v905_v60  ;;  %v1008_v7 = vadd.f32 %v1604_v42, %v937_v61 }
 0x12b   : > { %v1037_v8 = vmax.f32 %v973_v0, 0.0  ;;  %v1069_v9 = vmax.f32 %v1005_v1, 0.0  ;;  %v974_v10 = vadd.f32 %v1604_v42, %v903_v2  ;;  %v1006_v11 = vadd.f32 %v1604_v42, %v935_v3 }
 0x12c   : > { %1104 = vst.msk [vmem:[%s1618_s18 + $0xd0] sm:$0xff] %vm1077_vm2, %v1039_v4  ;;  %1136 = vst.msk [vmem:[%s1618_s18 + $0x1d0] sm:$0xff] %vm1077_vm2, %v1071_v5  ;;  %v1040_v12 = vmax.f32 %v976_v6, 0.0  ;;  %v1072_v13 = vmax.f32 %v1008_v7, 0.0 }
 0x12d   : > { %1102 = vst.msk [vmem:[%s1618_s18 + $0xc0] sm:$0xff] %vm1077_vm2, %v1037_v8  ;;  %1134 = vst.msk [vmem:[%s1618_s18 + $0x1c0] sm:$0xff] %vm1077_vm2, %v1069_v9  ;;  %v1038_v14 = vmax.f32 %v974_v10, 0.0  ;;  %v1070_v15 = vmax.f32 %v1006_v11, 0.0  ;;  %v1365_v16 = vpop.f32.mrb[28].mxu0  ;;  %v1397_v17 = vpop.f32.mrb[28].mxu1 }
 0x12e   : > { %1105 = vst.msk [vmem:[%s1618_s18 + $0xd8] sm:$0xff] %vm1077_vm2, %v1040_v12  ;;  %1137 = vst.msk [vmem:[%s1618_s18 + $0x1d8] sm:$0xff] %vm1077_vm2, %v1072_v13  ;;  %v908_v18 = vmul.f32 %v1365_v16, %v1599_v40  ;;  %v940_v19 = vmul.f32 %v1397_v17, %v1599_v40  ;;  %v728_v20 = vpop.f32.mrb[29].mxu0  ;;  %v856_v21 = vpop.f32.mrb[29].mxu1 }
 0x12f   : > { %1103 = vst.msk [vmem:[%s1618_s18 + $0xc8] sm:$0xff] %vm1077_vm2, %v1038_v14  ;;  %1135 = vst.msk [vmem:[%s1618_s18 + $0x1c8] sm:$0xff] %vm1077_vm2, %v1070_v15  ;;  %v906_v22 = vmul.f32 %v1599_v40, %v728_v20  ;;  %v938_v23 = vmul.f32 %v1599_v40, %v856_v21  ;;  %v1366_v24 = vpop.f32.mrb[30].mxu0  ;;  %v1398_v25 = vpop.f32.mrb[30].mxu1 }
 0x130   : > { %v979_v26 = vadd.f32 %v1604_v42, %v908_v18  ;;  %v1011_v27 = vadd.f32 %v1604_v42, %v940_v19  ;;  %v909_v28 = vmul.f32 %v1366_v24, %v1599_v40  ;;  %v941_v29 = vmul.f32 %v1398_v25, %v1599_v40  ;;  %v731_v30 = vpop.f32.mrb[31].mxu0  ;;  %v859_v31 = vpop.f32.mrb[31].mxu1 }
 0x131   : > { %v977_v32 = vadd.f32 %v1604_v42, %v906_v22  ;;  %v1009_v33 = vadd.f32 %v1604_v42, %v938_v23  ;;  %v907_v34 = vmul.f32 %v1599_v40, %v731_v30  ;;  %v939_v35 = vmul.f32 %v1599_v40, %v859_v31 }
 0x132   : > { %v1043_v36 = vmax.f32 %v979_v26, 0.0  ;;  %v1075_v37 = vmax.f32 %v1011_v27, 0.0  ;;  %v980_v38 = vadd.f32 %v1604_v42, %v909_v28  ;;  %v1012_v39 = vadd.f32 %v1604_v42, %v941_v29 }
 0x133   : > { %v1041_v41 = vmax.f32 %v977_v32, 0.0  ;;  %v1073_v43 = vmax.f32 %v1009_v33, 0.0  ;;  %v978_v44 = vadd.f32 %v1604_v42, %v907_v34  ;;  %v1010_v45 = vadd.f32 %v1604_v42, %v939_v35 }
 0x134   : > { %1108 = vst.msk [vmem:[%s1618_s18 + $0xf0] sm:$0xff] %vm1077_vm2, %v1043_v36  ;;  %1140 = vst.msk [vmem:[%s1618_s18 + $0x1f0] sm:$0xff] %vm1077_vm2, %v1075_v37  ;;  %v1044_v40 = vmax.f32 %v980_v38, 0.0  ;;  %v1076_v46 = vmax.f32 %v1012_v39, 0.0 }
 0x135   : > { %1106 = vst.msk [vmem:[%s1618_s18 + $0xe0] sm:$0xff] %vm1077_vm2, %v1041_v41  ;;  %1138 = vst.msk [vmem:[%s1618_s18 + $0x1e0] sm:$0xff] %vm1077_vm2, %v1073_v43  ;;  %v1042_v47 = vmax.f32 %v978_v44, 0.0  ;;  %v1074_v48 = vmax.f32 %v1010_v45, 0.0 }
 0x136   : > { %1109 = vst.msk [vmem:[%s1618_s18 + $0xf8] sm:$0xff] %vm1077_vm2, %v1044_v40  ;;  %1141 = vst.msk [vmem:[%s1618_s18 + $0x1f8] sm:$0xff] %vm1077_vm2, %v1076_v46 }
 0x137   : > { %1107 = vst.msk [vmem:[%s1618_s18 + $0xe8] sm:$0xff] %vm1077_vm2, %v1042_v47  ;;  %1139 = vst.msk [vmem:[%s1618_s18 + $0x1e8] sm:$0xff] %vm1077_vm2, %v1074_v48 }
 0x138 PF: > { %s14_s15 = sadd.s32 1, %s1468_s15  }
 0x139   : > { %p11_p4 = scmp.ge.s32.totalorder %s14_s15, 4  }
 0x13b   :  { %13 = sbr.rel (!%p11_p4) target bundleno = 1 (0x1), region = 66 }

// kernel: interactive_hnn_forward.11
= control target key start
LH: loop header
LB: loop body
LE: loop exit
PB: predicated region body
PF: predicated region fallthrough
CT: control target
= control target key end

     0   :  { %s1889_s21 = smov 0   ;;  %s2496_s0 = inlined_call_operand.vmem [shape: bf16[1024,108], index: 0, kind: input, shape index: {}]   ;;  %s2497_s1 = inlined_call_operand.vmem [shape: bf16[108,4], index: 1, kind: input, shape index: {}]   ;;  %s2498_s2 = inlined_call_operand.vmem [shape: f32[1,4], index: 2, kind: input, shape index: {}]   ;;  %s2499_s3 = inlined_call_operand.vmem [shape: f32[1,4], index: 3, kind: input, shape index: {}]   ;;  %s2500_s4 = inlined_call_operand.vmem [shape: f32[1024,4], index: 4, kind: input, shape index: {}]   ;;  %s2501_s5 = inlined_call_operand.vmem [shape: f32[1024,4], index: 5, kind: input, shape index: {}]   ;;  %s2502_s6 = inlined_call_operand.vmem [shape: f32[1024,4], index: 6, kind: output, shape index: {}]  }
   0x1 LB: > { %s1576_s22 = sadd.s32 4294967295, %s1852_s21   ;;  %p1580_p0 = scmp.ge.s32.totalorder %s1852_s21, 1  ;;  %s1852_s21 = sphi %s1889_s21, %s16_s21  }
   0x2   : > { %p235_p1 = scmp.lt.s32.totalorder %s1852_s21, 3 }
   0x4   : > { %p236_p2 = pnand %p1580_p0, %p235_p1 }
   0x5   : > { %v1805_v0 = vld [vmem:[%s2497_s1] sm:$0xff] (!%p236_p2)   ;;  %v1806_v1 = vld [vmem:[%s2497_s1 + $0x8] sm:$0xff] (!%p236_p2)   ;;  %s1581_s27 = sshll.u32 (!%p236_p2), %s1576_s22, 6  ;;  %v1807_v2 = vld [vmem:[%s2497_s1 + $0x10] sm:$0xff] (!%p236_p2)   ;;  %vm579_vm0 = vcmask (!%p236_p2), 883712   ;;  %vm676_vm1 = vcmask (!%p236_p2), 1045504  }
   0x6   : > { %239 = sbr.rel (%p236_p2) target bundleno = 337 (0x151), region = 44  ;;  %1703 = vmatprep.subr.bf16.mxu0 (!%p236_p2), %v1805_v0  ;;  %1781 = vmatprep.subr.bf16.mxu1 (!%p236_p2), %v1805_v0  ;;  %p276_p3 = scmp.lt.s32.totalorder (!%p236_p2), %s1581_s27, 127  ;;  %v1808_v3 = vld [vmem:[%s2497_s1 + $0x18] sm:$0xff] (!%p236_p2)   ;;  %v1809_v6 = vld [vmem:[%s2497_s1 + $0x20] sm:$0xff] (!%p236_p2)   ;;  %v1810_v7 = vld [vmem:[%s2497_s1 + $0x28] sm:$0xff] (!%p236_p2)   ;;  %vm1431_vm2 = vcmask (!%p236_p2), 31744  }
   0x7   : > { %1704 = vmatpush3.bf16.msra.mxu0 (!%p236_p2), %v1805_v0  ;;  %1788 = vmatpush3.bf16.msra.mxu1 (!%p236_p2), %v1805_v0  ;;  %v1811_v8 = vld [vmem:[%s2497_s1 + $0x30] sm:$0x3f] (!%p236_p2)   ;;  %v1996_v40 = vld [vmem:[%s2498_s2] ss:$0 sm:$0xff] (!%p236_p2) }
   0x8   : > { %1705 = vmatprep.subr.bf16.mxu0 (!%p236_p2), %v1806_v1  ;;  %1782 = vmatprep.subr.bf16.mxu1 (!%p236_p2), %v1806_v1  ;;  %v678_v9 = vsel (!%p236_p2), %vm676_vm1, %v1811_v8, 0  ;;  %v2007_v42 = vld [vmem:[%s2499_s3] ss:$0 sm:$0xff] (!%p236_p2) }
   0xb   : > { %1706 = vmatpush3.bf16.msra.mxu0 (!%p236_p2), %v1806_v1  ;;  %1789 = vmatpush3.bf16.msra.mxu1 (!%p236_p2), %v1806_v1 }
   0xc   : > { %1707 = vmatprep.subr.bf16.mxu0 (!%p236_p2), %v1807_v2  ;;  %1783 = vmatprep.subr.bf16.mxu1 (!%p236_p2), %v1807_v2 }
   0xd   : > { %s2504_s27 = smov (!%p276_p3, %s1581_s27), 127 }
   0xe   : > { %s1582_s30 = sshll.u32 %s2504_s27, 2  ;;  %s1991_s18 = sshll.u32 %s2504_s27, 3 }
   0xf   : > { %s1915_s11 = scalar_lea.vmem %s2496_s0, %s1582_s30  ;;  %1708 = vmatpush3.bf16.msra.mxu0 %v1807_v2  ;;  %1790 = vmatpush3.bf16.msra.mxu1 %v1807_v2  ;;  %s2002_s24 = scalar_lea.vmem %s2500_s4, %s1991_s18 }
  0x10   : > { %v1812_v4 = vld [vmem:[%s1915_s11] sm:$0xff]   ;;  %1709 = vmatprep.subr.bf16.mxu0 %v1808_v3  ;;  %1784 = vmatprep.subr.bf16.mxu1 %v1808_v3  ;;  %v1814_v10 = vld [vmem:[%s1915_s11 + $0x8] sm:$0xff]   ;;  %v1816_v12 = vld [vmem:[%s1915_s11 + $0x10] sm:$0xff]   ;;  %s2019_s29 = scalar_lea.vmem %s2501_s5, %s1991_s18  ;;  %s2047_s8 = scalar_lea.vmem %s2502_s6, %s1991_s18 }
  0x11   : > { %v1813_v5 = vld [vmem:[%s1915_s11 + $0x80] sm:$0xff]   ;;  %1717 = vmatprep.mubr.msk.bf16.mxu0 %vm579_vm0, %v1812_v4  ;;  %v1815_v11 = vld [vmem:[%s1915_s11 + $0x88] sm:$0xff]   ;;  %v1817_v13 = vld [vmem:[%s1915_s11 + $0x90] sm:$0xff]  }
  0x12   : > { %1749 = vmatprep.mubr.msk.bf16.mxu1 %vm579_vm0, %v1813_v5  ;;  %v1818_v14 = vld [vmem:[%s1915_s11 + $0x18] sm:$0xff]   ;;  %v1820_v16 = vld [vmem:[%s1915_s11 + $0x20] sm:$0xff]   ;;  %v1822_v18 = vld [vmem:[%s1915_s11 + $0x28] sm:$0xff]  }
  0x13   : > { %1710 = vmatpush3.bf16.msra.mxu0 %v1808_v3  ;;  %1791 = vmatpush3.bf16.msra.mxu1 %v1808_v3  ;;  %v1819_v15 = vld [vmem:[%s1915_s11 + $0x98] sm:$0xff]   ;;  %v1821_v17 = vld [vmem:[%s1915_s11 + $0xa0] sm:$0xff]   ;;  %v1823_v19 = vld [vmem:[%s1915_s11 + $0xa8] sm:$0xff]  }
  0x14   : > { %1711 = vmatprep.subr.bf16.mxu0 %v1809_v6  ;;  %1785 = vmatprep.subr.bf16.mxu1 %v1809_v6  ;;  %v1824_v20 = vld [vmem:[%s1915_s11 + $0x30] sm:$0xff]   ;;  %v1826_v22 = vld [vmem:[%s1915_s11 + $0x38] sm:$0xff]   ;;  %v1828_v24 = vld [vmem:[%s1915_s11 + $0x40] sm:$0xff]  }
  0x15   : > { %v1825_v21 = vld [vmem:[%s1915_s11 + $0xb0] sm:$0xff]   ;;  %v1827_v23 = vld [vmem:[%s1915_s11 + $0xb8] sm:$0xff]   ;;  %v1829_v25 = vld [vmem:[%s1915_s11 + $0xc0] sm:$0xff]  }
  0x16   : > { %v1830_v26 = vld [vmem:[%s1915_s11 + $0x48] sm:$0xff]   ;;  %v1832_v28 = vld [vmem:[%s1915_s11 + $0x50] sm:$0xff]   ;;  %v1834_v30 = vld [vmem:[%s1915_s11 + $0x58] sm:$0xff]  }
  0x17   : > { %1712 = vmatpush3.bf16.msra.mxu0 %v1809_v6  ;;  %1792 = vmatpush3.bf16.msra.mxu1 %v1809_v6  ;;  %v1831_v27 = vld [vmem:[%s1915_s11 + $0xc8] sm:$0xff]   ;;  %v1833_v29 = vld [vmem:[%s1915_s11 + $0xd0] sm:$0xff]   ;;  %v1835_v31 = vld [vmem:[%s1915_s11 + $0xd8] sm:$0xff]  }
  0x18   : > { %1713 = vmatprep.subr.bf16.mxu0 %v1810_v7  ;;  %1786 = vmatprep.subr.bf16.mxu1 %v1810_v7  ;;  %v1836_v32 = vld [vmem:[%s1915_s11 + $0x60] sm:$0xff]   ;;  %v1838_v34 = vld [vmem:[%s1915_s11 + $0x68] sm:$0xff]   ;;  %v1840_v36 = vld [vmem:[%s1915_s11 + $0x70] sm:$0xff]  }
  0x19   : > { %v1837_v33 = vld [vmem:[%s1915_s11 + $0xe0] sm:$0xff]   ;;  %v1839_v35 = vld [vmem:[%s1915_s11 + $0xe8] sm:$0xff]   ;;  %v1841_v37 = vld [vmem:[%s1915_s11 + $0xf0] sm:$0xff]  }
  0x1a   : > { %v1842_v38 = vld [vmem:[%s1915_s11 + $0x78] sm:$0xff]   ;;  %v1113_v48 = vld [vmem:[%s2002_s24 + $0x10] sm:$0xff]  ;;  %v1111_v56 = vld [vmem:[%s2002_s24] sm:$0xff] }
  0x1b   : > { %1714 = vmatpush3.bf16.msra.mxu0 %v1810_v7  ;;  %1793 = vmatpush3.bf16.msra.mxu1 %v1810_v7  ;;  %v1843_v39 = vld [vmem:[%s1915_s11 + $0xf8] sm:$0xff]   ;;  %v1145_v49 = vld [vmem:[%s2002_s24 + $0x110] sm:$0xff]  ;;  %v1143_v57 = vld [vmem:[%s2002_s24 + $0x100] sm:$0xff] }
  0x1c   : > { %1795 = vmatprep.subr.msk.bf16.mxu0 %vm676_vm1, %v1811_v8  ;;  %1796 = vmatprep.subr.msk.bf16.mxu1 %vm676_vm1, %v1811_v8  ;;  %v1114_v0 = vld [vmem:[%s2002_s24 + $0x18] sm:$0xff]  ;;  %v1112_v8 = vld [vmem:[%s2002_s24 + $0x8] sm:$0xff] }
  0x1d   : > { %v1146_v1 = vld [vmem:[%s2002_s24 + $0x118] sm:$0xff] }
  0x1f   : > { %1716 = vmatpush3.bf16.msra.mxu0 %v678_v9  ;;  %1794 = vmatpush3.bf16.msra.mxu1 %v678_v9  ;;  %v1144_v9 = vld [vmem:[%s2002_s24 + $0x108] sm:$0xff] }
  0x22   : > { %1718 = vmatmul.mubr.msk.bf16.vlgmr.msra.gmra.mrb[0].mxu0 %vm579_vm0, %v1814_v10  ;;  %1750 = vmatmul.mubr.msk.bf16.vlgmr.msra.gmra.mrb[0].mxu1 %vm579_vm0, %v1815_v11  ;;  %v1305_v10 = vld [vmem:[%s2019_s29 + $0x10] sm:$0xff] }
  0x23   : > { %1721 = vmatprep.mubr.msk.bf16.mxu0 %vm579_vm0, %v1816_v12  ;;  %1753 = vmatprep.mubr.msk.bf16.mxu1 %vm579_vm0, %v1817_v13  ;;  %v1337_v11 = vld [vmem:[%s2019_s29 + $0x110] sm:$0xff] }
  0x2a   : > { %1722 = vmatmul.mubr.msk.bf16.gmra.mrb[4].mxu0 %vm579_vm0, %v1818_v14  ;;  %1754 = vmatmul.mubr.msk.bf16.gmra.mrb[4].mxu1 %vm579_vm0, %v1819_v15 }
  0x2b   : > { %1725 = vmatprep.mubr.msk.bf16.mxu0 %vm579_vm0, %v1820_v16  ;;  %1757 = vmatprep.mubr.msk.bf16.mxu1 %vm579_vm0, %v1821_v17 }
  0x32   : > { %1726 = vmatmul.mubr.msk.bf16.gmra.mrb[8].mxu0 %vm579_vm0, %v1822_v18  ;;  %1758 = vmatmul.mubr.msk.bf16.gmra.mrb[8].mxu1 %vm579_vm0, %v1823_v19  ;;  %v1303_v18 = vld [vmem:[%s2019_s29] sm:$0xff] }
  0x33   : > { %1729 = vmatprep.mubr.msk.bf16.mxu0 %vm579_vm0, %v1824_v20  ;;  %1761 = vmatprep.mubr.msk.bf16.mxu1 %vm579_vm0, %v1825_v21  ;;  %v1335_v19 = vld [vmem:[%s2019_s29 + $0x100] sm:$0xff] }
  0x3a   : > { %1730 = vmatmul.mubr.msk.bf16.gmra.mrb[12].mxu0 %vm579_vm0, %v1826_v22  ;;  %1762 = vmatmul.mubr.msk.bf16.gmra.mrb[12].mxu1 %vm579_vm0, %v1827_v23 }
  0x3b   : > { %1733 = vmatprep.mubr.msk.bf16.mxu0 %vm579_vm0, %v1828_v24  ;;  %1765 = vmatprep.mubr.msk.bf16.mxu1 %vm579_vm0, %v1829_v25  ;;  %v1306_v24 = vld [vmem:[%s2019_s29 + $0x18] sm:$0xff] }
  0x3c   : > { %v1338_v25 = vld [vmem:[%s2019_s29 + $0x118] sm:$0xff] }
  0x42   : > { %1734 = vmatmul.mubr.msk.bf16.gmra.mrb[16].mxu0 %vm579_vm0, %v1830_v26  ;;  %1766 = vmatmul.mubr.msk.bf16.gmra.mrb[16].mxu1 %vm579_vm0, %v1831_v27 }
  0x43   : > { %1737 = vmatprep.mubr.msk.bf16.mxu0 %vm579_vm0, %v1832_v28  ;;  %1769 = vmatprep.mubr.msk.bf16.mxu1 %vm579_vm0, %v1833_v29 }
  0x4a   : > { %1738 = vmatmul.mubr.msk.bf16.gmra.mrb[20].mxu0 %vm579_vm0, %v1834_v30  ;;  %1770 = vmatmul.mubr.msk.bf16.gmra.mrb[20].mxu1 %vm579_vm0, %v1835_v31 }
  0x4b   : > { %1741 = vmatprep.mubr.msk.bf16.mxu0 %vm579_vm0, %v1836_v32  ;;  %1773 = vmatprep.mubr.msk.bf16.mxu1 %vm579_vm0, %v1837_v33 }
  0x52   : > { %1742 = vmatmul.mubr.msk.bf16.gmra.mrb[24].mxu0 %vm579_vm0, %v1838_v34  ;;  %1774 = vmatmul.mubr.msk.bf16.gmra.mrb[24].mxu1 %vm579_vm0, %v1839_v35  ;;  %v1304_v34 = vld [vmem:[%s2019_s29 + $0x8] sm:$0xff] }
  0x53   : > { %1745 = vmatprep.mubr.msk.bf16.mxu0 %vm579_vm0, %v1840_v36  ;;  %1777 = vmatprep.mubr.msk.bf16.mxu1 %vm579_vm0, %v1841_v37  ;;  %v1336_v35 = vld [vmem:[%s2019_s29 + $0x108] sm:$0xff] }
  0x5a   : > { %1746 = vmatmul.mubr.msk.bf16.gmra.mrb[28].mxu0 %vm579_vm0, %v1842_v38  ;;  %1778 = vmatmul.mubr.msk.bf16.gmra.mrb[28].mxu1 %vm579_vm0, %v1843_v39 }
  0xf5   : > { %v1719_v41 = vpop.f32.mrb[0].mxu0  ;;  %v1751_v43 = vpop.f32.mrb[0].mxu1 }
  0xf6   : > { %v978_v44 = vmul.f32 %v1719_v41, %v1996_v40  ;;  %v1010_v45 = vmul.f32 %v1751_v43, %v1996_v40  ;;  %v714_v46 = vpop.f32.mrb[1].mxu0  ;;  %v842_v47 = vpop.f32.mrb[1].mxu1 }
  0xf7   : > { %v976_v50 = vmul.f32 %v1996_v40, %v714_v46  ;;  %v1008_v51 = vmul.f32 %v1996_v40, %v842_v47  ;;  %v1720_v52 = vpop.f32.mrb[2].mxu0  ;;  %v1752_v53 = vpop.f32.mrb[2].mxu1 }
  0xf8   : > { %v1049_v54 = vadd.f32 %v2007_v42, %v978_v44  ;;  %v1081_v55 = vadd.f32 %v2007_v42, %v1010_v45  ;;  %v979_v58 = vmul.f32 %v1720_v52, %v1996_v40  ;;  %v1011_v59 = vmul.f32 %v1752_v53, %v1996_v40  ;;  %v717_v60 = vpop.f32.mrb[3].mxu0  ;;  %v845_v61 = vpop.f32.mrb[3].mxu1 }
  0xf9   : > { %v1047_v62 = vadd.f32 %v2007_v42, %v976_v50  ;;  %v1079_v63 = vadd.f32 %v2007_v42, %v1008_v51  ;;  %v977_v2 = vmul.f32 %v1996_v40, %v717_v60  ;;  %v1009_v3 = vmul.f32 %v1996_v40, %v845_v61  ;;  %v1115_v60 = vld [vmem:[%s2002_s24 + $0x20] sm:$0xff] }
  0xfa   : > { %v1177_v4 = vadd.f32 %v1113_v48, %v1049_v54  ;;  %v1209_v5 = vadd.f32 %v1145_v49, %v1081_v55  ;;  %v1050_v6 = vadd.f32 %v2007_v42, %v979_v58  ;;  %v1082_v7 = vadd.f32 %v2007_v42, %v1011_v59  ;;  %v1117_v54 = vld [vmem:[%s2002_s24 + $0x30] sm:$0xff]  ;;  %v1147_v61 = vld [vmem:[%s2002_s24 + $0x120] sm:$0xff] }
  0xfb   : > { %v1175_v12 = vadd.f32 %v1111_v56, %v1047_v62  ;;  %v1207_v13 = vadd.f32 %v1143_v57, %v1079_v63  ;;  %v1048_v14 = vadd.f32 %v2007_v42, %v977_v2  ;;  %v1080_v15 = vadd.f32 %v2007_v42, %v1009_v3  ;;  %v1149_v55 = vld [vmem:[%s2002_s24 + $0x130] sm:$0xff]  ;;  %v1118_v2 = vld [vmem:[%s2002_s24 + $0x38] sm:$0xff] }
  0xfc   : > { %v1241_v16 = vmax.f32 %v1177_v4, 0.0  ;;  %v1273_v17 = vmax.f32 %v1209_v5, 0.0  ;;  %v1178_v20 = vadd.f32 %v1114_v0, %v1050_v6  ;;  %v1210_v21 = vadd.f32 %v1146_v1, %v1082_v7  ;;  %v1150_v3 = vld [vmem:[%s2002_s24 + $0x138] sm:$0xff] }
  0xfd   : > { %v1239_v22 = vmax.f32 %v1175_v12, 0.0  ;;  %v1271_v23 = vmax.f32 %v1207_v13, 0.0  ;;  %v1176_v26 = vadd.f32 %v1112_v8, %v1048_v14  ;;  %v1208_v27 = vadd.f32 %v1144_v9, %v1080_v15  ;;  %v1723_v28 = vpop.f32.mrb[4].mxu0  ;;  %v1755_v29 = vpop.f32.mrb[4].mxu1  ;;  %v1309_v12 = vld [vmem:[%s2019_s29 + $0x30] sm:$0xff] }
  0xfe   : > { %v1369_v30 = vmul.f32 %v1305_v10, %v1241_v16  ;;  %v1401_v31 = vmul.f32 %v1337_v11, %v1273_v17  ;;  %v1242_v32 = vmax.f32 %v1178_v20, 0.0  ;;  %v1274_v33 = vmax.f32 %v1210_v21, 0.0  ;;  %v730_v36 = vpop.f32.mrb[5].mxu0  ;;  %v858_v37 = vpop.f32.mrb[5].mxu1  ;;  %v1116_v10 = vld [vmem:[%s2002_s24 + $0x28] sm:$0xff]  ;;  %v1341_v13 = vld [vmem:[%s2019_s29 + $0x130] sm:$0xff] }
  0xff   : > { %v1367_v38 = vmul.f32 %v1303_v18, %v1239_v22  ;;  %v1399_v39 = vmul.f32 %v1335_v19, %v1271_v23  ;;  %v1240_v41 = vmax.f32 %v1176_v26, 0.0  ;;  %v1272_v43 = vmax.f32 %v1208_v27, 0.0  ;;  %v1724_v44 = vpop.f32.mrb[6].mxu0  ;;  %v1756_v45 = vpop.f32.mrb[6].mxu1  ;;  %v1148_v11 = vld [vmem:[%s2002_s24 + $0x128] sm:$0xff]  ;;  %v1307_v22 = vld [vmem:[%s2019_s29 + $0x20] sm:$0xff] }
 0x100   : > { %1434 = vst.msk [vmem:[%s2047_s8 + $0x10] sm:$0xff] %vm1431_vm2, %v1369_v30  ;;  %1466 = vst.msk [vmem:[%s2047_s8 + $0x110] sm:$0xff] %vm1431_vm2, %v1401_v31  ;;  %v1370_v46 = vmul.f32 %v1306_v24, %v1242_v32  ;;  %v1402_v47 = vmul.f32 %v1338_v25, %v1274_v33  ;;  %v982_v48 = vmul.f32 %v1723_v28, %v1996_v40  ;;  %v733_v50 = vpop.f32.mrb[7].mxu0  ;;  %v861_v51 = vpop.f32.mrb[7].mxu1  ;;  %v1339_v23 = vld [vmem:[%s2019_s29 + $0x120] sm:$0xff]  ;;  %v1310_v30 = vld [vmem:[%s2019_s29 + $0x38] sm:$0xff] }
 0x101   : > { %v1014_v49 = vmul.f32 %v1755_v29, %v1996_v40  ;;  %1432 = vst.msk [vmem:[%s2047_s8] sm:$0xff] %vm1431_vm2, %v1367_v38  ;;  %1464 = vst.msk [vmem:[%s2047_s8 + $0x100] sm:$0xff] %vm1431_vm2, %v1399_v39  ;;  %v1368_v52 = vmul.f32 %v1304_v34, %v1240_v41  ;;  %v1400_v53 = vmul.f32 %v1336_v35, %v1272_v43  ;;  %v1342_v31 = vld [vmem:[%s2019_s29 + $0x138] sm:$0xff]  ;;  %v1308_v41 = vld [vmem:[%s2019_s29 + $0x28] sm:$0xff] }
 0x102   : > { %v980_v56 = vmul.f32 %v1996_v40, %v730_v36  ;;  %v1012_v57 = vmul.f32 %v1996_v40, %v858_v37  ;;  %1435 = vst.msk [vmem:[%s2047_s8 + $0x18] sm:$0xff] %vm1431_vm2, %v1370_v46  ;;  %1467 = vst.msk [vmem:[%s2047_s8 + $0x118] sm:$0xff] %vm1431_vm2, %v1402_v47  ;;  %v1053_v58 = vadd.f32 %v2007_v42, %v982_v48  ;;  %v1340_v43 = vld [vmem:[%s2019_s29 + $0x128] sm:$0xff] }
 0x103   : > { %v1085_v59 = vadd.f32 %v2007_v42, %v1014_v49  ;;  %v983_v62 = vmul.f32 %v1724_v44, %v1996_v40  ;;  %v1015_v63 = vmul.f32 %v1756_v45, %v1996_v40  ;;  %1433 = vst.msk [vmem:[%s2047_s8 + $0x8] sm:$0xff] %vm1431_vm2, %v1368_v52  ;;  %1465 = vst.msk [vmem:[%s2047_s8 + $0x108] sm:$0xff] %vm1431_vm2, %v1400_v53 }
 0x104   : > { %v1051_v0 = vadd.f32 %v2007_v42, %v980_v56  ;;  %v1083_v1 = vadd.f32 %v2007_v42, %v1012_v57  ;;  %v981_v4 = vmul.f32 %v1996_v40, %v733_v50  ;;  %v1013_v5 = vmul.f32 %v1996_v40, %v861_v51  ;;  %v1121_v56 = vld [vmem:[%s2002_s24 + $0x50] sm:$0xff] }
 0x105   : > { %v1181_v6 = vadd.f32 %v1117_v54, %v1053_v58  ;;  %v1213_v7 = vadd.f32 %v1149_v55, %v1085_v59  ;;  %v1054_v8 = vadd.f32 %v2007_v42, %v983_v62  ;;  %v1086_v9 = vadd.f32 %v2007_v42, %v1015_v63  ;;  %v1727_v18 = vpop.f32.mrb[8].mxu0  ;;  %v1759_v19 = vpop.f32.mrb[8].mxu1  ;;  %v1153_v57 = vld [vmem:[%s2002_s24 + $0x150] sm:$0xff]  ;;  %v1119_v62 = vld [vmem:[%s2002_s24 + $0x40] sm:$0xff] }
 0x106   : > { %v1179_v14 = vadd.f32 %v1115_v60, %v1051_v0  ;;  %v1211_v15 = vadd.f32 %v1147_v61, %v1083_v1  ;;  %v1052_v16 = vadd.f32 %v2007_v42, %v981_v4  ;;  %v1084_v17 = vadd.f32 %v2007_v42, %v1013_v5  ;;  %v746_v26 = vpop.f32.mrb[9].mxu0  ;;  %v874_v27 = vpop.f32.mrb[9].mxu1  ;;  %v1151_v63 = vld [vmem:[%s2002_s24 + $0x140] sm:$0xff]  ;;  %v1122_v4 = vld [vmem:[%s2002_s24 + $0x58] sm:$0xff] }
 0x107   : > { %v1245_v20 = vmax.f32 %v1181_v6, 0.0  ;;  %v1277_v21 = vmax.f32 %v1213_v7, 0.0  ;;  %v1182_v24 = vadd.f32 %v1118_v2, %v1054_v8  ;;  %v1214_v25 = vadd.f32 %v1150_v3, %v1086_v9  ;;  %v1728_v34 = vpop.f32.mrb[10].mxu0  ;;  %v1760_v35 = vpop.f32.mrb[10].mxu1  ;;  %v1154_v5 = vld [vmem:[%s2002_s24 + $0x158] sm:$0xff] }
 0x108   : > { %v1243_v28 = vmax.f32 %v1179_v14, 0.0  ;;  %v1275_v29 = vmax.f32 %v1211_v15, 0.0  ;;  %v1180_v32 = vadd.f32 %v1116_v10, %v1052_v16  ;;  %v1212_v33 = vadd.f32 %v1148_v11, %v1084_v17  ;;  %v749_v44 = vpop.f32.mrb[11].mxu0  ;;  %v877_v45 = vpop.f32.mrb[11].mxu1  ;;  %v1120_v14 = vld [vmem:[%s2002_s24 + $0x48] sm:$0xff] }
 0x109   : > { %v1373_v36 = vmul.f32 %v1309_v12, %v1245_v20  ;;  %v1405_v37 = vmul.f32 %v1341_v13, %v1277_v21  ;;  %v1246_v38 = vmax.f32 %v1182_v24, 0.0  ;;  %v1278_v39 = vmax.f32 %v1214_v25, 0.0  ;;  %v1152_v15 = vld [vmem:[%s2002_s24 + $0x148] sm:$0xff] }
 0x10a   : > { %v1371_v46 = vmul.f32 %v1307_v22, %v1243_v28  ;;  %v1403_v47 = vmul.f32 %v1339_v23, %v1275_v29  ;;  %v1244_v48 = vmax.f32 %v1180_v32, 0.0  ;;  %v1276_v49 = vmax.f32 %v1212_v33, 0.0  ;;  %v1311_v28 = vld [vmem:[%s2019_s29 + $0x40] sm:$0xff] }
 0x10b   : > { %1438 = vst.msk [vmem:[%s2047_s8 + $0x30] sm:$0xff] %vm1431_vm2, %v1373_v36  ;;  %1470 = vst.msk [vmem:[%s2047_s8 + $0x130] sm:$0xff] %vm1431_vm2, %v1405_v37  ;;  %v1374_v50 = vmul.f32 %v1310_v30, %v1246_v38  ;;  %v1406_v51 = vmul.f32 %v1342_v31, %v1278_v39  ;;  %v986_v52 = vmul.f32 %v1727_v18, %v1996_v40  ;;  %v1313_v18 = vld [vmem:[%s2019_s29 + $0x50] sm:$0xff]  ;;  %v1343_v29 = vld [vmem:[%s2019_s29 + $0x140] sm:$0xff] }
 0x10c   : > { %v1018_v53 = vmul.f32 %v1759_v19, %v1996_v40  ;;  %1436 = vst.msk [vmem:[%s2047_s8 + $0x20] sm:$0xff] %vm1431_vm2, %v1371_v46  ;;  %1468 = vst.msk [vmem:[%s2047_s8 + $0x120] sm:$0xff] %vm1431_vm2, %v1403_v47  ;;  %v1372_v54 = vmul.f32 %v1308_v41, %v1244_v48  ;;  %v1404_v55 = vmul.f32 %v1340_v43, %v1276_v49  ;;  %v1345_v19 = vld [vmem:[%s2019_s29 + $0x150] sm:$0xff]  ;;  %v1314_v36 = vld [vmem:[%s2019_s29 + $0x58] sm:$0xff] }
 0x10d   : > { %v984_v58 = vmul.f32 %v1996_v40, %v746_v26  ;;  %v1016_v59 = vmul.f32 %v1996_v40, %v874_v27  ;;  %1439 = vst.msk [vmem:[%s2047_s8 + $0x38] sm:$0xff] %vm1431_vm2, %v1374_v50  ;;  %1471 = vst.msk [vmem:[%s2047_s8 + $0x138] sm:$0xff] %vm1431_vm2, %v1406_v51  ;;  %v1057_v60 = vadd.f32 %v2007_v42, %v986_v52  ;;  %v1731_v8 = vpop.f32.mrb[12].mxu0  ;;  %v1763_v9 = vpop.f32.mrb[12].mxu1  ;;  %v1346_v37 = vld [vmem:[%s2019_s29 + $0x158] sm:$0xff]  ;;  %v1312_v46 = vld [vmem:[%s2019_s29 + $0x48] sm:$0xff] }
 0x10e   : > { %v1089_v61 = vadd.f32 %v2007_v42, %v1018_v53  ;;  %v987_v0 = vmul.f32 %v1728_v34, %v1996_v40  ;;  %v1019_v1 = vmul.f32 %v1760_v35, %v1996_v40  ;;  %1437 = vst.msk [vmem:[%s2047_s8 + $0x28] sm:$0xff] %vm1431_vm2, %v1372_v54  ;;  %1469 = vst.msk [vmem:[%s2047_s8 + $0x128] sm:$0xff] %vm1431_vm2, %v1404_v55  ;;  %v762_v16 = vpop.f32.mrb[13].mxu0  ;;  %v890_v17 = vpop.f32.mrb[13].mxu1  ;;  %v1344_v47 = vld [vmem:[%s2019_s29 + $0x148] sm:$0xff] }
 0x10f   : > { %v1055_v2 = vadd.f32 %v2007_v42, %v984_v58  ;;  %v1087_v3 = vadd.f32 %v2007_v42, %v1016_v59  ;;  %v985_v6 = vmul.f32 %v1996_v40, %v749_v44  ;;  %v1017_v7 = vmul.f32 %v1996_v40, %v877_v45  ;;  %v1732_v24 = vpop.f32.mrb[14].mxu0  ;;  %v1764_v25 = vpop.f32.mrb[14].mxu1  ;;  %v1125_v58 = vld [vmem:[%s2002_s24 + $0x70] sm:$0xff] }
 0x110   : > { %v1185_v10 = vadd.f32 %v1121_v56, %v1057_v60  ;;  %v1217_v11 = vadd.f32 %v1153_v57, %v1089_v61  ;;  %v1058_v12 = vadd.f32 %v2007_v42, %v987_v0  ;;  %v1090_v13 = vadd.f32 %v2007_v42, %v1019_v1  ;;  %v765_v32 = vpop.f32.mrb[15].mxu0  ;;  %v893_v33 = vpop.f32.mrb[15].mxu1  ;;  %v1157_v59 = vld [vmem:[%s2002_s24 + $0x170] sm:$0xff] }
 0x111   : > { %v1183_v20 = vadd.f32 %v1119_v62, %v1055_v2  ;;  %v1215_v21 = vadd.f32 %v1151_v63, %v1087_v3  ;;  %v1056_v22 = vadd.f32 %v2007_v42, %v985_v6  ;;  %v1088_v23 = vadd.f32 %v2007_v42, %v1017_v7  ;;  %v1123_v2 = vld [vmem:[%s2002_s24 + $0x60] sm:$0xff] }
 0x112   : > { %v1249_v26 = vmax.f32 %v1185_v10, 0.0  ;;  %v1281_v27 = vmax.f32 %v1217_v11, 0.0  ;;  %v1186_v30 = vadd.f32 %v1122_v4, %v1058_v12  ;;  %v1218_v31 = vadd.f32 %v1154_v5, %v1090_v13  ;;  %v1155_v3 = vld [vmem:[%s2002_s24 + $0x160] sm:$0xff]  ;;  %v1126_v10 = vld [vmem:[%s2002_s24 + $0x78] sm:$0xff] }
 0x113   : > { %v1247_v34 = vmax.f32 %v1183_v20, 0.0  ;;  %v1279_v35 = vmax.f32 %v1215_v21, 0.0  ;;  %v1184_v38 = vadd.f32 %v1120_v14, %v1056_v22  ;;  %v1216_v39 = vadd.f32 %v1152_v15, %v1088_v23  ;;  %v1158_v11 = vld [vmem:[%s2002_s24 + $0x178] sm:$0xff]  ;;  %v1124_v20 = vld [vmem:[%s2002_s24 + $0x68] sm:$0xff] }
 0x114   : > { %v1377_v41 = vmul.f32 %v1313_v18, %v1249_v26  ;;  %v1409_v43 = vmul.f32 %v1345_v19, %v1281_v27  ;;  %v1250_v44 = vmax.f32 %v1186_v30, 0.0  ;;  %v1282_v45 = vmax.f32 %v1218_v31, 0.0  ;;  %v1156_v21 = vld [vmem:[%s2002_s24 + $0x168] sm:$0xff] }
 0x115   : > { %v1375_v48 = vmul.f32 %v1311_v28, %v1247_v34  ;;  %v1407_v49 = vmul.f32 %v1343_v29, %v1279_v35  ;;  %v1248_v50 = vmax.f32 %v1184_v38, 0.0  ;;  %v1280_v51 = vmax.f32 %v1216_v39, 0.0  ;;  %v2163_v62 = vpop.f32.mrb[16].mxu0  ;;  %v2165_v63 = vpop.f32.mrb[16].mxu1  ;;  %v1318_v38 = vld [vmem:[%s2019_s29 + $0x78] sm:$0xff] }
 0x116   : > { %1442 = vst.msk [vmem:[%s2047_s8 + $0x50] sm:$0xff] %vm1431_vm2, %v1377_v41  ;;  %1474 = vst.msk [vmem:[%s2047_s8 + $0x150] sm:$0xff] %vm1431_vm2, %v1409_v43  ;;  %v1378_v52 = vmul.f32 %v1314_v36, %v1250_v44  ;;  %v1410_v53 = vmul.f32 %v1346_v37, %v1282_v45  ;;  %v990_v54 = vmul.f32 %v1731_v8, %v1996_v40  ;;  %v2177_v6 = vpop.f32.mrb[17].mxu0  ;;  %v2179_v7 = vpop.f32.mrb[17].mxu1  ;;  %v1350_v39 = vld [vmem:[%s2019_s29 + $0x178] sm:$0xff] }
 0x117   : > { %v1022_v55 = vmul.f32 %v1763_v9, %v1996_v40  ;;  %1440 = vst.msk [vmem:[%s2047_s8 + $0x40] sm:$0xff] %vm1431_vm2, %v1375_v48  ;;  %1472 = vst.msk [vmem:[%s2047_s8 + $0x140] sm:$0xff] %vm1431_vm2, %v1407_v49  ;;  %v1376_v56 = vmul.f32 %v1312_v46, %v1248_v50  ;;  %v1408_v57 = vmul.f32 %v1344_v47, %v1280_v51  ;;  %v2191_v14 = vpop.f32.mrb[18].mxu0  ;;  %v2193_v15 = vpop.f32.mrb[18].mxu1  ;;  %v1316_v48 = vld [vmem:[%s2019_s29 + $0x68] sm:$0xff] }
 0x118   : > { %v988_v60 = vmul.f32 %v1996_v40, %v762_v16  ;;  %v1020_v61 = vmul.f32 %v1996_v40, %v890_v17  ;;  %1443 = vst.msk [vmem:[%s2047_s8 + $0x58] sm:$0xff] %vm1431_vm2, %v1378_v52  ;;  %1475 = vst.msk [vmem:[%s2047_s8 + $0x158] sm:$0xff] %vm1431_vm2, %v1410_v53  ;;  %v1061_v0 = vadd.f32 %v2007_v42, %v990_v54  ;;  %v2199_v22 = vpop.f32.mrb[19].mxu0  ;;  %v2201_v23 = vpop.f32.mrb[19].mxu1  ;;  %v1348_v49 = vld [vmem:[%s2019_s29 + $0x168] sm:$0xff] }
 0x119   : > { %v1093_v1 = vadd.f32 %v2007_v42, %v1022_v55  ;;  %v991_v4 = vmul.f32 %v1732_v24, %v1996_v40  ;;  %v1023_v5 = vmul.f32 %v1764_v25, %v1996_v40  ;;  %1441 = vst.msk [vmem:[%s2047_s8 + $0x48] sm:$0xff] %vm1431_vm2, %v1376_v56  ;;  %1473 = vst.msk [vmem:[%s2047_s8 + $0x148] sm:$0xff] %vm1431_vm2, %v1408_v57  ;;  %v1317_v24 = vld [vmem:[%s2019_s29 + $0x70] sm:$0xff] }
 0x11a   : > { %v1059_v8 = vadd.f32 %v2007_v42, %v988_v60  ;;  %v1091_v9 = vadd.f32 %v2007_v42, %v1020_v61  ;;  %v989_v12 = vmul.f32 %v1996_v40, %v765_v32  ;;  %v1021_v13 = vmul.f32 %v1996_v40, %v893_v33  ;;  %v1349_v25 = vld [vmem:[%s2019_s29 + $0x170] sm:$0xff]  ;;  %v1315_v32 = vld [vmem:[%s2019_s29 + $0x60] sm:$0xff] }
 0x11b   : > { %v1189_v16 = vadd.f32 %v1125_v58, %v1061_v0  ;;  %v1221_v17 = vadd.f32 %v1157_v59, %v1093_v1  ;;  %v1062_v18 = vadd.f32 %v2007_v42, %v991_v4  ;;  %v1094_v19 = vadd.f32 %v2007_v42, %v1023_v5  ;;  %v1347_v33 = vld [vmem:[%s2019_s29 + $0x160] sm:$0xff] }
 0x11c   : > { %v1187_v26 = vadd.f32 %v1123_v2, %v1059_v8  ;;  %v1219_v27 = vadd.f32 %v1155_v3, %v1091_v9  ;;  %v1060_v28 = vadd.f32 %v2007_v42, %v989_v12  ;;  %v1092_v29 = vadd.f32 %v2007_v42, %v1021_v13  ;;  %v1129_v2 = vld [vmem:[%s2002_s24 + $0x90] sm:$0xff] }
 0x11d   : > { %v1253_v30 = vmax.f32 %v1189_v16, 0.0  ;;  %v1285_v31 = vmax.f32 %v1221_v17, 0.0  ;;  %v1190_v34 = vadd.f32 %v1126_v10, %v1062_v18  ;;  %v1222_v35 = vadd.f32 %v1158_v11, %v1094_v19  ;;  %v2213_v54 = vpop.f32.mrb[20].mxu0  ;;  %v2215_v55 = vpop.f32.mrb[20].mxu1  ;;  %v1161_v3 = vld [vmem:[%s2002_s24 + $0x190] sm:$0xff]  ;;  %v1127_v10 = vld [vmem:[%s2002_s24 + $0x80] sm:$0xff] }
 0x11e   : > { %v1251_v36 = vmax.f32 %v1187_v26, 0.0  ;;  %v1283_v37 = vmax.f32 %v1219_v27, 0.0  ;;  %v1188_v41 = vadd.f32 %v1124_v20, %v1060_v28  ;;  %v1220_v43 = vadd.f32 %v1156_v21, %v1092_v29  ;;  %v2225_v60 = vpop.f32.mrb[21].mxu0  ;;  %v2227_v61 = vpop.f32.mrb[21].mxu1  ;;  %v1159_v11 = vld [vmem:[%s2002_s24 + $0x180] sm:$0xff]  ;;  %v1162_v18 = vld [vmem:[%s2002_s24 + $0x198] sm:$0xff] }
 0x11f   : > { %v1381_v44 = vmul.f32 %v1317_v24, %v1253_v30  ;;  %v1413_v45 = vmul.f32 %v1349_v25, %v1285_v31  ;;  %v1254_v46 = vmax.f32 %v1190_v34, 0.0  ;;  %v1286_v47 = vmax.f32 %v1222_v35, 0.0  ;;  %v2239_v4 = vpop.f32.mrb[22].mxu0  ;;  %v2241_v5 = vpop.f32.mrb[22].mxu1  ;;  %v1128_v26 = vld [vmem:[%s2002_s24 + $0x88] sm:$0xff]  ;;  %v1321_v28 = vld [vmem:[%s2019_s29 + $0x90] sm:$0xff] }
 0x120   : > { %v1379_v50 = vmul.f32 %v1315_v32, %v1251_v36  ;;  %v1411_v51 = vmul.f32 %v1347_v33, %v1283_v37  ;;  %v1252_v52 = vmax.f32 %v1188_v41, 0.0  ;;  %v1284_v53 = vmax.f32 %v1220_v43, 0.0  ;;  %v2255_v12 = vpop.f32.mrb[23].mxu0  ;;  %v2257_v13 = vpop.f32.mrb[23].mxu1  ;;  %v1160_v27 = vld [vmem:[%s2002_s24 + $0x188] sm:$0xff]  ;;  %v1353_v29 = vld [vmem:[%s2019_s29 + $0x190] sm:$0xff] }
 0x121   : > { %1446 = vst.msk [vmem:[%s2047_s8 + $0x70] sm:$0xff] %vm1431_vm2, %v1381_v44  ;;  %1478 = vst.msk [vmem:[%s2047_s8 + $0x170] sm:$0xff] %vm1431_vm2, %v1413_v45  ;;  %v1382_v56 = vmul.f32 %v1318_v38, %v1254_v46  ;;  %v1414_v57 = vmul.f32 %v1350_v39, %v1286_v47  ;;  %v994_v58 = vmul.f32 %v2163_v62, %v1996_v40  ;;  %v1319_v34 = vld [vmem:[%s2019_s29 + $0x80] sm:$0xff]  ;;  %v1322_v41 = vld [vmem:[%s2019_s29 + $0x98] sm:$0xff] }
 0x122   : > { %v1026_v59 = vmul.f32 %v2165_v63, %v1996_v40  ;;  %1444 = vst.msk [vmem:[%s2047_s8 + $0x60] sm:$0xff] %vm1431_vm2, %v1379_v50  ;;  %1476 = vst.msk [vmem:[%s2047_s8 + $0x160] sm:$0xff] %vm1431_vm2, %v1411_v51  ;;  %v1380_v0 = vmul.f32 %v1316_v48, %v1252_v52  ;;  %v1412_v1 = vmul.f32 %v1348_v49, %v1284_v53  ;;  %v1351_v35 = vld [vmem:[%s2019_s29 + $0x180] sm:$0xff]  ;;  %v1354_v43 = vld [vmem:[%s2019_s29 + $0x198] sm:$0xff] }
 0x123   : > { %v992_v62 = vmul.f32 %v1996_v40, %v2177_v6  ;;  %v1024_v63 = vmul.f32 %v1996_v40, %v2179_v7  ;;  %1447 = vst.msk [vmem:[%s2047_s8 + $0x78] sm:$0xff] %vm1431_vm2, %v1382_v56  ;;  %1479 = vst.msk [vmem:[%s2047_s8 + $0x178] sm:$0xff] %vm1431_vm2, %v1414_v57  ;;  %v1065_v8 = vadd.f32 %v2007_v42, %v994_v58  ;;  %v1320_v52 = vld [vmem:[%s2019_s29 + $0x88] sm:$0xff] }
 0x124   : > { %v1097_v9 = vadd.f32 %v2007_v42, %v1026_v59  ;;  %v995_v6 = vmul.f32 %v2191_v14, %v1996_v40  ;;  %v1027_v7 = vmul.f32 %v2193_v15, %v1996_v40  ;;  %1445 = vst.msk [vmem:[%s2047_s8 + $0x68] sm:$0xff] %vm1431_vm2, %v1380_v0  ;;  %1477 = vst.msk [vmem:[%s2047_s8 + $0x168] sm:$0xff] %vm1431_vm2, %v1412_v1  ;;  %v1130_v14 = vld [vmem:[%s2002_s24 + $0x98] sm:$0xff]  ;;  %v1352_v53 = vld [vmem:[%s2019_s29 + $0x188] sm:$0xff] }
 0x125   : > { %v1063_v16 = vadd.f32 %v2007_v42, %v992_v62  ;;  %v1095_v17 = vadd.f32 %v2007_v42, %v1024_v63  ;;  %v993_v15 = vmul.f32 %v1996_v40, %v2199_v22  ;;  %v1025_v19 = vmul.f32 %v1996_v40, %v2201_v23  ;;  %v2283_v46 = vpop.f32.mrb[24].mxu0  ;;  %v2285_v47 = vpop.f32.mrb[24].mxu1 }
 0x126   : > { %v1193_v20 = vadd.f32 %v1129_v2, %v1065_v8  ;;  %v1225_v21 = vadd.f32 %v1161_v3, %v1097_v9  ;;  %v1066_v24 = vadd.f32 %v2007_v42, %v995_v6  ;;  %v1098_v25 = vadd.f32 %v2007_v42, %v1027_v7  ;;  %v2289_v56 = vpop.f32.mrb[25].mxu0  ;;  %v2291_v57 = vpop.f32.mrb[25].mxu1 }
 0x127   : > { %v1191_v30 = vadd.f32 %v1127_v10, %v1063_v16  ;;  %v1223_v31 = vadd.f32 %v1159_v11, %v1095_v17  ;;  %v1064_v22 = vadd.f32 %v2007_v42, %v993_v15  ;;  %v1096_v32 = vadd.f32 %v2007_v42, %v1025_v19  ;;  %v2293_v2 = vpop.f32.mrb[26].mxu0  ;;  %v2295_v3 = vpop.f32.mrb[26].mxu1  ;;  %v1133_v16 = vld [vmem:[%s2002_s24 + $0xb0] sm:$0xff]  ;;  %v1131_v15 = vld [vmem:[%s2002_s24 + $0xa0] sm:$0xff] }
 0x128   : > { %v1257_v23 = vmax.f32 %v1193_v20, 0.0  ;;  %v1289_v33 = vmax.f32 %v1225_v21, 0.0  ;;  %v1194_v36 = vadd.f32 %v1130_v14, %v1066_v24  ;;  %v1226_v37 = vadd.f32 %v1162_v18, %v1098_v25  ;;  %v2305_v10 = vpop.f32.mrb[27].mxu0  ;;  %v2307_v11 = vpop.f32.mrb[27].mxu1  ;;  %v1163_v19 = vld [vmem:[%s2002_s24 + $0x1a0] sm:$0xff]  ;;  %v1134_v24 = vld [vmem:[%s2002_s24 + $0xb8] sm:$0xff] }
 0x129   : > { %v1255_v38 = vmax.f32 %v1191_v30, 0.0  ;;  %v1287_v39 = vmax.f32 %v1223_v31, 0.0  ;;  %v1192_v44 = vadd.f32 %v1128_v26, %v1064_v22  ;;  %v1224_v45 = vadd.f32 %v1160_v27, %v1096_v32  ;;  %v1166_v25 = vld [vmem:[%s2002_s24 + $0x1b8] sm:$0xff]  ;;  %v1132_v30 = vld [vmem:[%s2002_s24 + $0xa8] sm:$0xff]  ;;  %v1325_v22 = vld [vmem:[%s2019_s29 + $0xb0] sm:$0xff] }
 0x12a   : > { %v1385_v48 = vmul.f32 %v1321_v28, %v1257_v23  ;;  %v1417_v49 = vmul.f32 %v1353_v29, %v1289_v33  ;;  %v1258_v50 = vmax.f32 %v1194_v36, 0.0  ;;  %v1290_v51 = vmax.f32 %v1226_v37, 0.0  ;;  %v1164_v31 = vld [vmem:[%s2002_s24 + $0x1a8] sm:$0xff]  ;;  %v1357_v32 = vld [vmem:[%s2019_s29 + $0x1b0] sm:$0xff] }
 0x12b   : > { %v1383_v58 = vmul.f32 %v1319_v34, %v1255_v38  ;;  %v1415_v59 = vmul.f32 %v1351_v35, %v1287_v39  ;;  %v1256_v0 = vmax.f32 %v1192_v44, 0.0  ;;  %v1288_v1 = vmax.f32 %v1224_v45, 0.0  ;;  %v1323_v38 = vld [vmem:[%s2019_s29 + $0xa0] sm:$0xff] }
 0x12c   : > { %1450 = vst.msk [vmem:[%s2047_s8 + $0x90] sm:$0xff] %vm1431_vm2, %v1385_v48  ;;  %1482 = vst.msk [vmem:[%s2047_s8 + $0x190] sm:$0xff] %vm1431_vm2, %v1417_v49  ;;  %v1386_v62 = vmul.f32 %v1322_v41, %v1258_v50  ;;  %v1418_v63 = vmul.f32 %v1354_v43, %v1290_v51  ;;  %v998_v8 = vmul.f32 %v2213_v54, %v1996_v40  ;;  %v1165_v54 = vld [vmem:[%s2002_s24 + $0x1b0] sm:$0xff]  ;;  %v1355_v39 = vld [vmem:[%s2019_s29 + $0x1a0] sm:$0xff] }
 0x12d   : > { %v1030_v9 = vmul.f32 %v2215_v55, %v1996_v40  ;;  %1448 = vst.msk [vmem:[%s2047_s8 + $0x80] sm:$0xff] %vm1431_vm2, %v1383_v58  ;;  %1480 = vst.msk [vmem:[%s2047_s8 + $0x180] sm:$0xff] %vm1431_vm2, %v1415_v59  ;;  %v1384_v6 = vmul.f32 %v1320_v52, %v1256_v0  ;;  %v1416_v7 = vmul.f32 %v1352_v53, %v1288_v1  ;;  %v2351_v34 = vpop.f32.mrb[28].mxu0  ;;  %v2353_v35 = vpop.f32.mrb[28].mxu1  ;;  %v1326_v50 = vld [vmem:[%s2019_s29 + $0xb8] sm:$0xff] }
 0x12e   : > { %v996_v55 = vmul.f32 %v1996_v40, %v2225_v60  ;;  %v1028_v17 = vmul.f32 %v1996_v40, %v2227_v61  ;;  %1451 = vst.msk [vmem:[%s2047_s8 + $0x98] sm:$0xff] %vm1431_vm2, %v1386_v62  ;;  %1483 = vst.msk [vmem:[%s2047_s8 + $0x198] sm:$0xff] %vm1431_vm2, %v1418_v63  ;;  %v1069_v14 = vadd.f32 %v2007_v42, %v998_v8  ;;  %v2357_v44 = vpop.f32.mrb[29].mxu0  ;;  %v2359_v45 = vpop.f32.mrb[29].mxu1  ;;  %v1358_v51 = vld [vmem:[%s2019_s29 + $0x1b8] sm:$0xff]  ;;  %v1324_v8 = vld [vmem:[%s2019_s29 + $0xa8] sm:$0xff] }
 0x12f   : > { %v1101_v18 = vadd.f32 %v2007_v42, %v1030_v9  ;;  %v999_v20 = vmul.f32 %v2239_v4, %v1996_v40  ;;  %v1031_v60 = vmul.f32 %v2241_v5, %v1996_v40  ;;  %1449 = vst.msk [vmem:[%s2047_s8 + $0x88] sm:$0xff] %vm1431_vm2, %v1384_v6  ;;  %1481 = vst.msk [vmem:[%s2047_s8 + $0x188] sm:$0xff] %vm1431_vm2, %v1416_v7  ;;  %v2363_v58 = vpop.f32.mrb[30].mxu0  ;;  %v2365_v59 = vpop.f32.mrb[30].mxu1  ;;  %v1356_v9 = vld [vmem:[%s2019_s29 + $0x1a8] sm:$0xff] }
 0x130   : > { %v1067_v61 = vadd.f32 %v2007_v42, %v996_v55  ;;  %v1099_v21 = vadd.f32 %v2007_v42, %v1028_v17  ;;  %v997_v26 = vmul.f32 %v1996_v40, %v2255_v12  ;;  %v1029_v4 = vmul.f32 %v1996_v40, %v2257_v13  ;;  %v2369_v6 = vpop.f32.mrb[31].mxu0  ;;  %v2371_v7 = vpop.f32.mrb[31].mxu1 }
 0x131   : > { %v1197_v27 = vadd.f32 %v1133_v16, %v1069_v14  ;;  %v1229_v5 = vadd.f32 %v1165_v54, %v1101_v18  ;;  %v1070_v28 = vadd.f32 %v2007_v42, %v999_v20  ;;  %v1102_v29 = vadd.f32 %v2007_v42, %v1031_v60 }
 0x132   : > { %v1195_v23 = vadd.f32 %v1131_v15, %v1067_v61  ;;  %v1227_v33 = vadd.f32 %v1163_v19, %v1099_v21  ;;  %v1068_v12 = vadd.f32 %v2007_v42, %v997_v26  ;;  %v1100_v13 = vadd.f32 %v2007_v42, %v1029_v4  ;;  %v1137_v61 = vld [vmem:[%s2002_s24 + $0xd0] sm:$0xff]  ;;  %v1135_v26 = vld [vmem:[%s2002_s24 + $0xc0] sm:$0xff] }
 0x133   : > { %v1261_v36 = vmax.f32 %v1197_v27, 0.0  ;;  %v1293_v37 = vmax.f32 %v1229_v5, 0.0  ;;  %v1198_v41 = vadd.f32 %v1134_v24, %v1070_v28  ;;  %v1230_v43 = vadd.f32 %v1166_v25, %v1102_v29  ;;  %v1169_v21 = vld [vmem:[%s2002_s24 + $0x1d0] sm:$0xff]  ;;  %v1167_v4 = vld [vmem:[%s2002_s24 + $0x1c0] sm:$0xff]  ;;  %v1138_v28 = vld [vmem:[%s2002_s24 + $0xd8] sm:$0xff] }
 0x134   : > { %v1259_v48 = vmax.f32 %v1195_v23, 0.0  ;;  %v1291_v49 = vmax.f32 %v1227_v33, 0.0  ;;  %v1196_v52 = vadd.f32 %v1132_v30, %v1068_v12  ;;  %v1228_v53 = vadd.f32 %v1164_v31, %v1100_v13  ;;  %v1170_v29 = vld [vmem:[%s2002_s24 + $0x1d8] sm:$0xff]  ;;  %v1136_v23 = vld [vmem:[%s2002_s24 + $0xc8] sm:$0xff]  ;;  %v1329_v12 = vld [vmem:[%s2019_s29 + $0xd0] sm:$0xff] }
 0x135   : > { %v1389_v0 = vmul.f32 %v1325_v22, %v1261_v36  ;;  %v1421_v1 = vmul.f32 %v1357_v32, %v1293_v37  ;;  %v1262_v62 = vmax.f32 %v1198_v41, 0.0  ;;  %v1294_v63 = vmax.f32 %v1230_v43, 0.0  ;;  %v1168_v33 = vld [vmem:[%s2002_s24 + $0x1c8] sm:$0xff]  ;;  %v1361_v13 = vld [vmem:[%s2019_s29 + $0x1d0] sm:$0xff]  ;;  %v1327_v41 = vld [vmem:[%s2019_s29 + $0xc0] sm:$0xff] }
 0x136   : > { %v1387_v16 = vmul.f32 %v1323_v38, %v1259_v48  ;;  %v1419_v54 = vmul.f32 %v1355_v39, %v1291_v49  ;;  %v1260_v55 = vmax.f32 %v1196_v52, 0.0  ;;  %v1292_v17 = vmax.f32 %v1228_v53, 0.0  ;;  %v1359_v43 = vld [vmem:[%s2019_s29 + $0x1c0] sm:$0xff]  ;;  %v1330_v52 = vld [vmem:[%s2019_s29 + $0xd8] sm:$0xff] }
 0x137   : > { %1454 = vst.msk [vmem:[%s2047_s8 + $0xb0] sm:$0xff] %vm1431_vm2, %v1389_v0  ;;  %1486 = vst.msk [vmem:[%s2047_s8 + $0x1b0] sm:$0xff] %vm1431_vm2, %v1421_v1  ;;  %v1390_v14 = vmul.f32 %v1326_v50, %v1262_v62  ;;  %v1422_v18 = vmul.f32 %v1358_v51, %v1294_v63  ;;  %v1002_v15 = vmul.f32 %v2283_v46, %v1996_v40  ;;  %v1362_v53 = vld [vmem:[%s2019_s29 + $0x1d8] sm:$0xff] }
 0x138   : > { %v1034_v19 = vmul.f32 %v2285_v47, %v1996_v40  ;;  %1452 = vst.msk [vmem:[%s2047_s8 + $0xa0] sm:$0xff] %vm1431_vm2, %v1387_v16  ;;  %1484 = vst.msk [vmem:[%s2047_s8 + $0x1a0] sm:$0xff] %vm1431_vm2, %v1419_v54  ;;  %v1388_v20 = vmul.f32 %v1324_v8, %v1260_v55  ;;  %v1420_v60 = vmul.f32 %v1356_v9, %v1292_v17  ;;  %v1328_v9 = vld [vmem:[%s2019_s29 + $0xc8] sm:$0xff] }
 0x139   : > { %v1000_v24 = vmul.f32 %v1996_v40, %v2289_v56  ;;  %v1032_v46 = vmul.f32 %v1996_v40, %v2291_v57  ;;  %1455 = vst.msk [vmem:[%s2047_s8 + $0xb8] sm:$0xff] %vm1431_vm2, %v1390_v14  ;;  %1487 = vst.msk [vmem:[%s2047_s8 + $0x1b8] sm:$0xff] %vm1431_vm2, %v1422_v18  ;;  %v1073_v47 = vadd.f32 %v2007_v42, %v1002_v15  ;;  %v1360_v16 = vld [vmem:[%s2019_s29 + $0x1c8] sm:$0xff] }
 0x13a   : > { %v1105_v25 = vadd.f32 %v2007_v42, %v1034_v19  ;;  %v1003_v27 = vmul.f32 %v2293_v2, %v1996_v40  ;;  %v1035_v56 = vmul.f32 %v2295_v3, %v1996_v40  ;;  %1453 = vst.msk [vmem:[%s2047_s8 + $0xa8] sm:$0xff] %vm1431_vm2, %v1388_v20  ;;  %1485 = vst.msk [vmem:[%s2047_s8 + $0x1a8] sm:$0xff] %vm1431_vm2, %v1420_v60 }
 0x13b   : > { %v1071_v57 = vadd.f32 %v2007_v42, %v1000_v24  ;;  %v1103_v5 = vadd.f32 %v2007_v42, %v1032_v46  ;;  %v1001_v30 = vmul.f32 %v1996_v40, %v2305_v10  ;;  %v1033_v2 = vmul.f32 %v1996_v40, %v2307_v11  ;;  %v1173_v24 = vld [vmem:[%s2002_s24 + $0x1f0] sm:$0xff]  ;;  %v1844_v46 = vld [vmem:[%s2498_s2] ss:$0 sm:$0xff] }
 0x13c   : > { %v1201_v3 = vadd.f32 %v1137_v61, %v1073_v47  ;;  %v1233_v31 = vadd.f32 %v1169_v21, %v1105_v25  ;;  %v1074_v22 = vadd.f32 %v2007_v42, %v1003_v27  ;;  %v1106_v32 = vadd.f32 %v2007_v42, %v1035_v56  ;;  %v1141_v21 = vld [vmem:[%s2002_s24 + $0xf0] sm:$0xff] }
 0x13d   : > { %v1199_v36 = vadd.f32 %v1135_v26, %v1071_v57  ;;  %v1231_v37 = vadd.f32 %v1167_v4, %v1103_v5  ;;  %v1072_v10 = vadd.f32 %v2007_v42, %v1001_v30  ;;  %v1104_v38 = vadd.f32 %v2007_v42, %v1033_v2  ;;  %v1139_v26 = vld [vmem:[%s2002_s24 + $0xe0] sm:$0xff]  ;;  %v1142_v57 = vld [vmem:[%s2002_s24 + $0xf8] sm:$0xff] }
 0x13e   : > { %v1265_v11 = vmax.f32 %v1201_v3, 0.0  ;;  %v1297_v39 = vmax.f32 %v1233_v31, 0.0  ;;  %v1202_v48 = vadd.f32 %v1138_v28, %v1074_v22  ;;  %v1234_v49 = vadd.f32 %v1170_v29, %v1106_v32  ;;  %v1171_v4 = vld [vmem:[%s2002_s24 + $0x1e0] sm:$0xff]  ;;  %v1174_v5 = vld [vmem:[%s2002_s24 + $0x1f8] sm:$0xff]  ;;  %v1172_v31 = vld [vmem:[%s2002_s24 + $0x1e8] sm:$0xff] }
 0x13f   : > { %v1263_v50 = vmax.f32 %v1199_v36, 0.0  ;;  %v1295_v51 = vmax.f32 %v1231_v37, 0.0  ;;  %v1200_v0 = vadd.f32 %v1136_v23, %v1072_v10  ;;  %v1232_v1 = vadd.f32 %v1168_v33, %v1104_v38  ;;  %v1333_v22 = vld [vmem:[%s2019_s29 + $0xf0] sm:$0xff]  ;;  %v1363_v37 = vld [vmem:[%s2019_s29 + $0x1e0] sm:$0xff] }
 0x140   : > { %v1393_v62 = vmul.f32 %v1329_v12, %v1265_v11  ;;  %v1425_v63 = vmul.f32 %v1361_v13, %v1297_v39  ;;  %v1266_v42 = vmax.f32 %v1202_v48, 0.0  ;;  %v1298_v8 = vmax.f32 %v1234_v49, 0.0  ;;  %v1365_v32 = vld [vmem:[%s2019_s29 + $0x1f0] sm:$0xff] }
 0x141   : > { %v1391_v54 = vmul.f32 %v1327_v41, %v1263_v50  ;;  %v1423_v55 = vmul.f32 %v1359_v43, %v1295_v51  ;;  %v1264_v17 = vmax.f32 %v1200_v0, 0.0  ;;  %v1296_v14 = vmax.f32 %v1232_v1, 0.0  ;;  %v1334_v41 = vld [vmem:[%s2019_s29 + $0xf8] sm:$0xff]  ;;  %v1332_v0 = vld [vmem:[%s2019_s29 + $0xe8] sm:$0xff] }
 0x142   : > { %1458 = vst.msk [vmem:[%s2047_s8 + $0xd0] sm:$0xff] %vm1431_vm2, %v1393_v62  ;;  %1490 = vst.msk [vmem:[%s2047_s8 + $0x1d0] sm:$0xff] %vm1431_vm2, %v1425_v63  ;;  %v1394_v18 = vmul.f32 %v1330_v52, %v1266_v42  ;;  %v1426_v15 = vmul.f32 %v1362_v53, %v1298_v8  ;;  %v1006_v19 = vmul.f32 %v2351_v34, %v1996_v40  ;;  %v1366_v43 = vld [vmem:[%s2019_s29 + $0x1f8] sm:$0xff]  ;;  %v1364_v1 = vld [vmem:[%s2019_s29 + $0x1e8] sm:$0xff] }
 0x143   : > { %v1038_v20 = vmul.f32 %v2353_v35, %v1996_v40  ;;  %1456 = vst.msk [vmem:[%s2047_s8 + $0xc0] sm:$0xff] %vm1431_vm2, %v1391_v54  ;;  %1488 = vst.msk [vmem:[%s2047_s8 + $0x1c0] sm:$0xff] %vm1431_vm2, %v1423_v55  ;;  %v1392_v60 = vmul.f32 %v1328_v9, %v1264_v17  ;;  %v1424_v61 = vmul.f32 %v1360_v16, %v1296_v14  ;;  %v1845_v35 = vld [vmem:[%s2499_s3] ss:$0 sm:$0xff] }
 0x144   : > { %v1004_v34 = vmul.f32 %v1844_v46, %v2357_v44  ;;  %v1036_v40 = vmul.f32 %v1844_v46, %v2359_v45  ;;  %1459 = vst.msk [vmem:[%s2047_s8 + $0xd8] sm:$0xff] %vm1431_vm2, %v1394_v18  ;;  %1491 = vst.msk [vmem:[%s2047_s8 + $0x1d8] sm:$0xff] %vm1431_vm2, %v1426_v15  ;;  %v1077_v47 = vadd.f32 %v1845_v35, %v1006_v19 }
 0x145   : > { %v1109_v25 = vadd.f32 %v1845_v35, %v1038_v20  ;;  %v1007_v27 = vmul.f32 %v1844_v46, %v2363_v58  ;;  %v1039_v44 = vmul.f32 %v1844_v46, %v2365_v59  ;;  %1457 = vst.msk [vmem:[%s2047_s8 + $0xc8] sm:$0xff] %vm1431_vm2, %v1392_v60  ;;  %1489 = vst.msk [vmem:[%s2047_s8 + $0x1c8] sm:$0xff] %vm1431_vm2, %v1424_v61  ;;  %v1140_v59 = vld [vmem:[%s2002_s24 + $0xe8] sm:$0xff] }
 0x146   : > { %v1075_v45 = vadd.f32 %v1845_v35, %v1004_v34  ;;  %v1107_v56 = vadd.f32 %v1845_v35, %v1036_v40  ;;  %v1005_v28 = vmul.f32 %v1844_v46, %v2369_v6  ;;  %v1037_v29 = vmul.f32 %v1844_v46, %v2371_v7  ;;  %v1331_v7 = vld [vmem:[%s2019_s29 + $0xe0] sm:$0xff] }
 0x147   : > { %v1205_v30 = vadd.f32 %v1141_v21, %v1077_v47  ;;  %v1237_v58 = vadd.f32 %v1173_v24, %v1109_v25  ;;  %v1078_v2 = vadd.f32 %v1845_v35, %v1007_v27  ;;  %v1110_v3 = vadd.f32 %v1845_v35, %v1039_v44 }
 0x148   : > { %v1203_v23 = vadd.f32 %v1139_v26, %v1075_v45  ;;  %v1235_v33 = vadd.f32 %v1171_v4, %v1107_v56  ;;  %v1076_v12 = vadd.f32 %v1845_v35, %v1005_v28  ;;  %v1108_v13 = vadd.f32 %v1845_v35, %v1037_v29 }
 0x149   : > { %v1269_v36 = vmax.f32 %v1205_v30, 0.0  ;;  %v1301_v6 = vmax.f32 %v1237_v58, 0.0  ;;  %v1206_v10 = vadd.f32 %v1142_v57, %v1078_v2  ;;  %v1238_v38 = vadd.f32 %v1174_v5, %v1110_v3 }
 0x14a   : > { %v1267_v11 = vmax.f32 %v1203_v23, 0.0  ;;  %v1299_v39 = vmax.f32 %v1235_v33, 0.0  ;;  %v1204_v48 = vadd.f32 %v1140_v59, %v1076_v12  ;;  %v1236_v49 = vadd.f32 %v1172_v31, %v1108_v13 }
 0x14b   : > { %v1397_v50 = vmul.f32 %v1333_v22, %v1269_v36  ;;  %v1429_v51 = vmul.f32 %v1365_v32, %v1301_v6  ;;  %v1270_v52 = vmax.f32 %v1206_v10, 0.0  ;;  %v1302_v53 = vmax.f32 %v1238_v38, 0.0 }
 0x14c   : > { %v1395_v62 = vmul.f32 %v1331_v7, %v1267_v11  ;;  %v1427_v63 = vmul.f32 %v1363_v37, %v1299_v39  ;;  %v1268_v42 = vmax.f32 %v1204_v48, 0.0  ;;  %v1300_v8 = vmax.f32 %v1236_v49, 0.0 }
 0x14d   : > { %1462 = vst.msk [vmem:[%s2047_s8 + $0xf0] sm:$0xff] %vm1431_vm2, %v1397_v50  ;;  %1494 = vst.msk [vmem:[%s2047_s8 + $0x1f0] sm:$0xff] %vm1431_vm2, %v1429_v51  ;;  %v1398_v9 = vmul.f32 %v1334_v41, %v1270_v52  ;;  %v1430_v16 = vmul.f32 %v1366_v43, %v1302_v53 }
 0x14e   : > { %1460 = vst.msk [vmem:[%s2047_s8 + $0xe0] sm:$0xff] %vm1431_vm2, %v1395_v62  ;;  %1492 = vst.msk [vmem:[%s2047_s8 + $0x1e0] sm:$0xff] %vm1431_vm2, %v1427_v63  ;;  %v1396_v54 = vmul.f32 %v1332_v0, %v1268_v42  ;;  %v1428_v55 = vmul.f32 %v1364_v1, %v1300_v8 }
 0x14f   : > { %1463 = vst.msk [vmem:[%s2047_s8 + $0xf8] sm:$0xff] %vm1431_vm2, %v1398_v9  ;;  %1495 = vst.msk [vmem:[%s2047_s8 + $0x1f8] sm:$0xff] %vm1431_vm2, %v1430_v16 }
 0x150   : > { %1461 = vst.msk [vmem:[%s2047_s8 + $0xe8] sm:$0xff] %vm1431_vm2, %v1396_v54  ;;  %1493 = vst.msk [vmem:[%s2047_s8 + $0x1e8] sm:$0xff] %vm1431_vm2, %v1428_v55 }
 0x151 PF: > { %s16_s21 = sadd.s32 1, %s1852_s21  }
 0x152   : > { %p13_p4 = scmp.ge.s32.totalorder %s16_s21, 4  }
 0x154   :  { %15 = sbr.rel (!%p13_p4) target bundleno = 1 (0x1), region = 80 }

// kernel: interactive_hnn_forward.12
= control target key start
LH: loop header
LB: loop body
LE: loop exit
PB: predicated region body
PF: predicated region fallthrough
CT: control target
= control target key end

     0   :  { %s1009_s30 = smov 0   ;;  %s1120_s0 = inlined_call_operand.vmem [shape: bf16[128,108], index: 0, kind: input, shape index: {}]   ;;  %s1121_s1 = inlined_call_operand.vmem [shape: bf16[108,8], index: 1, kind: input, shape index: {}]   ;;  %s1122_s2 = inlined_call_operand.vmem [shape: f32[1,8], index: 2, kind: input, shape index: {}]   ;;  %s1123_s3 = inlined_call_operand.vmem [shape: f32[1,8], index: 3, kind: input, shape index: {}]   ;;  %s1124_s4 = inlined_call_operand.vmem [shape: bf16[128,4], index: 4, kind: input, shape index: {}]   ;;  %s1125_s5 = inlined_call_operand.vmem [shape: bf16[4,8], index: 5, kind: input, shape index: {}]   ;;  %s1126_s6 = inlined_call_operand.vmem [shape: f32[1,8], index: 6, kind: input, shape index: {}]   ;;  %s1127_s7 = inlined_call_operand.vmem [shape: f32[1,8], index: 7, kind: input, shape index: {}]   ;;  %s1128_s8 = inlined_call_operand.vmem [shape: f32[128,8], index: 8, kind: output, shape index: {0}]   ;;  %s1129_s9 = inlined_call_operand.vmem [shape: f32[128,8], index: 9, kind: output, shape index: {1}]  }
   0x1 LB: > { %s836_s10 = sadd.s32 4294967295, %s957_s30   ;;  %p840_p0 = scmp.ge.s32.totalorder %s957_s30, 1  ;;  %s957_s30 = sphi %s1009_s30, %s20_s30  }
   0x2   : > { %p302_p1 = scmp.lt.s32.totalorder %s957_s30, 3 }
   0x4   : > { %p303_p2 = pnand %p840_p0, %p302_p1 }
   0x5   : > { %v936_v0 = vld [vmem:[%s1121_s1] sm:$0xff] (!%p303_p2)   ;;  %v937_v1 = vld [vmem:[%s1121_s1 + $0x8] sm:$0xff] (!%p303_p2)   ;;  %s841_s15 = sshll.u32 (!%p303_p2), %s836_s10, 3  ;;  %v938_v2 = vld [vmem:[%s1121_s1 + $0x10] sm:$0xff] (!%p303_p2)   ;;  %vm627_vm0 = vcmask (!%p303_p2), 1041408   ;;  %vm614_vm1 = vcmask (!%p303_p2), 31744  }
   0x6   : > { %306 = sbr.rel (%p303_p2) target bundleno = 264 (0x108), region = 52  ;;  %894 = vmatprep.subr.bf16.mxu0 (!%p303_p2), %v936_v0  ;;  %p349_p3 = scmp.lt.s32.totalorder (!%p303_p2), %s841_s15, 15  ;;  %v593_v3 = vld [vmem:[%s1125_s5] sm:$0x3] (!%p303_p2)  ;;  %v939_v5 = vld [vmem:[%s1121_s1 + $0x18] sm:$0xff] (!%p303_p2)   ;;  %vm456_vm2 = vcmask (!%p303_p2), 883712  }
   0x7   : > { %895 = vmatpush3.bf16.msra.mxu0 (!%p303_p2), %v936_v0  ;;  %927 = vmatprep.subr.msk.bf16.mxu1 (!%p303_p2), %vm627_vm0, %v593_v3  ;;  %v629_v4 = vsel (!%p303_p2), %vm627_vm0, %v593_v3, 0  ;;  %v940_v9 = vld [vmem:[%s1121_s1 + $0x20] sm:$0xff] (!%p303_p2)   ;;  %v941_v11 = vld [vmem:[%s1121_s1 + $0x28] sm:$0xff] (!%p303_p2)   ;;  %v942_v13 = vld [vmem:[%s1121_s1 + $0x30] sm:$0x3f] (!%p303_p2)   ;;  %vm469_vm3 = vcmask (!%p303_p2), 1045504  }
   0x8   : > { %896 = vmatprep.subr.bf16.mxu0 (!%p303_p2), %v937_v1  ;;  %917 = vmatpush3.bf16.msra.mxu1 (!%p303_p2), %v629_v4  ;;  %v471_v14 = vsel (!%p303_p2), %vm469_vm3, %v942_v13, 0  ;;  %v874_v18 = vld [vmem:[%s1126_s6] ss:$0 sm:$0xff] (!%p303_p2)  ;;  %vm576_vm4 = vcmask (!%p303_p2), 64512  }
   0x9   : > { %v875_v20 = vld [vmem:[%s1127_s7] ss:$0 sm:$0xff] (!%p303_p2) }
   0xa   : > { %v864_v44 = vld [vmem:[%s1122_s2] ss:$0 sm:$0xff] (!%p303_p2) }
   0xb   : > { %897 = vmatpush3.bf16.msra.mxu0 (!%p303_p2), %v937_v1  ;;  %v865_v46 = vld [vmem:[%s1123_s3] ss:$0 sm:$0xff] (!%p303_p2) }
   0xc   : > { %898 = vmatprep.subr.bf16.mxu0 (!%p303_p2), %v938_v2 }
   0xd   : > { %s1131_s15 = smov (!%p349_p3, %s841_s15), 15 }
   0xe   : > { %s842_s20 = sshll.u32 %s1131_s15, 2  ;;  %s846_s18 = sshll.u32 %s1131_s15, 3 }
   0xf   : > { %s358_s25 = scalar_lea.vmem %s1124_s4, %s842_s20  ;;  %s352_s28 = scalar_lea.vmem %s1120_s0, %s842_s20  ;;  %899 = vmatpush3.bf16.msra.mxu0 %v938_v2 }
  0x10   : > { %v943_v6 = vld [vmem:[%s358_s25] sm:$0xff]   ;;  %v945_v8 = vld [vmem:[%s358_s25 + $0x8] sm:$0xff]   ;;  %900 = vmatprep.subr.bf16.mxu0 %v939_v5  ;;  %v947_v10 = vld [vmem:[%s358_s25 + $0x10] sm:$0xff]   ;;  %s1070_s23 = scalar_lea.vmem %s1129_s9, %s846_s18  ;;  %s1099_s10 = scalar_lea.vmem %s1128_s8, %s846_s18 }
  0x11   : > { %v944_v7 = vld [vmem:[%s352_s28] sm:$0xff]   ;;  %918 = vmatprep.mubr.msk.bf16.mxu1 %vm614_vm1, %v943_v6  ;;  %v949_v12 = vld [vmem:[%s358_s25 + $0x18] sm:$0xff]   ;;  %v946_v15 = vld [vmem:[%s352_s28 + $0x8] sm:$0xff]  }
  0x12   : > { %908 = vmatprep.mubr.msk.bf16.mxu0 %vm456_vm2, %v944_v7  ;;  %919 = vmatmul.mubr.msk.bf16.vlgmr.msra.gmra.mrb[0].mxu1 %vm614_vm1, %v945_v8  ;;  %v948_v16 = vld [vmem:[%s352_s28 + $0x10] sm:$0xff]   ;;  %v950_v17 = vld [vmem:[%s352_s28 + $0x18] sm:$0xff]  }
  0x13   : > { %901 = vmatpush3.bf16.msra.mxu0 %v939_v5  ;;  %922 = vmatprep.mubr.msk.bf16.mxu1 %vm614_vm1, %v947_v10 }
  0x14   : > { %902 = vmatprep.subr.bf16.mxu0 %v940_v9 }
  0x17   : > { %903 = vmatpush3.bf16.msra.mxu0 %v940_v9 }
  0x18   : > { %904 = vmatprep.subr.bf16.mxu0 %v941_v11 }
  0x1a   : > { %923 = vmatmul.mubr.msk.bf16.gmra.mrb[4].mxu1 %vm614_vm1, %v949_v12 }
  0x1b   : > { %905 = vmatpush3.bf16.msra.mxu0 %v941_v11 }
  0x1c   : > { %926 = vmatprep.subr.msk.bf16.mxu0 %vm469_vm3, %v942_v13 }
  0x1f   : > { %907 = vmatpush3.bf16.msra.mxu0 %v471_v14 }
  0x22   : > { %909 = vmatmul.mubr.msk.bf16.vlgmr.msra.gmra.mrb[0].mxu0 %vm456_vm2, %v946_v15 }
  0x23   : > { %912 = vmatprep.mubr.msk.bf16.mxu0 %vm456_vm2, %v948_v16 }
  0x2a   : > { %913 = vmatmul.mubr.msk.bf16.gmra.mrb[4].mxu0 %vm456_vm2, %v950_v17 }
  0xe5   : > { %v920_v19 = vpop.f32.mrb[0].mxu1 }
  0xe6   : > { %v705_v21 = vmul.f32 %v920_v19, %v874_v18  ;;  %v665_v22 = vpop.f32.mrb[1].mxu1 }
  0xe7   : > { %v703_v23 = vmul.f32 %v874_v18, %v665_v22  ;;  %v921_v24 = vpop.f32.mrb[2].mxu1 }
  0xe8   : > { %v720_v25 = vadd.f32 %v875_v20, %v705_v21  ;;  %v706_v26 = vmul.f32 %v921_v24, %v874_v18  ;;  %v668_v27 = vpop.f32.mrb[3].mxu1 }
  0xe9   : > { %v718_v28 = vadd.f32 %v875_v20, %v703_v23  ;;  %v704_v29 = vmul.f32 %v874_v18, %v668_v27 }
  0xea   : > { %728 = vst.msk [vmem:[%s1070_s23 + $0x10] sm:$0xff] %vm576_vm4, %v720_v25  ;;  %v721_v30 = vadd.f32 %v875_v20, %v706_v26 }
  0xeb   : > { %726 = vst.msk [vmem:[%s1070_s23] sm:$0xff] %vm576_vm4, %v718_v28  ;;  %v719_v31 = vadd.f32 %v875_v20, %v704_v29 }
  0xec   : > { %729 = vst.msk [vmem:[%s1070_s23 + $0x18] sm:$0xff] %vm576_vm4, %v721_v30 }
  0xed   : > { %727 = vst.msk [vmem:[%s1070_s23 + $0x8] sm:$0xff] %vm576_vm4, %v719_v31  ;;  %v924_v32 = vpop.f32.mrb[4].mxu1 }
  0xee   : > { %v709_v33 = vmul.f32 %v924_v32, %v874_v18  ;;  %v681_v34 = vpop.f32.mrb[5].mxu1 }
  0xef   : > { %v707_v35 = vmul.f32 %v874_v18, %v681_v34  ;;  %v925_v36 = vpop.f32.mrb[6].mxu1 }
  0xf0   : > { %v724_v37 = vadd.f32 %v875_v20, %v709_v33  ;;  %v710_v38 = vmul.f32 %v925_v36, %v874_v18  ;;  %v684_v39 = vpop.f32.mrb[7].mxu1 }
  0xf1   : > { %v722_v40 = vadd.f32 %v875_v20, %v707_v35  ;;  %v708_v41 = vmul.f32 %v874_v18, %v684_v39 }
  0xf2   : > { %732 = vst.msk [vmem:[%s1070_s23 + $0x30] sm:$0xff] %vm576_vm4, %v724_v37  ;;  %v725_v42 = vadd.f32 %v875_v20, %v710_v38 }
  0xf3   : > { %730 = vst.msk [vmem:[%s1070_s23 + $0x20] sm:$0xff] %vm576_vm4, %v722_v40  ;;  %v723_v43 = vadd.f32 %v875_v20, %v708_v41 }
  0xf4   : > { %733 = vst.msk [vmem:[%s1070_s23 + $0x38] sm:$0xff] %vm576_vm4, %v725_v42 }
  0xf5   : > { %731 = vst.msk [vmem:[%s1070_s23 + $0x28] sm:$0xff] %vm576_vm4, %v723_v43  ;;  %v910_v45 = vpop.f32.mrb[0].mxu0 }
  0xf6   : > { %v547_v47 = vmul.f32 %v910_v45, %v864_v44  ;;  %v507_v48 = vpop.f32.mrb[1].mxu0 }
  0xf7   : > { %v545_v49 = vmul.f32 %v864_v44, %v507_v48  ;;  %v911_v50 = vpop.f32.mrb[2].mxu0 }
  0xf8   : > { %v562_v51 = vadd.f32 %v865_v46, %v547_v47  ;;  %v548_v52 = vmul.f32 %v911_v50, %v864_v44  ;;  %v510_v53 = vpop.f32.mrb[3].mxu0 }
  0xf9   : > { %v560_v54 = vadd.f32 %v865_v46, %v545_v49  ;;  %v546_v55 = vmul.f32 %v864_v44, %v510_v53 }
  0xfa   : > { %v570_v56 = vmax.f32 %v562_v51, 0.0  ;;  %v563_v57 = vadd.f32 %v865_v46, %v548_v52 }
  0xfb   : > { %v568_v58 = vmax.f32 %v560_v54, 0.0  ;;  %v561_v59 = vadd.f32 %v865_v46, %v546_v55 }
  0xfc   : > { %579 = vst.msk [vmem:[%s1099_s10 + $0x10] sm:$0xff] %vm576_vm4, %v570_v56  ;;  %v571_v60 = vmax.f32 %v563_v57, 0.0 }
  0xfd   : > { %577 = vst.msk [vmem:[%s1099_s10] sm:$0xff] %vm576_vm4, %v568_v58  ;;  %v569_v61 = vmax.f32 %v561_v59, 0.0  ;;  %v914_v62 = vpop.f32.mrb[4].mxu0 }
  0xfe   : > { %580 = vst.msk [vmem:[%s1099_s10 + $0x18] sm:$0xff] %vm576_vm4, %v571_v60  ;;  %v551_v63 = vmul.f32 %v914_v62, %v864_v44  ;;  %v523_v0 = vpop.f32.mrb[5].mxu0 }
  0xff   : > { %578 = vst.msk [vmem:[%s1099_s10 + $0x8] sm:$0xff] %vm576_vm4, %v569_v61  ;;  %v549_v1 = vmul.f32 %v864_v44, %v523_v0  ;;  %v915_v2 = vpop.f32.mrb[6].mxu0 }
 0x100   : > { %v566_v3 = vadd.f32 %v865_v46, %v551_v63  ;;  %v552_v4 = vmul.f32 %v915_v2, %v864_v44  ;;  %v526_v5 = vpop.f32.mrb[7].mxu0 }
 0x101   : > { %v564_v6 = vadd.f32 %v865_v46, %v549_v1  ;;  %v550_v7 = vmul.f32 %v864_v44, %v526_v5 }
 0x102   : > { %v574_v8 = vmax.f32 %v566_v3, 0.0  ;;  %v567_v9 = vadd.f32 %v865_v46, %v552_v4 }
 0x103   : > { %v572_v10 = vmax.f32 %v564_v6, 0.0  ;;  %v565_v11 = vadd.f32 %v865_v46, %v550_v7 }
 0x104   : > { %583 = vst.msk [vmem:[%s1099_s10 + $0x30] sm:$0xff] %vm576_vm4, %v574_v8  ;;  %v575_v12 = vmax.f32 %v567_v9, 0.0 }
 0x105   : > { %581 = vst.msk [vmem:[%s1099_s10 + $0x20] sm:$0xff] %vm576_vm4, %v572_v10  ;;  %v573_v13 = vmax.f32 %v565_v11, 0.0 }
 0x106   : > { %584 = vst.msk [vmem:[%s1099_s10 + $0x38] sm:$0xff] %vm576_vm4, %v575_v12 }
 0x107   : > { %582 = vst.msk [vmem:[%s1099_s10 + $0x28] sm:$0xff] %vm576_vm4, %v573_v13 }
 0x108 PF: > { %s20_s30 = sadd.s32 1, %s957_s30  }
 0x109   : > { %p17_p4 = scmp.ge.s32.totalorder %s20_s30, 4  }
 0x10b   :  { %19 = sbr.rel (!%p17_p4) target bundleno = 1 (0x1), region = 97 }

// kernel: interactive_hnn_forward.13
= control target key start
LH: loop header
LB: loop body
LE: loop exit
PB: predicated region body
PF: predicated region fallthrough
CT: control target
= control target key end

     0   :  { %s848_s21 = smov 0   ;;  %s1005_s0 = inlined_call_operand.vmem [shape: bf16[128,216], index: 0, kind: input, shape index: {}]   ;;  %s1006_s1 = inlined_call_operand.vmem [shape: bf16[216,8], index: 1, kind: input, shape index: {}]   ;;  %s1007_s2 = inlined_call_operand.vmem [shape: f32[1,8], index: 2, kind: input, shape index: {}]   ;;  %s1008_s3 = inlined_call_operand.vmem [shape: f32[1,8], index: 3, kind: input, shape index: {}]   ;;  %s1009_s4 = inlined_call_operand.vmem [shape: f32[128,8], index: 4, kind: input, shape index: {}]   ;;  %s1010_s5 = inlined_call_operand.vmem [shape: f32[128,8], index: 5, kind: input, shape index: {}]   ;;  %s1011_s6 = inlined_call_operand.vmem [shape: f32[128,8], index: 6, kind: output, shape index: {}]  }
   0x1 LB: > { %s696_s22 = sadd.s32 4294967295, %s810_s21   ;;  %p700_p0 = scmp.ge.s32.totalorder %s810_s21, 1  ;;  %s810_s21 = sphi %s848_s21, %s16_s21  }
   0x2   : > { %p236_p1 = scmp.lt.s32.totalorder %s810_s21, 3 }
   0x4   : > { %p237_p2 = pnand %p700_p0, %p236_p1 }
   0x5   : > { %v778_v0 = vld [vmem:[%s1006_s1] sm:$0xff] (!%p237_p2)   ;;  %v812_v1 = vmov (!%p237_p2), 0   ;;  %v779_v2 = vld [vmem:[%s1006_s1 + $0x8] sm:$0xff] (!%p237_p2)   ;;  %s701_s27 = sshll.u32 (!%p237_p2), %s696_s22, 3  ;;  %v780_v3 = vld [vmem:[%s1006_s1 + $0x10] sm:$0xff] (!%p237_p2)   ;;  %vm455_vm0 = vcmask (!%p237_p2), 719872  }
   0x6   : > { %240 = sbr.rel (%p237_p2) target bundleno = 296 (0x128), region = 44  ;;  %472 = vmatprep.subr.bf16.mxu0 (!%p237_p2), %v812_v1  ;;  %741 = vmatprep.subr.bf16.mxu1 (!%p237_p2), %v812_v1  ;;  %p278_p3 = scmp.lt.s32.totalorder (!%p237_p2), %s701_s27, 15  ;;  %v781_v4 = vld [vmem:[%s1006_s1 + $0x18] sm:$0xff] (!%p237_p2)   ;;  %v782_v5 = vld [vmem:[%s1006_s1 + $0x20] sm:$0xff] (!%p237_p2)   ;;  %v783_v8 = vld [vmem:[%s1006_s1 + $0x28] sm:$0xff] (!%p237_p2)   ;;  %vm468_vm1 = vcmask (!%p237_p2), 1043456  }
   0x7   : > { %473 = vmatpush1.bf16.msra.mxu0 (!%p237_p2), %v778_v0  ;;  %755 = vmatpush1.bf16.msra.mxu1 (!%p237_p2), %v778_v0  ;;  %v784_v9 = vld [vmem:[%s1006_s1 + $0x30] sm:$0xff] (!%p237_p2)   ;;  %v785_v10 = vld [vmem:[%s1006_s1 + $0x38] sm:$0xff] (!%p237_p2)   ;;  %v786_v11 = vld [vmem:[%s1006_s1 + $0x40] sm:$0xff] (!%p237_p2)   ;;  %vm607_vm2 = vcmask (!%p237_p2), 64512  }
   0x8   : > { %474 = vmatprep.subr.bf16.mxu0 (!%p237_p2), %v812_v1  ;;  %742 = vmatprep.subr.bf16.mxu1 (!%p237_p2), %v812_v1  ;;  %v787_v12 = vld [vmem:[%s1006_s1 + $0x48] sm:$0xff] (!%p237_p2)   ;;  %v788_v13 = vld [vmem:[%s1006_s1 + $0x50] sm:$0xff] (!%p237_p2)   ;;  %v789_v14 = vld [vmem:[%s1006_s1 + $0x58] sm:$0xff] (!%p237_p2)  }
   0x9   : > { %v790_v15 = vld [vmem:[%s1006_s1 + $0x60] sm:$0xff] (!%p237_p2)   ;;  %v791_v16 = vld [vmem:[%s1006_s1 + $0x68] ss:$0 sps:$4 sm:$0xff] (!%p237_p2)  }
   0xa   : > { %v470_v17 = vsel (!%p237_p2), %vm468_vm1, %v791_v16, 0  ;;  %v736_v24 = vld [vmem:[%s1007_s2] ss:$0 sm:$0xff] (!%p237_p2) }
   0xb   : > { %475 = vmatpush1.bf16.msra.mxu0 (!%p237_p2), %v779_v2  ;;  %756 = vmatpush1.bf16.msra.mxu1 (!%p237_p2), %v779_v2  ;;  %v737_v26 = vld [vmem:[%s1008_s3] ss:$0 sm:$0xff] (!%p237_p2) }
   0xc   : > { %476 = vmatprep.subr.bf16.mxu0 (!%p237_p2), %v812_v1  ;;  %743 = vmatprep.subr.bf16.mxu1 (!%p237_p2), %v812_v1 }
   0xd   : > { %s1013_s27 = smov (!%p278_p3, %s701_s27), 15 }
   0xe   : > { %s871_s30 = sshll.u32 %s1013_s27, 3 }
   0xf   : > { %477 = vmatpush1.bf16.msra.mxu0 %v780_v3  ;;  %757 = vmatpush1.bf16.msra.mxu1 %v780_v3  ;;  %s882_s11 = scalar_lea.vmem %s1005_s0, %s871_s30  ;;  %s953_s15 = scalar_lea.vmem %s1009_s4, %s871_s30 }
  0x10   : > { %478 = vmatprep.subr.bf16.mxu0 %v812_v1  ;;  %744 = vmatprep.subr.bf16.mxu1 %v812_v1  ;;  %v794_v6 = vld [vmem:[%s882_s11 + $0x4] ss:$8 sps:$4 sm:$0xff]   ;;  %v792_v18 = vld [vmem:[%s882_s11] ss:$8 sps:$4 sm:$0xff]   ;;  %v798_v20 = vld [vmem:[%s882_s11 + $0x14] ss:$8 sps:$4 sm:$0xff]   ;;  %s964_s19 = scalar_lea.vmem %s1010_s5, %s871_s30  ;;  %s974_s23 = scalar_lea.vmem %s1011_s6, %s871_s30 }
  0x11   : > { %732 = vmatprep.mubr.msk.bf16.mxu0 %vm455_vm0, %v794_v6  ;;  %v797_v7 = vld [vmem:[%s882_s11 + $0x24] ss:$8 sps:$4 sm:$0xff]   ;;  %v795_v19 = vld [vmem:[%s882_s11 + $0x20] ss:$8 sps:$4 sm:$0xff]   ;;  %v800_v21 = vld [vmem:[%s882_s11 + $0x34] ss:$8 sps:$4 sm:$0xff]  }
  0x12   : > { %734 = vmatprep.mubr.msk.bf16.mxu1 %vm455_vm0, %v797_v7  ;;  %v802_v22 = vld [vmem:[%s882_s11 + $0x10] ss:$8 sps:$4 sm:$0xff]   ;;  %v567_v32 = vld [vmem:[%s953_s15] sm:$0xff]  ;;  %v568_v42 = vld [vmem:[%s953_s15 + $0x8] sm:$0xff] }
  0x13   : > { %479 = vmatpush1.bf16.msra.mxu0 %v781_v4  ;;  %758 = vmatpush1.bf16.msra.mxu1 %v781_v4  ;;  %v803_v23 = vld [vmem:[%s882_s11 + $0x30] ss:$8 sps:$4 sm:$0xff]   ;;  %v571_v33 = vld [vmem:[%s953_s15 + $0x20] sm:$0xff]  ;;  %v572_v43 = vld [vmem:[%s953_s15 + $0x28] sm:$0xff] }
  0x14   : > { %480 = vmatprep.subr.bf16.mxu0 %v812_v1  ;;  %745 = vmatprep.subr.bf16.mxu1 %v812_v1  ;;  %v591_v48 = vld [vmem:[%s964_s19] sm:$0xff]  ;;  %v592_v54 = vld [vmem:[%s964_s19 + $0x8] sm:$0xff]  ;;  %v569_v6 = vld [vmem:[%s953_s15 + $0x10] sm:$0xff] }
  0x15   : > { %v595_v49 = vld [vmem:[%s964_s19 + $0x20] sm:$0xff]  ;;  %v596_v55 = vld [vmem:[%s964_s19 + $0x28] sm:$0xff]  ;;  %v573_v7 = vld [vmem:[%s953_s15 + $0x30] sm:$0xff] }
  0x17   : > { %481 = vmatpush1.bf16.msra.mxu0 %v782_v5  ;;  %759 = vmatpush1.bf16.msra.mxu1 %v782_v5 }
  0x18   : > { %482 = vmatprep.subr.bf16.mxu0 %v812_v1  ;;  %746 = vmatprep.subr.bf16.mxu1 %v812_v1 }
  0x1b   : > { %483 = vmatpush1.bf16.msra.mxu0 %v783_v8  ;;  %760 = vmatpush1.bf16.msra.mxu1 %v783_v8 }
  0x1c   : > { %484 = vmatprep.subr.bf16.mxu0 %v812_v1  ;;  %747 = vmatprep.subr.bf16.mxu1 %v812_v1 }
  0x1f   : > { %485 = vmatpush1.bf16.msra.mxu0 %v784_v9  ;;  %761 = vmatpush1.bf16.msra.mxu1 %v784_v9 }
  0x20   : > { %486 = vmatprep.subr.bf16.mxu0 %v812_v1  ;;  %748 = vmatprep.subr.bf16.mxu1 %v812_v1 }
  0x23   : > { %487 = vmatpush1.bf16.msra.mxu0 %v785_v10  ;;  %762 = vmatpush1.bf16.msra.mxu1 %v785_v10 }
  0x24   : > { %488 = vmatprep.subr.bf16.mxu0 %v812_v1  ;;  %749 = vmatprep.subr.bf16.mxu1 %v812_v1 }
  0x27   : > { %489 = vmatpush1.bf16.msra.mxu0 %v786_v11  ;;  %763 = vmatpush1.bf16.msra.mxu1 %v786_v11 }
  0x28   : > { %490 = vmatprep.subr.bf16.mxu0 %v812_v1  ;;  %750 = vmatprep.subr.bf16.mxu1 %v812_v1 }
  0x2b   : > { %491 = vmatpush1.bf16.msra.mxu0 %v787_v12  ;;  %764 = vmatpush1.bf16.msra.mxu1 %v787_v12 }
  0x2c   : > { %492 = vmatprep.subr.bf16.mxu0 %v812_v1  ;;  %751 = vmatprep.subr.bf16.mxu1 %v812_v1 }
  0x2f   : > { %493 = vmatpush1.bf16.msra.mxu0 %v788_v13  ;;  %765 = vmatpush1.bf16.msra.mxu1 %v788_v13 }
  0x30   : > { %494 = vmatprep.subr.bf16.mxu0 %v812_v1  ;;  %752 = vmatprep.subr.bf16.mxu1 %v812_v1 }
  0x33   : > { %495 = vmatpush1.bf16.msra.mxu0 %v789_v14  ;;  %766 = vmatpush1.bf16.msra.mxu1 %v789_v14  ;;  %v570_v14 = vld [vmem:[%s953_s15 + $0x18] sm:$0xff] }
  0x34   : > { %496 = vmatprep.subr.bf16.mxu0 %v812_v1  ;;  %753 = vmatprep.subr.bf16.mxu1 %v812_v1 }
  0x37   : > { %497 = vmatpush1.bf16.msra.mxu0 %v790_v15  ;;  %767 = vmatpush1.bf16.msra.mxu1 %v790_v15  ;;  %v574_v15 = vld [vmem:[%s953_s15 + $0x38] sm:$0xff] }
  0x38   : > { %498 = vmatprep.subr.bf16.mxu0 %v812_v1  ;;  %754 = vmatprep.subr.bf16.mxu1 %v812_v1 }
  0x3b   : > { %499 = vmatpush1.bf16.msra.mxu0 %v470_v17  ;;  %768 = vmatpush1.bf16.msra.mxu1 %v470_v17 }
  0x3e   : > { %505 = vmatmul.mubr.bf16.vlgmr.msra.gmra.mrb[0].mxu0 %v792_v18  ;;  %521 = vmatmul.mubr.bf16.vlgmr.msra.gmra.mrb[0].mxu1 %v795_v19 }
  0x3f   : > { %733 = vmatprep.mubr.msk.bf16.mxu0 %vm455_vm0, %v798_v20  ;;  %735 = vmatprep.mubr.msk.bf16.mxu1 %vm455_vm0, %v800_v21  ;;  %v593_v20 = vld [vmem:[%s964_s19 + $0x10] sm:$0xff] }
  0x40   : > { %v597_v21 = vld [vmem:[%s964_s19 + $0x30] sm:$0xff] }
  0x46   : > { %513 = vmatmul.mubr.bf16.gmra.mrb[4].mxu0 %v802_v22  ;;  %529 = vmatmul.mubr.bf16.gmra.mrb[4].mxu1 %v803_v23 }
 0x111   : > { %v506_v25 = vpop.f32.mrb[0].mxu0  ;;  %v522_v27 = vpop.f32.mrb[0].mxu1 }
 0x112   : > { %v544_v28 = vmul.f32 %v736_v24, %v506_v25  ;;  %v548_v29 = vmul.f32 %v736_v24, %v522_v27  ;;  %v508_v30 = vpop.f32.mrb[1].mxu0  ;;  %v524_v31 = vpop.f32.mrb[1].mxu1  ;;  %v594_v27 = vld [vmem:[%s964_s19 + $0x18] sm:$0xff] }
 0x113   : > { %v509_v34 = vpop.f32.mrb[2].mxu0  ;;  %v525_v35 = vpop.f32.mrb[2].mxu1 }
 0x114   : > { %v559_v36 = vadd.f32 %v737_v26, %v544_v28  ;;  %v563_v37 = vadd.f32 %v737_v26, %v548_v29  ;;  %v545_v38 = vmul.f32 %v736_v24, %v509_v34  ;;  %v549_v39 = vmul.f32 %v736_v24, %v525_v35  ;;  %v511_v40 = vpop.f32.mrb[3].mxu0  ;;  %v527_v41 = vpop.f32.mrb[3].mxu1  ;;  %v598_v28 = vld [vmem:[%s964_s19 + $0x38] sm:$0xff] }
 0x116   : > { %v575_v44 = vadd.f32 %v567_v32, %v559_v36  ;;  %v579_v45 = vadd.f32 %v571_v33, %v563_v37  ;;  %v560_v46 = vadd.f32 %v737_v26, %v545_v38  ;;  %v564_v47 = vadd.f32 %v737_v26, %v549_v39 }
 0x118   : > { %v583_v50 = vmax.f32 %v575_v44, 0.0  ;;  %v587_v51 = vmax.f32 %v579_v45, 0.0  ;;  %v576_v52 = vadd.f32 %v568_v42, %v560_v46  ;;  %v580_v53 = vadd.f32 %v572_v43, %v564_v47 }
 0x119   : > { %v514_v56 = vpop.f32.mrb[4].mxu0  ;;  %v530_v57 = vpop.f32.mrb[4].mxu1 }
 0x11a   : > { %v599_v58 = vmul.f32 %v591_v48, %v583_v50  ;;  %v603_v59 = vmul.f32 %v595_v49, %v587_v51  ;;  %v584_v60 = vmax.f32 %v576_v52, 0.0  ;;  %v588_v61 = vmax.f32 %v580_v53, 0.0  ;;  %v516_v62 = vpop.f32.mrb[5].mxu0  ;;  %v532_v63 = vpop.f32.mrb[5].mxu1 }
 0x11b   : > { %v546_v0 = vmul.f32 %v736_v24, %v514_v56  ;;  %v550_v1 = vmul.f32 %v736_v24, %v530_v57  ;;  %v517_v2 = vpop.f32.mrb[6].mxu0  ;;  %v533_v3 = vpop.f32.mrb[6].mxu1 }
 0x11c   : > { %608 = vst.msk [vmem:[%s974_s23] sm:$0xff] %vm607_vm2, %v599_v58  ;;  %612 = vst.msk [vmem:[%s974_s23 + $0x20] sm:$0xff] %vm607_vm2, %v603_v59  ;;  %v600_v4 = vmul.f32 %v592_v54, %v584_v60  ;;  %v604_v5 = vmul.f32 %v596_v55, %v588_v61  ;;  %v547_v8 = vmul.f32 %v736_v24, %v517_v2  ;;  %v519_v10 = vpop.f32.mrb[7].mxu0  ;;  %v535_v11 = vpop.f32.mrb[7].mxu1 }
 0x11d   : > { %v551_v9 = vmul.f32 %v736_v24, %v533_v3  ;;  %v561_v12 = vadd.f32 %v737_v26, %v546_v0  ;;  %v565_v13 = vadd.f32 %v737_v26, %v550_v1 }
 0x11e   : > { %609 = vst.msk [vmem:[%s974_s23 + $0x8] sm:$0xff] %vm607_vm2, %v600_v4  ;;  %613 = vst.msk [vmem:[%s974_s23 + $0x28] sm:$0xff] %vm607_vm2, %v604_v5  ;;  %v562_v16 = vadd.f32 %v737_v26, %v547_v8 }
 0x11f   : > { %v566_v17 = vadd.f32 %v737_v26, %v551_v9  ;;  %v577_v18 = vadd.f32 %v569_v6, %v561_v12  ;;  %v581_v19 = vadd.f32 %v573_v7, %v565_v13 }
 0x120   : > { %v578_v22 = vadd.f32 %v570_v14, %v562_v16 }
 0x121   : > { %v582_v23 = vadd.f32 %v574_v15, %v566_v17  ;;  %v585_v24 = vmax.f32 %v577_v18, 0.0  ;;  %v589_v25 = vmax.f32 %v581_v19, 0.0 }
 0x122   : > { %v586_v29 = vmax.f32 %v578_v22, 0.0 }
 0x123   : > { %v590_v30 = vmax.f32 %v582_v23, 0.0  ;;  %v601_v31 = vmul.f32 %v593_v20, %v585_v24  ;;  %v605_v32 = vmul.f32 %v597_v21, %v589_v25 }
 0x124   : > { %v602_v33 = vmul.f32 %v594_v27, %v586_v29 }
 0x125   : > { %v606_v26 = vmul.f32 %v598_v28, %v590_v30  ;;  %610 = vst.msk [vmem:[%s974_s23 + $0x10] sm:$0xff] %vm607_vm2, %v601_v31  ;;  %614 = vst.msk [vmem:[%s974_s23 + $0x30] sm:$0xff] %vm607_vm2, %v605_v32 }
 0x126   : > { %611 = vst.msk [vmem:[%s974_s23 + $0x18] sm:$0xff] %vm607_vm2, %v602_v33 }
 0x127   : > { %615 = vst.msk [vmem:[%s974_s23 + $0x38] sm:$0xff] %vm607_vm2, %v606_v26 }
 0x128 PF: > { %s16_s21 = sadd.s32 1, %s810_s21  }
 0x129   : > { %p13_p4 = scmp.ge.s32.totalorder %s16_s21, 4  }
 0x12b   :  { %15 = sbr.rel (!%p13_p4) target bundleno = 1 (0x1), region = 80 }

// kernel: interactive_hnn_forward.14
= control target key start
LH: loop header
LB: loop body
LE: loop exit
PB: predicated region body
PF: predicated region fallthrough
CT: control target
= control target key end

     0   :  { %s835_s30 = smov 0   ;;  %s922_s0 = inlined_call_operand.vmem [shape: bf16[16,216], index: 0, kind: input, shape index: {}]   ;;  %s923_s1 = inlined_call_operand.vmem [shape: bf16[216,16], index: 1, kind: input, shape index: {}]   ;;  %s924_s2 = inlined_call_operand.vmem [shape: f32[1,16], index: 2, kind: input, shape index: {}]   ;;  %s925_s3 = inlined_call_operand.vmem [shape: f32[1,16], index: 3, kind: input, shape index: {}]   ;;  %s926_s4 = inlined_call_operand.vmem [shape: bf16[16,8], index: 4, kind: input, shape index: {}]   ;;  %s927_s5 = inlined_call_operand.vmem [shape: bf16[8,16], index: 5, kind: input, shape index: {}]   ;;  %s928_s6 = inlined_call_operand.vmem [shape: f32[1,16], index: 6, kind: input, shape index: {}]   ;;  %s929_s7 = inlined_call_operand.vmem [shape: f32[1,16], index: 7, kind: input, shape index: {}]   ;;  %s930_s8 = inlined_call_operand.vmem [shape: f32[16,16], index: 8, kind: output, shape index: {0}]   ;;  %s931_s9 = inlined_call_operand.vmem [shape: f32[16,16], index: 9, kind: output, shape index: {1}]  }
   0x1 LB: > { %s704_s10 = sadd.s32 4294967295, %s780_s30   ;;  %p708_p0 = scmp.ge.s32.totalorder %s780_s30, 1  ;;  %s780_s30 = sphi %s835_s30, %s20_s30  }
   0x2   : > { %p299_p1 = scmp.lt.s32.totalorder %s780_s30, 3 }
   0x4   : > { %p300_p2 = pnand %p708_p0, %p299_p1 }
   0x5   : > { %v758_v0 = vld [vmem:[%s923_s1] sm:$0xff] (!%p300_p2)   ;;  %v782_v1 = vmov (!%p300_p2), 0   ;;  %v759_v2 = vld [vmem:[%s923_s1 + $0x8] sm:$0xff] (!%p300_p2)   ;;  %v783_v3 = vmov (!%p300_p2), 0.0   ;;  %vm784_vm0 = vmmov (!%p300_p2), 0   ;;  %p342_p3 = scmp.lt.s32.totalorder (!%p300_p2), %s704_s10, 1 }
   0x6   : > { %303 = sbr.rel (%p300_p2) target bundleno = 281 (0x119), region = 52  ;;  %483 = vmatprep.subr.bf16.mxu0 (!%p300_p2), %v782_v1  ;;  %741 = vmatprep.subr.bf16.mxu1 (!%p300_p2), %v783_v3  ;;  %v760_v4 = vld [vmem:[%s923_s1 + $0x10] sm:$0xff] (!%p300_p2)   ;;  %v761_v5 = vld [vmem:[%s923_s1 + $0x18] sm:$0xff] (!%p300_p2)   ;;  %vm479_vm1 = vcmask (!%p300_p2), 1043456   ;;  %v543_v6 = vld [vmem:[%s927_s5] sm:$0xf] (!%p300_p2) }
   0x7   : > { %484 = vmatpush1.bf16.msra.mxu0 (!%p300_p2), %v758_v0  ;;  %743 = vmatprep.mubr.msk.bf16.mxu1 (!%p300_p2), %vm784_vm0, %v783_v3  ;;  %v762_v7 = vld [vmem:[%s923_s1 + $0x20] sm:$0xff] (!%p300_p2)   ;;  %v549_v8 = vsel (!%p300_p2), %vm479_vm1, %v543_v6, 0  ;;  %vm475_vm2 = vcmask (!%p300_p2), 719872   ;;  %vm544_vm3 = vcmask (!%p300_p2), 64512   ;;  %v763_v12 = vld [vmem:[%s923_s1 + $0x28] sm:$0xff] (!%p300_p2)   ;;  %v764_v13 = vld [vmem:[%s923_s1 + $0x30] sm:$0xff] (!%p300_p2)  }
   0x8   : > { %485 = vmatprep.subr.bf16.mxu0 (!%p300_p2), %v782_v1  ;;  %742 = vmatpush3.bf16.msra.mxu1 (!%p300_p2), %v549_v8  ;;  %v765_v14 = vld [vmem:[%s923_s1 + $0x38] sm:$0xff] (!%p300_p2)   ;;  %v766_v15 = vld [vmem:[%s923_s1 + $0x40] sm:$0xff] (!%p300_p2)   ;;  %v767_v16 = vld [vmem:[%s923_s1 + $0x48] sm:$0xff] (!%p300_p2)   ;;  %vm540_vm4 = vcmask (!%p300_p2), 130048  }
   0x9   : > { %v768_v17 = vld [vmem:[%s923_s1 + $0x50] sm:$0xff] (!%p300_p2)   ;;  %v769_v18 = vld [vmem:[%s923_s1 + $0x58] sm:$0xff] (!%p300_p2)   ;;  %v770_v19 = vld [vmem:[%s923_s1 + $0x60] sm:$0xff] (!%p300_p2)  }
   0xa   : > { %v771_v20 = vld [vmem:[%s923_s1 + $0x68] ss:$0 sps:$4 sm:$0xff] (!%p300_p2)   ;;  %v734_v23 = vld [vmem:[%s928_s6] ss:$0 sm:$0xff] (!%p300_p2) }
   0xb   : > { %486 = vmatpush1.bf16.msra.mxu0 (!%p300_p2), %v759_v2  ;;  %v481_v21 = vsel (!%p300_p2), %vm479_vm1, %v771_v20, 0  ;;  %v735_v25 = vld [vmem:[%s929_s7] ss:$0 sm:$0xff] (!%p300_p2) }
   0xc   : > { %487 = vmatprep.subr.bf16.mxu0 (!%p300_p2), %v782_v1  ;;  %v731_v31 = vld [vmem:[%s924_s2] ss:$0 sm:$0xff] (!%p300_p2) }
   0xd   : > { %s933_s10 = smov (!%p342_p3, %s704_s10), 1  ;;  %v732_v33 = vld [vmem:[%s925_s3] ss:$0 sm:$0xff] }
   0xe   : > { %s852_s17 = sshll.u32 %s933_s10, 3  ;;  %s711_s20 = sshll.u32 %s933_s10, 2 }
   0xf   : > { %488 = vmatpush1.bf16.msra.mxu0 %v760_v4  ;;  %s346_s23 = scalar_lea.vmem %s922_s0, %s852_s17  ;;  %s350_s26 = scalar_lea.vmem %s926_s4, %s711_s20 }
  0x10   : > { %489 = vmatprep.subr.bf16.mxu0 %v782_v1  ;;  %v360_v9 = vld [vmem:[%s346_s23] sm:$0xff]  ;;  %s358_s16 = scalar_lea.vmem %s931_s9, %s852_s17  ;;  %s354_s24 = scalar_lea.vmem %s930_s8, %s852_s17 }
  0x11   : > { %v715_v10 = vcombine.high %v360_v9, %v360_v9  ;;  %v542_v11 = vld [vmem:[%s350_s26] sm:$0xf]  ;;  %v714_v22 = vcombine.low %v360_v9, %v360_v9 }
  0x12   : > { %744 = vmatmul.mubr.msk.bf16.vlgmr.msra.gmra.mrb[0].mxu1 %vm544_vm3, %v542_v11 }
  0x13   : > { %490 = vmatpush1.bf16.msra.mxu0 %v761_v5  ;;  %730 = vmatprep.mubr.msk.bf16.mxu0 %vm475_vm2, %v715_v10 }
  0x14   : > { %491 = vmatprep.subr.bf16.mxu0 %v782_v1 }
  0x17   : > { %492 = vmatpush1.bf16.msra.mxu0 %v762_v7 }
  0x18   : > { %493 = vmatprep.subr.bf16.mxu0 %v782_v1 }
  0x1b   : > { %494 = vmatpush1.bf16.msra.mxu0 %v763_v12 }
  0x1c   : > { %495 = vmatprep.subr.bf16.mxu0 %v782_v1 }
  0x1f   : > { %496 = vmatpush1.bf16.msra.mxu0 %v764_v13 }
  0x20   : > { %497 = vmatprep.subr.bf16.mxu0 %v782_v1 }
  0x23   : > { %498 = vmatpush1.bf16.msra.mxu0 %v765_v14 }
  0x24   : > { %499 = vmatprep.subr.bf16.mxu0 %v782_v1 }
  0x27   : > { %500 = vmatpush1.bf16.msra.mxu0 %v766_v15 }
  0x28   : > { %501 = vmatprep.subr.bf16.mxu0 %v782_v1 }
  0x2b   : > { %502 = vmatpush1.bf16.msra.mxu0 %v767_v16 }
  0x2c   : > { %503 = vmatprep.subr.bf16.mxu0 %v782_v1 }
  0x2f   : > { %504 = vmatpush1.bf16.msra.mxu0 %v768_v17 }
  0x30   : > { %505 = vmatprep.subr.bf16.mxu0 %v782_v1 }
  0x33   : > { %506 = vmatpush1.bf16.msra.mxu0 %v769_v18 }
  0x34   : > { %507 = vmatprep.subr.bf16.mxu0 %v782_v1 }
  0x37   : > { %508 = vmatpush1.bf16.msra.mxu0 %v770_v19 }
  0x38   : > { %509 = vmatprep.subr.bf16.mxu0 %v782_v1 }
  0x3b   : > { %510 = vmatpush1.bf16.msra.mxu0 %v481_v21 }
  0x3e   : > { %516 = vmatmul.mubr.bf16.vlgmr.msra.gmra.mrb[0].mxu0 %v714_v22 }
  0xe5   : > { %v585_v24 = vpop.f32.mrb[0].mxu1 }
  0xe6   : > { %v598_v26 = vmul.f32 %v734_v23, %v585_v24  ;;  %v745_v27 = vpop.f32.mrb[1].mxu1 }
  0xe7   : > { %v588_v28 = vpop.f32.mrb[2].mxu1 }
  0xe8   : > { %v606_v29 = vadd.f32 %v735_v25, %v598_v26  ;;  %v746_v30 = vpop.f32.mrb[3].mxu1 }
  0xea   : > { %607 = vst.msk [vmem:[%s358_s16] sm:$0xff] %vm540_vm4, %v606_v29 }
 0x111   : > { %v517_v32 = vpop.f32.mrb[0].mxu0 }
 0x112   : > { %v530_v34 = vmul.f32 %v731_v31, %v517_v32  ;;  %v519_v35 = vpop.f32.mrb[1].mxu0 }
 0x113   : > { %v520_v36 = vpop.f32.mrb[2].mxu0 }
 0x114   : > { %v538_v37 = vadd.f32 %v732_v33, %v530_v34  ;;  %v521_v38 = vpop.f32.mrb[3].mxu0 }
 0x116   : > { %v539_v39 = vmax.f32 %v538_v37, 0.0 }
 0x118   : > { %541 = vst.msk [vmem:[%s354_s24] sm:$0xff] %vm540_vm4, %v539_v39 }
 0x119 PF: > { %s20_s30 = sadd.s32 1, %s780_s30  }
 0x11a   : > { %p17_p4 = scmp.ge.s32.totalorder %s20_s30, 4  }
 0x11c   :  { %19 = sbr.rel (!%p17_p4) target bundleno = 1 (0x1), region = 97 }

// kernel: interactive_hnn_forward.15
= control target key start
LH: loop header
LB: loop body
LE: loop exit
PB: predicated region body
PF: predicated region fallthrough
CT: control target
= control target key end

     0   :  { %s853_s21 = smov 0   ;;  %s982_s0 = inlined_call_operand.vmem [shape: bf16[16,432], index: 0, kind: input, shape index: {}]   ;;  %s983_s1 = inlined_call_operand.vmem [shape: bf16[432,16], index: 1, kind: input, shape index: {}]   ;;  %s984_s2 = inlined_call_operand.vmem [shape: f32[1,16], index: 2, kind: input, shape index: {}]   ;;  %s985_s3 = inlined_call_operand.vmem [shape: f32[1,16], index: 3, kind: input, shape index: {}]   ;;  %s986_s4 = inlined_call_operand.vmem [shape: f32[16,16], index: 4, kind: input, shape index: {}]   ;;  %s987_s5 = inlined_call_operand.vmem [shape: f32[16,16], index: 5, kind: input, shape index: {}]   ;;  %s988_s6 = inlined_call_operand.vmem [shape: f32[16,16], index: 6, kind: output, shape index: {}]  }
   0x1 LB: > { %s700_s22 = sadd.s32 4294967295, %s815_s21   ;;  %p704_p0 = scmp.ge.s32.totalorder %s815_s21, 1  ;;  %s815_s21 = sphi %s853_s21, %s16_s21  }
   0x2   : > { %p230_p1 = scmp.lt.s32.totalorder %s815_s21, 3 }
   0x4   : > { %p231_p2 = pnand %p704_p0, %p230_p1 }
   0x5   : > { %v778_v0 = vld [vmem:[%s983_s1 + $0x80] sm:$0xff] (!%p231_p2)   ;;  %v817_v1 = vmov (!%p231_p2), 0   ;;  %v779_v2 = vld [vmem:[%s983_s1 + $0x88] sm:$0xff] (!%p231_p2)   ;;  %v782_v5 = vld [vmem:[%s983_s1 + $0x90] sm:$0xff] (!%p231_p2)   ;;  %p267_p3 = scmp.lt.s32.totalorder (!%p231_p2), %s700_s22, 1  ;;  %vm516_vm0 = vcmask (!%p231_p2), 392192  }
   0x6   : > { %234 = sbr.rel (%p231_p2) target bundleno = 275 (0x113), region = 44  ;;  %560 = vmatprep.subr.bf16.mxu1 (!%p231_p2), %v817_v1  ;;  %v780_v3 = vld [vmem:[%s983_s1 + $0x40] sm:$0xff] (!%p231_p2)   ;;  %v783_v6 = vld [vmem:[%s983_s1 + $0x48] sm:$0xff] (!%p231_p2)   ;;  %v786_v8 = vld [vmem:[%s983_s1 + $0x50] sm:$0xff] (!%p231_p2)   ;;  %vm621_vm1 = vcmask (!%p231_p2), 130048  }
   0x7   : > { %561 = vmatpush1.bf16.msra.mxu1 (!%p231_p2), %v778_v0  ;;  %v781_v4 = vld [vmem:[%s983_s1] sm:$0xff] (!%p231_p2)   ;;  %747 = vmatprep.subr.bf16.mxu0 (!%p231_p2), %v780_v3  ;;  %v784_v7 = vld [vmem:[%s983_s1 + $0x8] sm:$0xff] (!%p231_p2)   ;;  %v787_v9 = vld [vmem:[%s983_s1 + $0x10] sm:$0xff] (!%p231_p2)  }
   0x8   : > { %562 = vmatprep.subr.bf16.mxu1 (!%p231_p2), %v817_v1  ;;  %748 = vmatpush3.bf16.msra.mxu0 (!%p231_p2), %v781_v4  ;;  %v785_v10 = vld [vmem:[%s983_s1 + $0x98] sm:$0xff] (!%p231_p2)   ;;  %v788_v12 = vld [vmem:[%s983_s1 + $0xa0] sm:$0xff] (!%p231_p2)   ;;  %v791_v15 = vld [vmem:[%s983_s1 + $0xa8] sm:$0xff] (!%p231_p2)  }
   0x9   : > { %749 = vmatprep.subr.bf16.mxu0 (!%p231_p2), %v783_v6  ;;  %v789_v11 = vld [vmem:[%s983_s1 + $0x58] sm:$0xff] (!%p231_p2)   ;;  %v792_v14 = vld [vmem:[%s983_s1 + $0x60] sm:$0xff] (!%p231_p2)   ;;  %v795_v17 = vld [vmem:[%s983_s1 + $0x68] sm:$0xff] (!%p231_p2)  }
   0xa   : > { %v790_v13 = vld [vmem:[%s983_s1 + $0x18] sm:$0xff] (!%p231_p2)   ;;  %v793_v16 = vld [vmem:[%s983_s1 + $0x20] sm:$0xff] (!%p231_p2)   ;;  %v794_v18 = vld [vmem:[%s983_s1 + $0xb0] sm:$0xff] (!%p231_p2)  }
   0xb   : > { %563 = vmatpush1.bf16.msra.mxu1 (!%p231_p2), %v779_v2  ;;  %v796_v19 = vld [vmem:[%s983_s1 + $0x28] sm:$0xff] (!%p231_p2)   ;;  %v798_v20 = vld [vmem:[%s983_s1 + $0x70] sm:$0xff] (!%p231_p2)   ;;  %v797_v21 = vld [vmem:[%s983_s1 + $0xb8] sm:$0xff] (!%p231_p2)  }
   0xc   : > { %564 = vmatprep.subr.bf16.mxu1 (!%p231_p2), %v817_v1  ;;  %750 = vmatpush3.bf16.msra.mxu0 (!%p231_p2), %v784_v7  ;;  %v799_v22 = vld [vmem:[%s983_s1 + $0x30] sm:$0xff] (!%p231_p2)   ;;  %v801_v24 = vld [vmem:[%s983_s1 + $0x78] sm:$0xff] (!%p231_p2)   ;;  %v800_v29 = vld [vmem:[%s983_s1 + $0xc0] sm:$0xff] (!%p231_p2)  }
   0xd   : > { %751 = vmatprep.subr.bf16.mxu0 %v786_v8  ;;  %s990_s22 = smov (!%p267_p3, %s700_s22), 1  ;;  %v802_v28 = vld [vmem:[%s983_s1 + $0x38] sm:$0xff]   ;;  %v805_v31 = vld [vmem:[%s983_s1 + $0xc8] sm:$0xff]   ;;  %v806_v32 = vld [vmem:[%s983_s1 + $0xd0] sm:$0xff]  }
   0xe   : > { %s746_s11 = sshll.u32 %s990_s22, 4  ;;  %s707_s13 = sshll.u32 %s990_s22, 3  ;;  %v742_v40 = vld [vmem:[%s984_s2] ss:$0 sm:$0xff] }
   0xf   : > { %565 = vmatpush1.bf16.msra.mxu1 %v782_v5  ;;  %s271_s20 = scalar_lea.vmem %s982_s0, %s746_s11  ;;  %s275_s18 = scalar_lea.vmem %s986_s4, %s707_s13  ;;  %v743_v43 = vld [vmem:[%s985_s3] ss:$0 sm:$0xff] }
  0x10   : > { %566 = vmatprep.subr.bf16.mxu1 %v817_v1  ;;  %752 = vmatpush3.bf16.msra.mxu0 %v787_v9  ;;  %v285_v23 = vld [vmem:[%s271_s20] sm:$0xff]  ;;  %v286_v26 = vld [vmem:[%s271_s20 + $0x8] sm:$0xff]  ;;  %s279_s24 = scalar_lea.vmem %s987_s5, %s707_s13  ;;  %s283_s27 = scalar_lea.vmem %s988_s6, %s707_s13 }
  0x11   : > { %753 = vmatprep.subr.bf16.mxu0 %v789_v11  ;;  %v711_v25 = vcombine.high %v285_v23, %v285_v23  ;;  %v713_v27 = vcombine.high %v286_v26, %v286_v26  ;;  %v710_v30 = vcombine.low %v285_v23, %v285_v23  ;;  %v712_v33 = vcombine.low %v286_v26, %v286_v26  ;;  %v616_v47 = vld [vmem:[%s275_s18] sm:$0xff] }
  0x12   : > { %v619_v50 = vld [vmem:[%s279_s24] sm:$0xff] }
  0x13   : > { %567 = vmatpush1.bf16.msra.mxu1 %v785_v10  ;;  %552 = vmatprep.mubr.bf16.mxu0 %v711_v25 }
  0x14   : > { %568 = vmatprep.subr.bf16.mxu1 %v817_v1  ;;  %754 = vmatpush3.bf16.msra.mxu0 %v790_v13 }
  0x15   : > { %755 = vmatprep.subr.bf16.mxu0 %v792_v14  ;;  %741 = vmatprep.mubr.msk.bf16.mxu1 %vm516_vm0, %v713_v27 }
  0x17   : > { %569 = vmatpush1.bf16.msra.mxu1 %v788_v12 }
  0x18   : > { %570 = vmatprep.subr.bf16.mxu1 %v817_v1  ;;  %756 = vmatpush3.bf16.msra.mxu0 %v793_v16 }
  0x19   : > { %757 = vmatprep.subr.bf16.mxu0 %v795_v17 }
  0x1b   : > { %571 = vmatpush1.bf16.msra.mxu1 %v791_v15 }
  0x1c   : > { %572 = vmatprep.subr.bf16.mxu1 %v817_v1  ;;  %758 = vmatpush3.bf16.msra.mxu0 %v796_v19 }
  0x1d   : > { %759 = vmatprep.subr.bf16.mxu0 %v798_v20 }
  0x1f   : > { %573 = vmatpush1.bf16.msra.mxu1 %v794_v18 }
  0x20   : > { %574 = vmatprep.subr.bf16.mxu1 %v817_v1  ;;  %760 = vmatpush3.bf16.msra.mxu0 %v799_v22 }
  0x21   : > { %761 = vmatprep.subr.bf16.mxu0 %v801_v24 }
  0x23   : > { %575 = vmatpush1.bf16.msra.mxu1 %v797_v21 }
  0x24   : > { %576 = vmatprep.subr.bf16.mxu1 %v817_v1  ;;  %762 = vmatpush3.bf16.msra.mxu0 %v802_v28 }
  0x27   : > { %577 = vmatpush1.bf16.msra.mxu1 %v800_v29  ;;  %553 = vmatmul.mubr.bf16.vlgmr.msra.gmra.mrb[0].mxu0 %v710_v30 }
  0x28   : > { %578 = vmatprep.subr.bf16.mxu1 %v817_v1 }
  0x2b   : > { %579 = vmatpush1.bf16.msra.mxu1 %v805_v31 }
  0x2c   : > { %580 = vmatprep.subr.bf16.mxu1 %v817_v1 }
  0x2f   : > { %581 = vmatpush1.bf16.msra.mxu1 %v806_v32 }
  0x32   : > { %593 = vmatmul.mubr.bf16.vlgmr.msra.gmra.mrb[0].mxu1 %v712_v33 }
  0xfa   : > { %v763_v34 = vpop.f32.mrb[0].mxu0 }
  0xfb   : > { %v764_v35 = vpop.f32.mrb[1].mxu0 }
  0xfc   : > { %v765_v36 = vadd.f32 %v764_v35, %v763_v34  ;;  %v766_v37 = vpop.f32.mrb[2].mxu0 }
  0xfd   : > { %v767_v38 = vpop.f32.mrb[3].mxu0 }
 0x105   : > { %v594_v39 = vpop.f32.mrb[0].mxu1 }
 0x106   : > { %v595_v41 = vadd.f32 %v765_v36, %v594_v39  ;;  %v596_v42 = vpop.f32.mrb[1].mxu1 }
 0x107   : > { %v597_v44 = vpop.f32.mrb[2].mxu1 }
 0x108   : > { %v607_v45 = vmul.f32 %v742_v40, %v595_v41  ;;  %v598_v46 = vpop.f32.mrb[3].mxu1 }
 0x10a   : > { %v615_v48 = vadd.f32 %v743_v43, %v607_v45 }
 0x10c   : > { %v617_v49 = vadd.f32 %v616_v47, %v615_v48 }
 0x10e   : > { %v618_v51 = vmax.f32 %v617_v49, 0.0 }
 0x110   : > { %v620_v52 = vmul.f32 %v619_v50, %v618_v51 }
 0x112   : > { %622 = vst.msk [vmem:[%s283_s27] sm:$0xff] %vm621_vm1, %v620_v52 }
 0x113 PF: > { %s16_s21 = sadd.s32 1, %s815_s21  }
 0x114   : > { %p13_p4 = scmp.ge.s32.totalorder %s16_s21, 4  }
 0x116   :  { %15 = sbr.rel (!%p13_p4) target bundleno = 1 (0x1), region = 80 }

// kernel: interactive_hnn_forward.16
= control target key start
LH: loop header
LB: loop body
LE: loop exit
PB: predicated region body
PF: predicated region fallthrough
CT: control target
= control target key end

     0   :  { %v555_v0 = vmov 0   ;;  %v556_v16 = vmov 1966171168   ;;  %v99_v18 = vlaneseq  ;;  %vm277_vm0 = vcmask 392192   ;;  %s728_s1 = inlined_call_operand.vmem [shape: bf16[432,32], index: 1, kind: input, shape index: {}]   ;;  %s729_s0 = inlined_call_operand.vmem [shape: bf16[2,432], index: 0, kind: input, shape index: {}]   ;;  %s730_s5 = inlined_call_operand.vmem [shape: bf16[16,32], index: 5, kind: input, shape index: {}]   ;;  %s731_s4 = inlined_call_operand.vmem [shape: bf16[2,16], index: 4, kind: input, shape index: {}]   ;;  %s732_s6 = inlined_call_operand.vmem [shape: f32[1,32], index: 6, kind: input, shape index: {}]   ;;  %s733_s7 = inlined_call_operand.vmem [shape: f32[1,32], index: 7, kind: input, shape index: {}]   ;;  %s734_s2 = inlined_call_operand.vmem [shape: f32[1,32], index: 2, kind: input, shape index: {}]   ;;  %s735_s3 = inlined_call_operand.vmem [shape: f32[1,32], index: 3, kind: input, shape index: {}]   ;;  %s736_s9 = inlined_call_operand.vmem [shape: f32[2,32], index: 9, kind: output, shape index: {1}]   ;;  %s737_s8 = inlined_call_operand.vmem [shape: f32[2,32], index: 8, kind: output, shape index: {0}]  }
   0x1   :  { %321 = vmatprep.subr.bf16.mxu1 %v555_v0  ;;  %v527_v1 = vld [vmem:[%s728_s1 + $0x80] sm:$0xff]   ;;  %v529_v3 = vld [vmem:[%s728_s1 + $0x88] sm:$0xff]   ;;  %v532_v6 = vld [vmem:[%s728_s1 + $0x90] sm:$0xff]   ;;  %v97_v17 = vunpack.c.l.s4 %v556_v16  ;;  %v557_v39 = vmov 0.0   ;;  %vm558_vm1 = vmmov 0   ;;  %vm389_vm2 = vcmask 130048  }
   0x2   :  { %v528_v2 = vld [vmem:[%s728_s1 + $0x40] sm:$0xff]   ;;  %322 = vmatpush1.bf16.msra.mxu1 %v527_v1  ;;  %v531_v5 = vld [vmem:[%s728_s1 + $0x48] sm:$0xff]   ;;  %v534_v8 = vld [vmem:[%s728_s1 + $0x50] sm:$0xff]   ;;  %v100_v23 = vshrl.u32 %v99_v18, 7  ;;  %vm378_vm3 = vcmask 254976  }
   0x3   :  { %323 = vmatprep.subr.bf16.mxu1 %v555_v0  ;;  %493 = vmatprep.subr.bf16.mxu0 %v528_v2  ;;  %v530_v4 = vld [vmem:[%s728_s1] sm:$0xff]   ;;  %v533_v7 = vld [vmem:[%s728_s1 + $0x8] sm:$0xff]   ;;  %v535_v9 = vld [vmem:[%s728_s1 + $0x98] sm:$0xff]   ;;  %v98_v22 = vunpack.c.0.s8 %v97_v17 }
   0x4   :  { %494 = vmatpush3.bf16.msra.mxu0 %v530_v4  ;;  %v536_v10 = vld [vmem:[%s728_s1 + $0x10] sm:$0xff]   ;;  %v537_v11 = vld [vmem:[%s728_s1 + $0x58] sm:$0xff]   ;;  %v538_v12 = vld [vmem:[%s728_s1 + $0xa0] sm:$0xff]  }
   0x5   :  { %495 = vmatprep.subr.bf16.mxu0 %v531_v5  ;;  %v539_v13 = vld [vmem:[%s728_s1 + $0x18] sm:$0xff]   ;;  %v540_v14 = vld [vmem:[%s728_s1 + $0x60] sm:$0xff]   ;;  %v541_v15 = vld [vmem:[%s728_s1 + $0xa8] sm:$0xff]   ;;  %v101_v28 = vsub.s32 %v98_v22, %v100_v23 }
   0x6   :  { %324 = vmatpush1.bf16.msra.mxu1 %v529_v3  ;;  %v542_v19 = vld [vmem:[%s728_s1 + $0x20] sm:$0xff]   ;;  %v543_v20 = vld [vmem:[%s728_s1 + $0x68] sm:$0xff]   ;;  %v544_v21 = vld [vmem:[%s728_s1 + $0xb0] sm:$0xff]  }
   0x7   :  { %325 = vmatprep.subr.bf16.mxu1 %v555_v0  ;;  %v545_v24 = vld [vmem:[%s728_s1 + $0x28] sm:$0xff]   ;;  %v546_v25 = vld [vmem:[%s728_s1 + $0x70] sm:$0xff]   ;;  %v547_v26 = vld [vmem:[%s728_s1 + $0xb8] sm:$0xff]  }
   0x8   :  { %496 = vmatpush3.bf16.msra.mxu0 %v533_v7  ;;  %v548_v27 = vld [vmem:[%s728_s1 + $0x30] sm:$0xff]   ;;  %v458_v29 = vld.sshfl [vmem:[%s729_s0] sm:$0x33 pattern:$0x75316420]  ;;  %v549_v30 = vld [vmem:[%s728_s1 + $0x78] sm:$0xff]  }
   0x9   :  { %497 = vmatprep.subr.bf16.mxu0 %v534_v8  ;;  %v95_v31 = vcombine.high %v458_v29, %v458_v29  ;;  %v551_v33 = vld [vmem:[%s728_s1 + $0x38] sm:$0xff]   ;;  %v550_v34 = vld [vmem:[%s728_s1 + $0xc0] sm:$0xff]   ;;  %v102_v36 = vrot.slane %v458_v29, %v101_v28  ;;  %v552_v38 = vld [vmem:[%s728_s1 + $0xc8] sm:$0xff]  }
   0xa   :  { %326 = vmatpush1.bf16.msra.mxu1 %v532_v6  ;;  %v553_v37 = vld [vmem:[%s730_s5] sm:$0xff]   ;;  %v554_v40 = vld [vmem:[%s728_s1 + $0xd0] sm:$0xff]  }
   0xb   :  { %327 = vmatprep.subr.bf16.mxu1 %v555_v0  ;;  %v109_v32 = vrot.slane %v95_v31, %v101_v28  ;;  %v110_v41 = vcombine.high %v102_v36, %v102_v36  ;;  %v380_v42 = vld [vmem:[%s731_s4] sm:$0x1] }
   0xc   :  { %498 = vmatpush3.bf16.msra.mxu0 %v536_v10  ;;  %v491_v48 = vld [vmem:[%s732_s6] ss:$0 sm:$0xff] }
   0xd   :  { %499 = vmatprep.subr.bf16.mxu0 %v537_v11  ;;  %v111_v35 = vcombine.high %v109_v32, %v109_v32  ;;  %313 = vmatprep.mubr.bf16.mxu0 %v109_v32  ;;  %v492_v50 = vld [vmem:[%s733_s7] ss:$0 sm:$0xff] }
   0xe   :  { %328 = vmatpush1.bf16.msra.mxu1 %v535_v9  ;;  %v487_v52 = vld [vmem:[%s734_s2] ss:$0 sm:$0xff] }
   0xf   :  { %329 = vmatprep.subr.bf16.mxu1 %v555_v0  ;;  %486 = vmatprep.mubr.msk.bf16.mxu1 %vm277_vm0, %v111_v35  ;;  %v488_v58 = vld [vmem:[%s735_s3] ss:$0 sm:$0xff] }
  0x10   :  { %500 = vmatpush3.bf16.msra.mxu0 %v539_v13 }
  0x11   :  { %501 = vmatprep.subr.bf16.mxu0 %v540_v14 }
  0x12   :  { %330 = vmatpush1.bf16.msra.mxu1 %v538_v12 }
  0x13   :  { %331 = vmatprep.subr.bf16.mxu1 %v555_v0 }
  0x14   :  { %502 = vmatpush3.bf16.msra.mxu0 %v542_v19 }
  0x15   :  { %503 = vmatprep.subr.bf16.mxu0 %v543_v20 }
  0x16   :  { %332 = vmatpush1.bf16.msra.mxu1 %v541_v15 }
  0x17   :  { %333 = vmatprep.subr.bf16.mxu1 %v555_v0 }
  0x18   :  { %504 = vmatpush3.bf16.msra.mxu0 %v545_v24 }
  0x19   :  { %505 = vmatprep.subr.bf16.mxu0 %v546_v25 }
  0x1a   :  { %334 = vmatpush1.bf16.msra.mxu1 %v544_v21 }
  0x1b   :  { %335 = vmatprep.subr.bf16.mxu1 %v555_v0 }
  0x1c   :  { %506 = vmatpush3.bf16.msra.mxu0 %v548_v27 }
  0x1d   :  { %507 = vmatprep.subr.bf16.mxu0 %v549_v30 }
  0x1e   :  { %336 = vmatpush1.bf16.msra.mxu1 %v547_v26 }
  0x1f   :  { %337 = vmatprep.subr.bf16.mxu1 %v555_v0 }
  0x20   :  { %508 = vmatpush3.bf16.msra.mxu0 %v551_v33 }
  0x21   :  { %517 = vmatprep.subr.bf16.mxu0 %v557_v39 }
  0x22   :  { %338 = vmatpush1.bf16.msra.mxu1 %v550_v34 }
  0x23   :  { %339 = vmatprep.subr.bf16.mxu1 %v555_v0  ;;  %314 = vmatmul.mubr.bf16.vlgmr.msra.gmra.mrb[0].mxu0 %v102_v36 }
  0x24   :  { %518 = vmatpush3.bf16.msra.mxu0 %v553_v37  ;;  %519 = vmatprep.mubr.msk.bf16.mxu0 %vm558_vm1, %v557_v39 }
  0x26   :  { %340 = vmatpush1.bf16.msra.mxu1 %v552_v38 }
  0x27   :  { %341 = vmatprep.subr.bf16.mxu1 %v555_v0 }
  0x2a   :  { %342 = vmatpush1.bf16.msra.mxu1 %v554_v40 }
  0x2b   :  { %520 = vmatmul.mubr.msk.bf16.vlgmr.msra.gmra.mrb[4].mxu0 %vm389_vm2, %v380_v42 }
  0x2d   :  { %354 = vmatmul.mubr.bf16.vlgmr.msra.gmra.mrb[0].mxu1 %v110_v41 }
  0xf6   :  { %v509_v43 = vpop.f32.mrb[0].mxu0 }
  0xf7   :  { %v510_v44 = vpop.f32.mrb[1].mxu0 }
  0xf8   :  { %v511_v45 = vadd.f32 %v510_v44, %v509_v43  ;;  %v512_v46 = vpop.f32.mrb[2].mxu0 }
  0xf9   :  { %v513_v47 = vpop.f32.mrb[3].mxu0 }
  0xfe   :  { %v427_v49 = vpop.f32.mrb[4].mxu0 }
  0xff   :  { %v440_v53 = vmul.f32 %v491_v48, %v427_v49  ;;  %v521_v54 = vpop.f32.mrb[5].mxu0 }
 0x100   :  { %v355_v51 = vpop.f32.mrb[0].mxu1  ;;  %v430_v57 = vpop.f32.mrb[6].mxu0 }
 0x101   :  { %v356_v55 = vadd.f32 %v511_v45, %v355_v51  ;;  %v357_v56 = vpop.f32.mrb[1].mxu1  ;;  %v448_v59 = vadd.f32 %v492_v50, %v440_v53  ;;  %v522_v61 = vpop.f32.mrb[7].mxu0 }
 0x102   :  { %v358_v60 = vpop.f32.mrb[2].mxu1 }
 0x103   :  { %v368_v62 = vmul.f32 %v487_v52, %v356_v55  ;;  %v359_v63 = vpop.f32.mrb[3].mxu1  ;;  %449 = vst.msk [vmem:[%s736_s9] sm:$0x3] %vm378_vm3, %v448_v59 }
 0x105   :  { %v376_v0 = vadd.f32 %v488_v58, %v368_v62 }
 0x107   :  { %v377_v1 = vmax.f32 %v376_v0, 0.0 }
 0x109   :  { %379 = vst.msk [vmem:[%s737_s8] sm:$0x3] %vm378_vm3, %v377_v1 }

// kernel: interactive_hnn_forward.17
= control target key start
LH: loop header
LB: loop body
LE: loop exit
PB: predicated region body
PF: predicated region fallthrough
CT: control target
= control target key end

     0   :  { %v902_v22 = vmov 1966171168   ;;  %v135_v24 = vlaneseq  ;;  %v903_v42 = vmov 0.0   ;;  %vm904_vm0 = vmmov 0   ;;  %s1120_s1 = inlined_call_operand.vmem [shape: bf16[864,32], index: 1, kind: input, shape index: {}]   ;;  %s1121_s0 = inlined_call_operand.vmem [shape: bf16[2,864], index: 0, kind: input, shape index: {}]   ;;  %s1122_s2 = inlined_call_operand.vmem [shape: f32[1,32], index: 2, kind: input, shape index: {}]   ;;  %s1123_s3 = inlined_call_operand.vmem [shape: f32[1,32], index: 3, kind: input, shape index: {}]   ;;  %s1124_s4 = inlined_call_operand.vmem [shape: f32[2,32], index: 4, kind: input, shape index: {}]   ;;  %s1125_s5 = inlined_call_operand.vmem [shape: f32[2,32], index: 5, kind: output, shape index: {}]  }
   0x1   :  { %v847_v0 = vld [vmem:[%s1120_s1 + $0x40] sm:$0xff]   ;;  %v851_v4 = vld [vmem:[%s1120_s1 + $0x48] sm:$0xff]   ;;  %v855_v8 = vld [vmem:[%s1120_s1 + $0x50] sm:$0xff]   ;;  %v133_v23 = vunpack.c.l.s4 %v902_v22  ;;  %vm509_vm1 = vcmask 785408   ;;  %vm692_vm2 = vcmask 254976  }
   0x2   :  { %v848_v1 = vld [vmem:[%s1120_s1 + $0xc0] sm:$0xff]   ;;  %755 = vmatprep.subr.bf16.mxu0 %v847_v0  ;;  %v852_v5 = vld [vmem:[%s1120_s1 + $0xc8] sm:$0xff]   ;;  %v856_v9 = vld [vmem:[%s1120_s1 + $0xd0] sm:$0xff]   ;;  %v136_v30 = vshrl.u32 %v135_v24, 7 }
   0x3   :  { %v849_v2 = vld [vmem:[%s1120_s1] sm:$0xff]   ;;  %777 = vmatprep.subr.bf16.mxu1 %v848_v1  ;;  %v853_v6 = vld [vmem:[%s1120_s1 + $0x8] sm:$0xff]   ;;  %v857_v10 = vld [vmem:[%s1120_s1 + $0x10] sm:$0xff]   ;;  %v134_v29 = vunpack.c.0.s8 %v133_v23 }
   0x4   :  { %v850_v3 = vld [vmem:[%s1120_s1 + $0x80] sm:$0xff]   ;;  %756 = vmatpush3.bf16.msra.mxu0 %v849_v2  ;;  %v854_v7 = vld [vmem:[%s1120_s1 + $0x88] sm:$0xff]   ;;  %v858_v11 = vld [vmem:[%s1120_s1 + $0x90] sm:$0xff]  }
   0x5   :  { %778 = vmatpush3.bf16.msra.mxu1 %v850_v3  ;;  %757 = vmatprep.subr.bf16.mxu0 %v851_v4  ;;  %v859_v12 = vld [vmem:[%s1120_s1 + $0x58] sm:$0xff]   ;;  %v863_v16 = vld [vmem:[%s1120_s1 + $0x60] sm:$0xff]   ;;  %v867_v20 = vld [vmem:[%s1120_s1 + $0x68] sm:$0xff]   ;;  %v1025_v35 = vsub.s32 %v134_v29, %v136_v30 }
   0x6   :  { %779 = vmatprep.subr.bf16.mxu1 %v852_v5  ;;  %v860_v13 = vld [vmem:[%s1120_s1 + $0xd8] sm:$0xff]   ;;  %v864_v17 = vld [vmem:[%s1120_s1 + $0xe0] sm:$0xff]   ;;  %v868_v21 = vld [vmem:[%s1120_s1 + $0xe8] sm:$0xff]  }
   0x7   :  { %v861_v14 = vld [vmem:[%s1120_s1 + $0x18] sm:$0xff]   ;;  %v865_v18 = vld [vmem:[%s1120_s1 + $0x20] sm:$0xff]   ;;  %v869_v25 = vld [vmem:[%s1120_s1 + $0x28] sm:$0xff]  }
   0x8   :  { %758 = vmatpush3.bf16.msra.mxu0 %v853_v6  ;;  %v862_v15 = vld [vmem:[%s1120_s1 + $0x98] sm:$0xff]   ;;  %v866_v19 = vld [vmem:[%s1120_s1 + $0xa0] sm:$0xff]   ;;  %v870_v26 = vld [vmem:[%s1120_s1 + $0xa8] sm:$0xff]  }
   0x9   :  { %780 = vmatpush3.bf16.msra.mxu1 %v854_v7  ;;  %759 = vmatprep.subr.bf16.mxu0 %v855_v8  ;;  %v871_v27 = vld [vmem:[%s1120_s1 + $0x70] sm:$0xff]   ;;  %v875_v33 = vld [vmem:[%s1120_s1 + $0x78] sm:$0xff]   ;;  %v21_v38 = vld [vmem:[%s1121_s0] sm:$0x7f] }
   0xa   :  { %781 = vmatprep.subr.bf16.mxu1 %v856_v9  ;;  %v872_v28 = vld [vmem:[%s1120_s1 + $0xf0] sm:$0xff]   ;;  %v876_v34 = vld [vmem:[%s1120_s1 + $0xf8] sm:$0xff]   ;;  %v131_v39 = vcombine.high %v21_v38, %v21_v38  ;;  %v138_v40 = vrot.slane %v21_v38, %v1025_v35  ;;  %v880_v41 = vld [vmem:[%s1120_s1 + $0x140] sm:$0xff]  }
   0xb   :  { %v873_v31 = vld [vmem:[%s1120_s1 + $0x30] sm:$0xff]   ;;  %v877_v36 = vld [vmem:[%s1120_s1 + $0x38] sm:$0xff]   ;;  %v881_v47 = vld [vmem:[%s1120_s1 + $0x100] sm:$0xff]  }
   0xc   :  { %760 = vmatpush3.bf16.msra.mxu0 %v857_v10  ;;  %v874_v32 = vld [vmem:[%s1120_s1 + $0xb0] sm:$0xff]   ;;  %v878_v37 = vld [vmem:[%s1120_s1 + $0xb8] sm:$0xff]   ;;  %v146_v43 = vcombine.high %v138_v40, %v138_v40  ;;  %v154_v44 = vrot.slane %v138_v40, %v1025_v35  ;;  %v145_v45 = vrot.slane %v131_v39, %v1025_v35  ;;  %v882_v50 = vld [vmem:[%s1120_s1 + $0x148] sm:$0xff]  }
   0xd   :  { %782 = vmatpush3.bf16.msra.mxu1 %v858_v11  ;;  %761 = vmatprep.subr.bf16.mxu0 %v859_v12  ;;  %v886_v52 = vld [vmem:[%s1120_s1 + $0x180] sm:$0xff]   ;;  %v883_v54 = vld [vmem:[%s1120_s1 + $0x108] sm:$0xff]   ;;  %v884_v55 = vld [vmem:[%s1120_s1 + $0x150] sm:$0xff]  }
   0xe   :  { %783 = vmatprep.subr.bf16.mxu1 %v860_v13  ;;  %v168_v46 = vrot.slane %v146_v43, %v1025_v35  ;;  %v147_v48 = vcombine.high %v145_v45, %v145_v45  ;;  %v176_v49 = vcombine.high %v154_v44, %v154_v44  ;;  %v889_v56 = vld [vmem:[%s1120_s1 + $0x188] sm:$0xff]   ;;  %v885_v57 = vld [vmem:[%s1120_s1 + $0x110] sm:$0xff]   ;;  %v887_v58 = vld [vmem:[%s1120_s1 + $0x158] sm:$0xff]   ;;  %v161_v4 = vrot.slane %v145_v45, %v1025_v35 }
   0xf   :  { %v892_v59 = vld [vmem:[%s1120_s1 + $0x190] sm:$0xff]   ;;  %v888_v60 = vld [vmem:[%s1120_s1 + $0x118] sm:$0xff]   ;;  %v890_v61 = vld [vmem:[%s1120_s1 + $0x160] sm:$0xff]  }
  0x10   :  { %762 = vmatpush3.bf16.msra.mxu0 %v861_v14  ;;  %545 = vmatprep.mubr.bf16.mxu0 %v168_v46  ;;  %v178_v51 = vcombine.high %v168_v46, %v168_v46  ;;  %v175_v53 = vrot.slane %v147_v48, %v1025_v35  ;;  %v895_v62 = vld [vmem:[%s1120_s1 + $0x198] sm:$0xff]   ;;  %v891_v63 = vld [vmem:[%s1120_s1 + $0x120] sm:$0xff]   ;;  %v893_v0 = vld [vmem:[%s1120_s1 + $0x168] sm:$0xff]   ;;  %v177_v8 = vcombine.high %v161_v4, %v161_v4 }
  0x11   :  { %784 = vmatpush3.bf16.msra.mxu1 %v862_v15  ;;  %763 = vmatprep.subr.bf16.mxu0 %v863_v16  ;;  %v898_v1 = vld [vmem:[%s1120_s1 + $0x1a0] sm:$0xff]   ;;  %v894_v2 = vld [vmem:[%s1120_s1 + $0x128] sm:$0xff]   ;;  %v896_v3 = vld [vmem:[%s1120_s1 + $0x170] sm:$0xff]  }
  0x12   :  { %785 = vmatprep.subr.bf16.mxu1 %v864_v17  ;;  %585 = vmatprep.mubr.bf16.mxu1 %v178_v51  ;;  %v901_v5 = vld [vmem:[%s1120_s1 + $0x1a8] sm:$0xff]   ;;  %v897_v6 = vld [vmem:[%s1120_s1 + $0x130] sm:$0xff]   ;;  %v899_v7 = vld [vmem:[%s1120_s1 + $0x178] sm:$0xff]  }
  0x13   :  { %v900_v9 = vld [vmem:[%s1120_s1 + $0x138] sm:$0xff]   ;;  %v689_v35 = vld [vmem:[%s1124_s4] sm:$0x3] }
  0x14   :  { %764 = vmatpush3.bf16.msra.mxu0 %v865_v18 }
  0x15   :  { %786 = vmatpush3.bf16.msra.mxu1 %v866_v19  ;;  %765 = vmatprep.subr.bf16.mxu0 %v867_v20 }
  0x16   :  { %787 = vmatprep.subr.bf16.mxu1 %v868_v21 }
  0x18   :  { %766 = vmatpush3.bf16.msra.mxu0 %v869_v25 }
  0x19   :  { %788 = vmatpush3.bf16.msra.mxu1 %v870_v26  ;;  %767 = vmatprep.subr.bf16.mxu0 %v871_v27 }
  0x1a   :  { %789 = vmatprep.subr.bf16.mxu1 %v872_v28 }
  0x1c   :  { %768 = vmatpush3.bf16.msra.mxu0 %v873_v31  ;;  %v753_v31 = vld [vmem:[%s1122_s2] ss:$0 sm:$0xff] }
  0x1d   :  { %790 = vmatpush3.bf16.msra.mxu1 %v874_v32  ;;  %769 = vmatprep.subr.bf16.mxu0 %v875_v33  ;;  %v754_v33 = vld [vmem:[%s1123_s3] ss:$0 sm:$0xff] }
  0x1e   :  { %791 = vmatprep.subr.bf16.mxu1 %v876_v34 }
  0x20   :  { %770 = vmatpush3.bf16.msra.mxu0 %v877_v36 }
  0x21   :  { %792 = vmatpush3.bf16.msra.mxu1 %v878_v37  ;;  %799 = vmatprep.subr.bf16.mxu0 %v880_v41 }
  0x22   :  { %828 = vmatprep.subr.bf16.mxu1 %v903_v42 }
  0x23   :  { %546 = vmatmul.mubr.bf16.vlgmr.msra.gmra.mrb[0].mxu0 %v154_v44 }
  0x24   :  { %800 = vmatpush3.bf16.msra.mxu0 %v881_v47  ;;  %586 = vmatmul.mubr.bf16.vlgmr.msra.gmra.mrb[0].mxu1 %v176_v49 }
  0x25   :  { %801 = vmatprep.subr.bf16.mxu0 %v882_v50  ;;  %829 = vmatpush3.bf16.msra.mxu1 %v886_v52 }
  0x26   :  { %625 = vmatprep.mubr.bf16.mxu0 %v175_v53  ;;  %830 = vmatprep.subr.bf16.mxu1 %v903_v42 }
  0x27   :  { %840 = vmatprep.mubr.msk.bf16.mxu1 %vm904_vm0, %v903_v42 }
  0x28   :  { %802 = vmatpush3.bf16.msra.mxu0 %v883_v54 }
  0x29   :  { %803 = vmatprep.subr.bf16.mxu0 %v884_v55  ;;  %831 = vmatpush3.bf16.msra.mxu1 %v889_v56 }
  0x2a   :  { %832 = vmatprep.subr.bf16.mxu1 %v903_v42 }
  0x2c   :  { %804 = vmatpush3.bf16.msra.mxu0 %v885_v57 }
  0x2d   :  { %805 = vmatprep.subr.bf16.mxu0 %v887_v58  ;;  %833 = vmatpush3.bf16.msra.mxu1 %v892_v59 }
  0x2e   :  { %834 = vmatprep.subr.bf16.mxu1 %v903_v42 }
  0x30   :  { %806 = vmatpush3.bf16.msra.mxu0 %v888_v60 }
  0x31   :  { %807 = vmatprep.subr.bf16.mxu0 %v890_v61  ;;  %835 = vmatpush3.bf16.msra.mxu1 %v895_v62 }
  0x32   :  { %836 = vmatprep.subr.bf16.mxu1 %v903_v42 }
  0x34   :  { %808 = vmatpush3.bf16.msra.mxu0 %v891_v63 }
  0x35   :  { %809 = vmatprep.subr.bf16.mxu0 %v893_v0  ;;  %837 = vmatpush3.bf16.msra.mxu1 %v898_v1 }
  0x36   :  { %838 = vmatprep.subr.bf16.mxu1 %v903_v42 }
  0x38   :  { %810 = vmatpush3.bf16.msra.mxu0 %v894_v2 }
  0x39   :  { %811 = vmatprep.subr.bf16.mxu0 %v896_v3  ;;  %839 = vmatpush3.bf16.msra.mxu1 %v901_v5 }
  0x3c   :  { %812 = vmatpush3.bf16.msra.mxu0 %v897_v6  ;;  %841 = vmatmul.mubr.msk.bf16.vlgmr.msra.gmra.mrb[4].mxu1 %vm509_vm1, %v177_v8 }
  0x3d   :  { %813 = vmatprep.subr.bf16.mxu0 %v899_v7 }
  0x40   :  { %814 = vmatpush3.bf16.msra.mxu0 %v900_v9 }
  0x43   :  { %626 = vmatmul.mubr.bf16.vlgmr.msra.gmra.mrb[4].mxu0 %v161_v4 }
  0xf6   :  { %v771_v10 = vpop.f32.mrb[0].mxu0 }
  0xf7   :  { %v772_v11 = vpop.f32.mrb[1].mxu0  ;;  %v793_v12 = vpop.f32.mrb[0].mxu1 }
  0xf8   :  { %v773_v13 = vadd.f32 %v772_v11, %v771_v10  ;;  %v774_v14 = vpop.f32.mrb[2].mxu0  ;;  %v794_v15 = vpop.f32.mrb[1].mxu1 }
  0xf9   :  { %v775_v16 = vpop.f32.mrb[3].mxu0  ;;  %v795_v17 = vadd.f32 %v794_v15, %v793_v12  ;;  %v796_v18 = vpop.f32.mrb[2].mxu1 }
  0xfa   :  { %v797_v19 = vpop.f32.mrb[3].mxu1 }
  0xfb   :  { %v588_v20 = vadd.f32 %v795_v17, %v773_v13 }
 0x10f   :  { %v667_v21 = vpop.f32.mrb[4].mxu1 }
 0x110   :  { %v842_v22 = vpop.f32.mrb[5].mxu1 }
 0x111   :  { %v670_v23 = vpop.f32.mrb[6].mxu1 }
 0x112   :  { %v843_v24 = vpop.f32.mrb[7].mxu1 }
 0x116   :  { %v815_v25 = vpop.f32.mrb[4].mxu0 }
 0x117   :  { %v816_v26 = vpop.f32.mrb[5].mxu0 }
 0x118   :  { %v817_v27 = vadd.f32 %v816_v26, %v815_v25  ;;  %v818_v28 = vpop.f32.mrb[6].mxu0 }
 0x119   :  { %v819_v29 = vpop.f32.mrb[7].mxu0 }
 0x11a   :  { %v628_v30 = vadd.f32 %v817_v27, %v588_v20 }
 0x11c   :  { %v668_v32 = vadd.f32 %v667_v21, %v628_v30 }
 0x11e   :  { %v680_v34 = vmul.f32 %v753_v31, %v668_v32 }
 0x120   :  { %v688_v36 = vadd.f32 %v754_v33, %v680_v34 }
 0x122   :  { %v690_v37 = vadd.f32 %v689_v35, %v688_v36 }
 0x124   :  { %v691_v38 = vmax.f32 %v690_v37, 0.0 }
 0x126   :  { %693 = vst.msk [vmem:[%s1125_s5] sm:$0x3] %vm692_vm2, %v691_v38 }

</bundles_post_ra>
